<compile_context>
chip_gen: v5e
topology: v5e:2x2
jax: 0.10.0
libtpu: 0.0.40
codegen_flags: <defaults>
</compile_context>

<pallas_src>
import jax
import jax.numpy as jnp
from jax.experimental import pallas as pl
from jax.experimental.pallas import tpu as pltpu

HIDDEN = 2 * 4 * 8          # 64
FLAT = 4 * 4 * 64           # 1024
N_ACT = 3
NG = 4 * HIDDEN             # 256: fused gate width, order i|f|g|o
CANVAS = 7 * 7              # every activation lives on a padded 7x7 spatial canvas
KOFF = (0, 1, 7, 8)         # canvas row offset of 2x2 tap k = ky*2 + kx


# ------------------------- fused Pallas kernel -------------------------

def fused_net_kernel(x_ref, h_ref, c_ref,
                     w1_ref, b1_ref, w2_ref, b2_ref, w3_ref, b3_ref,
                     wx_ref, wh_ref, bl_ref, fcw_ref, fcb_ref,
                     out_ref, h1_ref, c1_ref,
                     a1_ref, a2_ref, a3_ref):
    """conv1..conv3 + flatten + LSTMCell + fc, fully resident in VMEM.

    Activations are 2D canvases: rows ordered (b, h, w) on a fixed 7x7 grid,
    channels on lanes.  Valid spatial regions shrink 7x7 -> 6x6 -> 5x5 -> 4x4;
    rows outside the valid region are over-computed garbage that never feeds a
    valid downstream row (matmul rows are independent).
    """
    B = h_ref.shape[0]
    n3 = B * CANVAS            # rows carrying conv3 output
    n2 = n3 + 8                # conv2 computes 8 extra rows so conv3's shifted reads stay in-bounds
    n1 = n2 + 8                # likewise for conv1 (x is zero-padded by 24 rows host-side)

    def conv_layer(in_ref, w_ref, b_ref, o_ref, n_out):
        """relu(conv2x2 + bias) over the whole padded canvas: 4 accumulated GEMMs."""
        bias = b_ref[...]                                     # hoisted: loaded once per layer
        acc = jnp.dot(in_ref[0:n_out, :], w_ref[0],
                      preferred_element_type=jnp.float32)
        for k in range(1, 4):
            acc = acc + jnp.dot(in_ref[KOFF[k]:KOFF[k] + n_out, :], w_ref[k],
                                preferred_element_type=jnp.float32)
        o_ref[0:n_out, :] = jnp.maximum(acc + bias, 0.0)

    conv_layer(x_ref, w1_ref, b1_ref, a1_ref, n1)             # (., 3)  -> (., 16)
    conv_layer(a1_ref, w2_ref, b2_ref, a2_ref, n2)            # (., 16) -> (., 32)
    conv_layer(a2_ref, w3_ref, b3_ref, a3_ref, n3)            # (., 32) -> (., 64)

    # ---- LSTM cell: gates = x @ Wx + h @ Wh + b, gate order i|f|g|o ----------
    # The x @ Wx term is a 16-step accumulated (B,64)@(64,256) dot: pixel (ph,pw)
    # of every image sits at canvas rows b*49 + ph*7 + pw (stride-49 row load).
    # Wx/Wh are stored bf16 (DMA win) and upcast here; math stays f32.
    gates = (jnp.dot(h_ref[...], wh_ref[...].astype(jnp.float32),
                     preferred_element_type=jnp.float32) + bl_ref[...])
    for ph in range(4):
        for pw in range(4):
            xp = a3_ref[pl.ds(ph * 7 + pw, B, stride=CANVAS), :]       # (B, 64)
            wp = wx_ref[ph * 4 + pw].astype(jnp.float32)               # (64, 256)
            gates = gates + jnp.dot(xp, wp, preferred_element_type=jnp.float32)

    def sigmoid(z):
        # == 1/(1+exp(-z)), but saturates without intermediate inf and runs on
        # the (otherwise idle) EUP tanh unit.
        return 0.5 * (jnp.tanh(0.5 * z) + 1.0)

    i_g = sigmoid(gates[:, 0 * HIDDEN:1 * HIDDEN])
    f_g = sigmoid(gates[:, 1 * HIDDEN:2 * HIDDEN])
    g_g = jnp.tanh(gates[:, 2 * HIDDEN:3 * HIDDEN])
    o_g = sigmoid(gates[:, 3 * HIDDEN:4 * HIDDEN])

    c_new = f_g * c_ref[...] + i_g * g_g
    h_new = o_g * jnp.tanh(c_new)
    c1_ref[...] = c_new
    h1_ref[...] = h_new

    logits = jnp.dot(h_new, fcw_ref[...], preferred_element_type=jnp.float32) + fcb_ref[...]
    out_ref[...] = jnp.maximum(logits, 0.0)


# ------------------------- host-side wrapper -------------------------

def net_forward(params, x_nchw, hidden_states):
    h0, c0 = hidden_states
    B = x_nchw.shape[0]
    rows = B * CANVAS
    # NCHW -> canvas rows (b, h, w) x channels; zero-pad 24 rows so the deepest
    # shifted conv read (offset 8 per layer, 3 layers) stays in-bounds.
    x2d = jnp.transpose(x_nchw, (0, 2, 3, 1)).reshape(rows, 3)
    x_canvas = jnp.pad(x2d, ((0, 24), (0, 0)))

    vspec = pl.BlockSpec(memory_space=pltpu.MemorySpace.VMEM)
    out, h1, c1 = pl.pallas_call(
        fused_net_kernel,
        out_shape=(jax.ShapeDtypeStruct((B, N_ACT), jnp.float32),
                   jax.ShapeDtypeStruct((B, HIDDEN), jnp.float32),
                   jax.ShapeDtypeStruct((B, HIDDEN), jnp.float32)),
        in_specs=[vspec] * 14,
        out_specs=(vspec, vspec, vspec),
        scratch_shapes=[pltpu.VMEM((rows + 16, 16), jnp.float32),   # conv1 canvas
                        pltpu.VMEM((rows + 8, 32), jnp.float32),    # conv2 canvas
                        pltpu.VMEM((rows, 64), jnp.float32)],       # conv3 canvas
    )(x_canvas, h0, c0,
      params["w1"], params["b1"], params["w2"], params["b2"],
      params["w3"], params["b3"],
      params["wx"], params["wh"], params["bl"],
      params["fcw"], params["fcb"])
    return out, (h1, c1)


# ------------------------- parameters -------------------------

def init_params(key):
    """Deterministic synthetic parameters in PyTorch layout (`raw`), plus the
    kernel-layout versions (`params`)."""
    ks = jax.random.split(key, 12)

    def u(k, shape, fan_in):
        bound = 1.0 / jnp.sqrt(jnp.float32(fan_in))
        return jax.random.uniform(k, shape, jnp.float32, -bound, bound)

    raw = dict(
        w1=u(ks[0], (16, 3, 2, 2), 3 * 4),    b1=u(ks[1], (16,), 3 * 4),
        w2=u(ks[2], (32, 16, 2, 2), 16 * 4),  b2=u(ks[3], (32,), 16 * 4),
        w3=u(ks[4], (64, 32, 2, 2), 32 * 4),  b3=u(ks[5], (64,), 32 * 4),
        w_ih=u(ks[6], (NG, FLAT), HIDDEN),    w_hh=u(ks[7], (NG, HIDDEN), HIDDEN),
        b_ih=u(ks[8], (NG,), HIDDEN),         b_hh=u(ks[9], (NG,), HIDDEN),
        fc_w=u(ks[10], (N_ACT, HIDDEN), HIDDEN), fc_b=u(ks[11], (N_ACT,), HIDDEN),
    )

    def conv_k(w):            # (Co, Ci, 2, 2) -> (4, Ci, Co), k = ky*2 + kx
        co, ci = w.shape[0], w.shape[1]
        return jnp.transpose(w, (2, 3, 1, 0)).reshape(4, ci, co)

    # LSTM input weight: (256, 1024) with torch column index c*16 + (h*4 + w)
    #   -> (16 pixels, 64 channels, 256 gates).  The NCHW flatten of
    #      x.view(B, -1) is thereby folded into the weight (no runtime scatter).
    wx = raw["w_ih"].T.reshape(HIDDEN, 16, NG).transpose(1, 0, 2)    # (16, 64, 256)

    params = dict(
        w1=conv_k(raw["w1"]), b1=raw["b1"].reshape(1, 16),
        w2=conv_k(raw["w2"]), b2=raw["b2"].reshape(1, 32),
        w3=conv_k(raw["w3"]), b3=raw["b3"].reshape(1, 64),
        wx=wx.astype(jnp.bfloat16),              # bf16 storage: halves the big weight DMA
        wh=raw["w_hh"].T.astype(jnp.bfloat16),
        bl=(raw["b_ih"] + raw["b_hh"]).reshape(1, NG),
        fcw=raw["fc_w"].T,
        fcb=raw["fc_b"].reshape(1, N_ACT),
    )
    return params, raw


# ------------------------- pure-JAX reference (PyTorch semantics) -------------------------

def reference_forward(raw, x, h0, c0, quantize_lstm_weights=False):
    hp = jax.lax.Precision.HIGHEST
    w_ih, w_hh = raw["w_ih"], raw["w_hh"]
    if quantize_lstm_weights:
        # mirror the kernel's bf16 storage of the LSTM weights (f32 math otherwise)
        w_ih = w_ih.astype(jnp.bfloat16).astype(jnp.float32)
        w_hh = w_hh.astype(jnp.bfloat16).astype(jnp.float32)

    def conv(y, w, b):
        y = jax.lax.conv_general_dilated(
            y, w, window_strides=(1, 1), padding="VALID",
            dimension_numbers=("NCHW", "OIHW", "NCHW"), precision=hp)
        return jnp.maximum(y + b.reshape(1, -1, 1, 1), 0.0)

    y = conv(x, raw["w1"], raw["b1"])
    y = conv(y, raw["w2"], raw["b2"])
    y = conv(y, raw["w3"], raw["b3"])
    xf = y.reshape(y.shape[0], -1)                 # NCHW flatten, like torch .view
    gates = (jnp.dot(xf, w_ih.T, precision=hp)
             + jnp.dot(h0, w_hh.T, precision=hp)
             + raw["b_ih"] + raw["b_hh"])
    i, f, g, o = jnp.split(gates, 4, axis=1)
    i = jax.nn.sigmoid(i); f = jax.nn.sigmoid(f)
    g = jnp.tanh(g);       o = jax.nn.sigmoid(o)
    c1 = f * c0 + i * g
    h1 = o * jnp.tanh(c1)
    out = jnp.maximum(jnp.dot(h1, raw["fc_w"].T, precision=hp) + raw["fc_b"], 0.0)
    return out, h1, c1


if __name__ == "__main__":
    key = jax.random.PRNGKey(0)
    kp, kx_, kh, kc = jax.random.split(key, 4)
    params, raw = init_params(kp)

    B = 2
    # input spatial size is dictated by the module: 7x7 -> 6 -> 5 -> 4, 4*4*64 = 1024
    x = jax.random.normal(kx_, (B, 3, 7, 7), jnp.float32)
    h0 = jax.random.normal(kh, (B, HIDDEN), jnp.float32)
    c0 = jax.random.normal(kc, (B, HIDDEN), jnp.float32)

    fwd = jax.jit(net_forward)
    out, (h1, c1) = fwd(params, x, (h0, c0))
    jax.block_until_ready((out, h1, c1))

    assert out.shape == (B, N_ACT) and out.dtype == jnp.float32
    assert h1.shape == (B, HIDDEN) and c1.shape == (B, HIDDEN)
    assert bool(jnp.all(out >= 0.0))               # ReLU output
    assert bool(jnp.all(jnp.isfinite(out)))
    assert bool(jnp.all(jnp.isfinite(h1))) and bool(jnp.all(jnp.isfinite(c1)))

    # (1) tight check vs a reference that uses the same bf16-rounded LSTM weights
    #     the kernel stores (isolates kernel-structure / permutation errors);
    # (2) looser check vs the exact all-f32 PyTorch-semantics reference, where
    #     the residual is the intentional bf16 weight quantization (~1e-3).
    ref_q = reference_forward(raw, x, h0, c0, quantize_lstm_weights=True)
    ref_f = reference_forward(raw, x, h0, c0, quantize_lstm_weights=False)
    for name, got, rq, rf in (("out", out, ref_q[0], ref_f[0]),
                              ("h1", h1, ref_q[1], ref_f[1]),
                              ("c1", c1, ref_q[2], ref_f[2])):
        err_q = float(jnp.max(jnp.abs(got - rq)))
        err_f = float(jnp.max(jnp.abs(got - rf)))
        assert err_q < 5e-3, f"{name}: max abs err {err_q} vs bf16-weight reference"
        assert err_f < 2e-2, f"{name}: max abs err {err_f} vs f32 reference"

    print("KERNEL_OK")
</pallas_src>

<mosaic_0001>
module attributes {stable_mosaic.version = 11 : i64} {
  func.func @fused_net_kernel(%arg0: memref<122x3xf32, #tpu.memory_space<vmem>>, %arg1: memref<2x64xf32, #tpu.memory_space<vmem>>, %arg2: memref<2x64xf32, #tpu.memory_space<vmem>>, %arg3: memref<4x3x16xf32, #tpu.memory_space<vmem>>, %arg4: memref<1x16xf32, #tpu.memory_space<vmem>>, %arg5: memref<4x16x32xf32, #tpu.memory_space<vmem>>, %arg6: memref<1x32xf32, #tpu.memory_space<vmem>>, %arg7: memref<4x32x64xf32, #tpu.memory_space<vmem>>, %arg8: memref<1x64xf32, #tpu.memory_space<vmem>>, %arg9: memref<16x64x256xbf16, #tpu.memory_space<vmem>>, %arg10: memref<64x256xbf16, #tpu.memory_space<vmem>>, %arg11: memref<1x256xf32, #tpu.memory_space<vmem>>, %arg12: memref<64x3xf32, #tpu.memory_space<vmem>>, %arg13: memref<1x3xf32, #tpu.memory_space<vmem>>, %arg14: memref<2x3xf32, #tpu.memory_space<vmem>>, %arg15: memref<2x64xf32, #tpu.memory_space<vmem>>, %arg16: memref<2x64xf32, #tpu.memory_space<vmem>>, %arg17: memref<114x16xf32, #tpu.memory_space<vmem>>, %arg18: memref<106x32xf32, #tpu.memory_space<vmem>>, %arg19: memref<98x64xf32, #tpu.memory_space<vmem>>) attributes {dimension_semantics = [], scalar_prefetch = 0 : i64, scratch_operands = 3 : i64, tpu.core_type = #tpu.core_type<tc>} {
    %c0 = arith.constant 0 : index
    %c0_0 = arith.constant 0 : index
    %0 = vector.load %arg4[%c0, %c0_0] : memref<1x16xf32, #tpu.memory_space<vmem>>, vector<1x16xf32>
    %c0_1 = arith.constant 0 : index
    %c0_2 = arith.constant 0 : index
    %1 = vector.load %arg0[%c0_1, %c0_2] : memref<122x3xf32, #tpu.memory_space<vmem>>, vector<114x3xf32>
    %c0_3 = arith.constant 0 : index
    %c0_4 = arith.constant 0 : index
    %c0_5 = arith.constant 0 : index
    %2 = vector.load %arg3[%c0_3, %c0_4, %c0_5] : memref<4x3x16xf32, #tpu.memory_space<vmem>>, vector<1x3x16xf32>
    %3 = vector.shape_cast %2 : vector<1x3x16xf32> to vector<3x16xf32>
    %cst = arith.constant dense<0.000000e+00> : vector<114x16xf32>
    %4 = tpu.matmul %1, %3, %cst {dimension_numbers = #tpu.dot_dimension_numbers<[1], [0], [0], [1], [0, 0, 1, 1], [], []>} : vector<114x3xf32>, vector<3x16xf32>, vector<114x16xf32> -> vector<114x16xf32>
    %c1 = arith.constant 1 : index
    %c0_6 = arith.constant 0 : index
    %5 = vector.load %arg0[%c1, %c0_6] : memref<122x3xf32, #tpu.memory_space<vmem>>, vector<114x3xf32>
    %c1_7 = arith.constant 1 : index
    %c0_8 = arith.constant 0 : index
    %c0_9 = arith.constant 0 : index
    %6 = vector.load %arg3[%c1_7, %c0_8, %c0_9] : memref<4x3x16xf32, #tpu.memory_space<vmem>>, vector<1x3x16xf32>
    %7 = vector.shape_cast %6 : vector<1x3x16xf32> to vector<3x16xf32>
    %cst_10 = arith.constant dense<0.000000e+00> : vector<114x16xf32>
    %8 = tpu.matmul %5, %7, %cst_10 {dimension_numbers = #tpu.dot_dimension_numbers<[1], [0], [0], [1], [0, 0, 1, 1], [], []>} : vector<114x3xf32>, vector<3x16xf32>, vector<114x16xf32> -> vector<114x16xf32>
    %9 = arith.addf %4, %8 : vector<114x16xf32>
    %c7 = arith.constant 7 : index
    %c0_11 = arith.constant 0 : index
    %10 = vector.load %arg0[%c7, %c0_11] : memref<122x3xf32, #tpu.memory_space<vmem>>, vector<114x3xf32>
    %c2 = arith.constant 2 : index
    %c0_12 = arith.constant 0 : index
    %c0_13 = arith.constant 0 : index
    %11 = vector.load %arg3[%c2, %c0_12, %c0_13] : memref<4x3x16xf32, #tpu.memory_space<vmem>>, vector<1x3x16xf32>
    %12 = vector.shape_cast %11 : vector<1x3x16xf32> to vector<3x16xf32>
    %cst_14 = arith.constant dense<0.000000e+00> : vector<114x16xf32>
    %13 = tpu.matmul %10, %12, %cst_14 {dimension_numbers = #tpu.dot_dimension_numbers<[1], [0], [0], [1], [0, 0, 1, 1], [], []>} : vector<114x3xf32>, vector<3x16xf32>, vector<114x16xf32> -> vector<114x16xf32>
    %14 = arith.addf %9, %13 : vector<114x16xf32>
    %c8 = arith.constant 8 : index
    %c0_15 = arith.constant 0 : index
    %15 = vector.load %arg0[%c8, %c0_15] : memref<122x3xf32, #tpu.memory_space<vmem>>, vector<114x3xf32>
    %c3 = arith.constant 3 : index
    %c0_16 = arith.constant 0 : index
    %c0_17 = arith.constant 0 : index
    %16 = vector.load %arg3[%c3, %c0_16, %c0_17] : memref<4x3x16xf32, #tpu.memory_space<vmem>>, vector<1x3x16xf32>
    %17 = vector.shape_cast %16 : vector<1x3x16xf32> to vector<3x16xf32>
    %cst_18 = arith.constant dense<0.000000e+00> : vector<114x16xf32>
    %18 = tpu.matmul %15, %17, %cst_18 {dimension_numbers = #tpu.dot_dimension_numbers<[1], [0], [0], [1], [0, 0, 1, 1], [], []>} : vector<114x3xf32>, vector<3x16xf32>, vector<114x16xf32> -> vector<114x16xf32>
    %19 = arith.addf %14, %18 : vector<114x16xf32>
    %20 = vector.broadcast %0 : vector<1x16xf32> to vector<114x16xf32>
    %21 = arith.addf %19, %20 : vector<114x16xf32>
    %cst_19 = arith.constant 0.000000e+00 : f32
    %22 = vector.broadcast %cst_19 : f32 to vector<114x16xf32>
    %23 = arith.maximumf %21, %22 : vector<114x16xf32>
    %c0_20 = arith.constant 0 : index
    %c0_21 = arith.constant 0 : index
    %24 = vector.load %arg17[%c0_20, %c0_21] : memref<114x16xf32, #tpu.memory_space<vmem>>, vector<114x16xf32>
    tpu.vector_store %arg17[%c0_20, %c0_21], %23 {strides = array<i32>} : memref<114x16xf32, #tpu.memory_space<vmem>>, vector<114x16xf32>,
    %c0_22 = arith.constant 0 : index
    %c0_23 = arith.constant 0 : index
    %25 = vector.load %arg6[%c0_22, %c0_23] : memref<1x32xf32, #tpu.memory_space<vmem>>, vector<1x32xf32>
    %c0_24 = arith.constant 0 : index
    %c0_25 = arith.constant 0 : index
    %26 = vector.load %arg17[%c0_24, %c0_25] : memref<114x16xf32, #tpu.memory_space<vmem>>, vector<106x16xf32>
    %c0_26 = arith.constant 0 : index
    %c0_27 = arith.constant 0 : index
    %c0_28 = arith.constant 0 : index
    %27 = vector.load %arg5[%c0_26, %c0_27, %c0_28] : memref<4x16x32xf32, #tpu.memory_space<vmem>>, vector<1x16x32xf32>
    %28 = vector.shape_cast %27 : vector<1x16x32xf32> to vector<16x32xf32>
    %cst_29 = arith.constant dense<0.000000e+00> : vector<106x32xf32>
    %29 = tpu.matmul %26, %28, %cst_29 {dimension_numbers = #tpu.dot_dimension_numbers<[1], [0], [0], [1], [0, 0, 1, 1], [], []>} : vector<106x16xf32>, vector<16x32xf32>, vector<106x32xf32> -> vector<106x32xf32>
    %c1_30 = arith.constant 1 : index
    %c0_31 = arith.constant 0 : index
    %30 = vector.load %arg17[%c1_30, %c0_31] : memref<114x16xf32, #tpu.memory_space<vmem>>, vector<106x16xf32>
    %c1_32 = arith.constant 1 : index
    %c0_33 = arith.constant 0 : index
    %c0_34 = arith.constant 0 : index
    %31 = vector.load %arg5[%c1_32, %c0_33, %c0_34] : memref<4x16x32xf32, #tpu.memory_space<vmem>>, vector<1x16x32xf32>
    %32 = vector.shape_cast %31 : vector<1x16x32xf32> to vector<16x32xf32>
    %cst_35 = arith.constant dense<0.000000e+00> : vector<106x32xf32>
    %33 = tpu.matmul %30, %32, %cst_35 {dimension_numbers = #tpu.dot_dimension_numbers<[1], [0], [0], [1], [0, 0, 1, 1], [], []>} : vector<106x16xf32>, vector<16x32xf32>, vector<106x32xf32> -> vector<106x32xf32>
    %34 = arith.addf %29, %33 : vector<106x32xf32>
    %c7_36 = arith.constant 7 : index
    %c0_37 = arith.constant 0 : index
    %35 = vector.load %arg17[%c7_36, %c0_37] : memref<114x16xf32, #tpu.memory_space<vmem>>, vector<106x16xf32>
    %c2_38 = arith.constant 2 : index
    %c0_39 = arith.constant 0 : index
    %c0_40 = arith.constant 0 : index
    %36 = vector.load %arg5[%c2_38, %c0_39, %c0_40] : memref<4x16x32xf32, #tpu.memory_space<vmem>>, vector<1x16x32xf32>
    %37 = vector.shape_cast %36 : vector<1x16x32xf32> to vector<16x32xf32>
    %cst_41 = arith.constant dense<0.000000e+00> : vector<106x32xf32>
    %38 = tpu.matmul %35, %37, %cst_41 {dimension_numbers = #tpu.dot_dimension_numbers<[1], [0], [0], [1], [0, 0, 1, 1], [], []>} : vector<106x16xf32>, vector<16x32xf32>, vector<106x32xf32> -> vector<106x32xf32>
    %39 = arith.addf %34, %38 : vector<106x32xf32>
    %c8_42 = arith.constant 8 : index
    %c0_43 = arith.constant 0 : index
    %40 = vector.load %arg17[%c8_42, %c0_43] : memref<114x16xf32, #tpu.memory_space<vmem>>, vector<106x16xf32>
    %c3_44 = arith.constant 3 : index
    %c0_45 = arith.constant 0 : index
    %c0_46 = arith.constant 0 : index
    %41 = vector.load %arg5[%c3_44, %c0_45, %c0_46] : memref<4x16x32xf32, #tpu.memory_space<vmem>>, vector<1x16x32xf32>
    %42 = vector.shape_cast %41 : vector<1x16x32xf32> to vector<16x32xf32>
    %cst_47 = arith.constant dense<0.000000e+00> : vector<106x32xf32>
    %43 = tpu.matmul %40, %42, %cst_47 {dimension_numbers = #tpu.dot_dimension_numbers<[1], [0], [0], [1], [0, 0, 1, 1], [], []>} : vector<106x16xf32>, vector<16x32xf32>, vector<106x32xf32> -> vector<106x32xf32>
    %44 = arith.addf %39, %43 : vector<106x32xf32>
    %45 = vector.broadcast %25 : vector<1x32xf32> to vector<106x32xf32>
    %46 = arith.addf %44, %45 : vector<106x32xf32>
    %cst_48 = arith.constant 0.000000e+00 : f32
    %47 = vector.broadcast %cst_48 : f32 to vector<106x32xf32>
    %48 = arith.maximumf %46, %47 : vector<106x32xf32>
    %c0_49 = arith.constant 0 : index
    %c0_50 = arith.constant 0 : index
    %49 = vector.load %arg18[%c0_49, %c0_50] : memref<106x32xf32, #tpu.memory_space<vmem>>, vector<106x32xf32>
    tpu.vector_store %arg18[%c0_49, %c0_50], %48 {strides = array<i32>} : memref<106x32xf32, #tpu.memory_space<vmem>>, vector<106x32xf32>,
    %c0_51 = arith.constant 0 : index
    %c0_52 = arith.constant 0 : index
    %50 = vector.load %arg8[%c0_51, %c0_52] : memref<1x64xf32, #tpu.memory_space<vmem>>, vector<1x64xf32>
    %c0_53 = arith.constant 0 : index
    %c0_54 = arith.constant 0 : index
    %51 = vector.load %arg18[%c0_53, %c0_54] : memref<106x32xf32, #tpu.memory_space<vmem>>, vector<98x32xf32>
    %c0_55 = arith.constant 0 : index
    %c0_56 = arith.constant 0 : index
    %c0_57 = arith.constant 0 : index
    %52 = vector.load %arg7[%c0_55, %c0_56, %c0_57] : memref<4x32x64xf32, #tpu.memory_space<vmem>>, vector<1x32x64xf32>
    %53 = vector.shape_cast %52 : vector<1x32x64xf32> to vector<32x64xf32>
    %cst_58 = arith.constant dense<0.000000e+00> : vector<98x64xf32>
    %54 = tpu.matmul %51, %53, %cst_58 {dimension_numbers = #tpu.dot_dimension_numbers<[1], [0], [0], [1], [0, 0, 1, 1], [], []>} : vector<98x32xf32>, vector<32x64xf32>, vector<98x64xf32> -> vector<98x64xf32>
    %c1_59 = arith.constant 1 : index
    %c0_60 = arith.constant 0 : index
    %55 = vector.load %arg18[%c1_59, %c0_60] : memref<106x32xf32, #tpu.memory_space<vmem>>, vector<98x32xf32>
    %c1_61 = arith.constant 1 : index
    %c0_62 = arith.constant 0 : index
    %c0_63 = arith.constant 0 : index
    %56 = vector.load %arg7[%c1_61, %c0_62, %c0_63] : memref<4x32x64xf32, #tpu.memory_space<vmem>>, vector<1x32x64xf32>
    %57 = vector.shape_cast %56 : vector<1x32x64xf32> to vector<32x64xf32>
    %cst_64 = arith.constant dense<0.000000e+00> : vector<98x64xf32>
    %58 = tpu.matmul %55, %57, %cst_64 {dimension_numbers = #tpu.dot_dimension_numbers<[1], [0], [0], [1], [0, 0, 1, 1], [], []>} : vector<98x32xf32>, vector<32x64xf32>, vector<98x64xf32> -> vector<98x64xf32>
    %59 = arith.addf %54, %58 : vector<98x64xf32>
    %c7_65 = arith.constant 7 : index
    %c0_66 = arith.constant 0 : index
    %60 = vector.load %arg18[%c7_65, %c0_66] : memref<106x32xf32, #tpu.memory_space<vmem>>, vector<98x32xf32>
    %c2_67 = arith.constant 2 : index
    %c0_68 = arith.constant 0 : index
    %c0_69 = arith.constant 0 : index
    %61 = vector.load %arg7[%c2_67, %c0_68, %c0_69] : memref<4x32x64xf32, #tpu.memory_space<vmem>>, vector<1x32x64xf32>
    %62 = vector.shape_cast %61 : vector<1x32x64xf32> to vector<32x64xf32>
    %cst_70 = arith.constant dense<0.000000e+00> : vector<98x64xf32>
    %63 = tpu.matmul %60, %62, %cst_70 {dimension_numbers = #tpu.dot_dimension_numbers<[1], [0], [0], [1], [0, 0, 1, 1], [], []>} : vector<98x32xf32>, vector<32x64xf32>, vector<98x64xf32> -> vector<98x64xf32>
    %64 = arith.addf %59, %63 : vector<98x64xf32>
    %c8_71 = arith.constant 8 : index
    %c0_72 = arith.constant 0 : index
    %65 = vector.load %arg18[%c8_71, %c0_72] : memref<106x32xf32, #tpu.memory_space<vmem>>, vector<98x32xf32>
    %c3_73 = arith.constant 3 : index
    %c0_74 = arith.constant 0 : index
    %c0_75 = arith.constant 0 : index
    %66 = vector.load %arg7[%c3_73, %c0_74, %c0_75] : memref<4x32x64xf32, #tpu.memory_space<vmem>>, vector<1x32x64xf32>
    %67 = vector.shape_cast %66 : vector<1x32x64xf32> to vector<32x64xf32>
    %cst_76 = arith.constant dense<0.000000e+00> : vector<98x64xf32>
    %68 = tpu.matmul %65, %67, %cst_76 {dimension_numbers = #tpu.dot_dimension_numbers<[1], [0], [0], [1], [0, 0, 1, 1], [], []>} : vector<98x32xf32>, vector<32x64xf32>, vector<98x64xf32> -> vector<98x64xf32>
    %69 = arith.addf %64, %68 : vector<98x64xf32>
    %70 = vector.broadcast %50 : vector<1x64xf32> to vector<98x64xf32>
    %71 = arith.addf %69, %70 : vector<98x64xf32>
    %cst_77 = arith.constant 0.000000e+00 : f32
    %72 = vector.broadcast %cst_77 : f32 to vector<98x64xf32>
    %73 = arith.maximumf %71, %72 : vector<98x64xf32>
    %c0_78 = arith.constant 0 : index
    %c0_79 = arith.constant 0 : index
    %74 = vector.load %arg19[%c0_78, %c0_79] : memref<98x64xf32, #tpu.memory_space<vmem>>, vector<98x64xf32>
    tpu.vector_store %arg19[%c0_78, %c0_79], %73 {strides = array<i32>} : memref<98x64xf32, #tpu.memory_space<vmem>>, vector<98x64xf32>,
    %c0_80 = arith.constant 0 : index
    %c0_81 = arith.constant 0 : index
    %75 = vector.load %arg1[%c0_80, %c0_81] : memref<2x64xf32, #tpu.memory_space<vmem>>, vector<2x64xf32>
    %c0_82 = arith.constant 0 : index
    %c0_83 = arith.constant 0 : index
    %76 = vector.load %arg10[%c0_82, %c0_83] : memref<64x256xbf16, #tpu.memory_space<vmem>>, vector<64x256xbf16>
    %77 = arith.extf %76 : vector<64x256xbf16> to vector<64x256xf32>
    %cst_84 = arith.constant dense<0.000000e+00> : vector<2x256xf32>
    %78 = tpu.matmul %75, %77, %cst_84 {dimension_numbers = #tpu.dot_dimension_numbers<[1], [0], [0], [1], [0, 0, 1, 1], [], []>} : vector<2x64xf32>, vector<64x256xf32>, vector<2x256xf32> -> vector<2x256xf32>
    %c0_85 = arith.constant 0 : index
    %c0_86 = arith.constant 0 : index
    %79 = vector.load %arg11[%c0_85, %c0_86] : memref<1x256xf32, #tpu.memory_space<vmem>>, vector<1x256xf32>
    %80 = vector.broadcast %79 : vector<1x256xf32> to vector<2x256xf32>
    %81 = arith.addf %78, %80 : vector<2x256xf32>
    %c0_87 = arith.constant 0 : index
    %c0_88 = arith.constant 0 : index
    %82 = tpu.strided_load %arg19[%c0_87, %c0_88] {strides = array<i32: 49, 1>} : memref<98x64xf32, #tpu.memory_space<vmem>>, vector<2x64xf32>
    %c0_89 = arith.constant 0 : index
    %c0_90 = arith.constant 0 : index
    %c0_91 = arith.constant 0 : index
    %83 = vector.load %arg9[%c0_89, %c0_90, %c0_91] : memref<16x64x256xbf16, #tpu.memory_space<vmem>>, vector<1x64x256xbf16>
    %84 = vector.shape_cast %83 : vector<1x64x256xbf16> to vector<64x256xbf16>
    %85 = arith.extf %84 : vector<64x256xbf16> to vector<64x256xf32>
    %cst_92 = arith.constant dense<0.000000e+00> : vector<2x256xf32>
    %86 = tpu.matmul %82, %85, %cst_92 {dimension_numbers = #tpu.dot_dimension_numbers<[1], [0], [0], [1], [0, 0, 1, 1], [], []>} : vector<2x64xf32>, vector<64x256xf32>, vector<2x256xf32> -> vector<2x256xf32>
    %87 = arith.addf %81, %86 : vector<2x256xf32>
    %c1_93 = arith.constant 1 : index
    %c0_94 = arith.constant 0 : index
    %88 = tpu.strided_load %arg19[%c1_93, %c0_94] {strides = array<i32: 49, 1>} : memref<98x64xf32, #tpu.memory_space<vmem>>, vector<2x64xf32>
    %c1_95 = arith.constant 1 : index
    %c0_96 = arith.constant 0 : index
    %c0_97 = arith.constant 0 : index
    %89 = vector.load %arg9[%c1_95, %c0_96, %c0_97] : memref<16x64x256xbf16, #tpu.memory_space<vmem>>, vector<1x64x256xbf16>
    %90 = vector.shape_cast %89 : vector<1x64x256xbf16> to vector<64x256xbf16>
    %91 = arith.extf %90 : vector<64x256xbf16> to vector<64x256xf32>
    %cst_98 = arith.constant dense<0.000000e+00> : vector<2x256xf32>
    %92 = tpu.matmul %88, %91, %cst_98 {dimension_numbers = #tpu.dot_dimension_numbers<[1], [0], [0], [1], [0, 0, 1, 1], [], []>} : vector<2x64xf32>, vector<64x256xf32>, vector<2x256xf32> -> vector<2x256xf32>
    %93 = arith.addf %87, %92 : vector<2x256xf32>
    %c2_99 = arith.constant 2 : index
    %c0_100 = arith.constant 0 : index
    %94 = tpu.strided_load %arg19[%c2_99, %c0_100] {strides = array<i32: 49, 1>} : memref<98x64xf32, #tpu.memory_space<vmem>>, vector<2x64xf32>
    %c2_101 = arith.constant 2 : index
    %c0_102 = arith.constant 0 : index
    %c0_103 = arith.constant 0 : index
    %95 = vector.load %arg9[%c2_101, %c0_102, %c0_103] : memref<16x64x256xbf16, #tpu.memory_space<vmem>>, vector<1x64x256xbf16>
    %96 = vector.shape_cast %95 : vector<1x64x256xbf16> to vector<64x256xbf16>
    %97 = arith.extf %96 : vector<64x256xbf16> to vector<64x256xf32>
    %cst_104 = arith.constant dense<0.000000e+00> : vector<2x256xf32>
    %98 = tpu.matmul %94, %97, %cst_104 {dimension_numbers = #tpu.dot_dimension_numbers<[1], [0], [0], [1], [0, 0, 1, 1], [], []>} : vector<2x64xf32>, vector<64x256xf32>, vector<2x256xf32> -> vector<2x256xf32>
    %99 = arith.addf %93, %98 : vector<2x256xf32>
    %c3_105 = arith.constant 3 : index
    %c0_106 = arith.constant 0 : index
    %100 = tpu.strided_load %arg19[%c3_105, %c0_106] {strides = array<i32: 49, 1>} : memref<98x64xf32, #tpu.memory_space<vmem>>, vector<2x64xf32>
    %c3_107 = arith.constant 3 : index
    %c0_108 = arith.constant 0 : index
    %c0_109 = arith.constant 0 : index
    %101 = vector.load %arg9[%c3_107, %c0_108, %c0_109] : memref<16x64x256xbf16, #tpu.memory_space<vmem>>, vector<1x64x256xbf16>
    %102 = vector.shape_cast %101 : vector<1x64x256xbf16> to vector<64x256xbf16>
    %103 = arith.extf %102 : vector<64x256xbf16> to vector<64x256xf32>
    %cst_110 = arith.constant dense<0.000000e+00> : vector<2x256xf32>
    %104 = tpu.matmul %100, %103, %cst_110 {dimension_numbers = #tpu.dot_dimension_numbers<[1], [0], [0], [1], [0, 0, 1, 1], [], []>} : vector<2x64xf32>, vector<64x256xf32>, vector<2x256xf32> -> vector<2x256xf32>
    %105 = arith.addf %99, %104 : vector<2x256xf32>
    %c7_111 = arith.constant 7 : index
    %c0_112 = arith.constant 0 : index
    %106 = tpu.strided_load %arg19[%c7_111, %c0_112] {strides = array<i32: 49, 1>} : memref<98x64xf32, #tpu.memory_space<vmem>>, vector<2x64xf32>
    %c4 = arith.constant 4 : index
    %c0_113 = arith.constant 0 : index
    %c0_114 = arith.constant 0 : index
    %107 = vector.load %arg9[%c4, %c0_113, %c0_114] : memref<16x64x256xbf16, #tpu.memory_space<vmem>>, vector<1x64x256xbf16>
    %108 = vector.shape_cast %107 : vector<1x64x256xbf16> to vector<64x256xbf16>
    %109 = arith.extf %108 : vector<64x256xbf16> to vector<64x256xf32>
    %cst_115 = arith.constant dense<0.000000e+00> : vector<2x256xf32>
    %110 = tpu.matmul %106, %109, %cst_115 {dimension_numbers = #tpu.dot_dimension_numbers<[1], [0], [0], [1], [0, 0, 1, 1], [], []>} : vector<2x64xf32>, vector<64x256xf32>, vector<2x256xf32> -> vector<2x256xf32>
    %111 = arith.addf %105, %110 : vector<2x256xf32>
    %c8_116 = arith.constant 8 : index
    %c0_117 = arith.constant 0 : index
    %112 = tpu.strided_load %arg19[%c8_116, %c0_117] {strides = array<i32: 49, 1>} : memref<98x64xf32, #tpu.memory_space<vmem>>, vector<2x64xf32>
    %c5 = arith.constant 5 : index
    %c0_118 = arith.constant 0 : index
    %c0_119 = arith.constant 0 : index
    %113 = vector.load %arg9[%c5, %c0_118, %c0_119] : memref<16x64x256xbf16, #tpu.memory_space<vmem>>, vector<1x64x256xbf16>
    %114 = vector.shape_cast %113 : vector<1x64x256xbf16> to vector<64x256xbf16>
    %115 = arith.extf %114 : vector<64x256xbf16> to vector<64x256xf32>
    %cst_120 = arith.constant dense<0.000000e+00> : vector<2x256xf32>
    %116 = tpu.matmul %112, %115, %cst_120 {dimension_numbers = #tpu.dot_dimension_numbers<[1], [0], [0], [1], [0, 0, 1, 1], [], []>} : vector<2x64xf32>, vector<64x256xf32>, vector<2x256xf32> -> vector<2x256xf32>
    %117 = arith.addf %111, %116 : vector<2x256xf32>
    %c9 = arith.constant 9 : index
    %c0_121 = arith.constant 0 : index
    %118 = tpu.strided_load %arg19[%c9, %c0_121] {strides = array<i32: 49, 1>} : memref<98x64xf32, #tpu.memory_space<vmem>>, vector<2x64xf32>
    %c6 = arith.constant 6 : index
    %c0_122 = arith.constant 0 : index
    %c0_123 = arith.constant 0 : index
    %119 = vector.load %arg9[%c6, %c0_122, %c0_123] : memref<16x64x256xbf16, #tpu.memory_space<vmem>>, vector<1x64x256xbf16>
    %120 = vector.shape_cast %119 : vector<1x64x256xbf16> to vector<64x256xbf16>
    %121 = arith.extf %120 : vector<64x256xbf16> to vector<64x256xf32>
    %cst_124 = arith.constant dense<0.000000e+00> : vector<2x256xf32>
    %122 = tpu.matmul %118, %121, %cst_124 {dimension_numbers = #tpu.dot_dimension_numbers<[1], [0], [0], [1], [0, 0, 1, 1], [], []>} : vector<2x64xf32>, vector<64x256xf32>, vector<2x256xf32> -> vector<2x256xf32>
    %123 = arith.addf %117, %122 : vector<2x256xf32>
    %c10 = arith.constant 10 : index
    %c0_125 = arith.constant 0 : index
    %124 = tpu.strided_load %arg19[%c10, %c0_125] {strides = array<i32: 49, 1>} : memref<98x64xf32, #tpu.memory_space<vmem>>, vector<2x64xf32>
    %c7_126 = arith.constant 7 : index
    %c0_127 = arith.constant 0 : index
    %c0_128 = arith.constant 0 : index
    %125 = vector.load %arg9[%c7_126, %c0_127, %c0_128] : memref<16x64x256xbf16, #tpu.memory_space<vmem>>, vector<1x64x256xbf16>
    %126 = vector.shape_cast %125 : vector<1x64x256xbf16> to vector<64x256xbf16>
    %127 = arith.extf %126 : vector<64x256xbf16> to vector<64x256xf32>
    %cst_129 = arith.constant dense<0.000000e+00> : vector<2x256xf32>
    %128 = tpu.matmul %124, %127, %cst_129 {dimension_numbers = #tpu.dot_dimension_numbers<[1], [0], [0], [1], [0, 0, 1, 1], [], []>} : vector<2x64xf32>, vector<64x256xf32>, vector<2x256xf32> -> vector<2x256xf32>
    %129 = arith.addf %123, %128 : vector<2x256xf32>
    %c14 = arith.constant 14 : index
    %c0_130 = arith.constant 0 : index
    %130 = tpu.strided_load %arg19[%c14, %c0_130] {strides = array<i32: 49, 1>} : memref<98x64xf32, #tpu.memory_space<vmem>>, vector<2x64xf32>
    %c8_131 = arith.constant 8 : index
    %c0_132 = arith.constant 0 : index
    %c0_133 = arith.constant 0 : index
    %131 = vector.load %arg9[%c8_131, %c0_132, %c0_133] : memref<16x64x256xbf16, #tpu.memory_space<vmem>>, vector<1x64x256xbf16>
    %132 = vector.shape_cast %131 : vector<1x64x256xbf16> to vector<64x256xbf16>
    %133 = arith.extf %132 : vector<64x256xbf16> to vector<64x256xf32>
    %cst_134 = arith.constant dense<0.000000e+00> : vector<2x256xf32>
    %134 = tpu.matmul %130, %133, %cst_134 {dimension_numbers = #tpu.dot_dimension_numbers<[1], [0], [0], [1], [0, 0, 1, 1], [], []>} : vector<2x64xf32>, vector<64x256xf32>, vector<2x256xf32> -> vector<2x256xf32>
    %135 = arith.addf %129, %134 : vector<2x256xf32>
    %c15 = arith.constant 15 : index
    %c0_135 = arith.constant 0 : index
    %136 = tpu.strided_load %arg19[%c15, %c0_135] {strides = array<i32: 49, 1>} : memref<98x64xf32, #tpu.memory_space<vmem>>, vector<2x64xf32>
    %c9_136 = arith.constant 9 : index
    %c0_137 = arith.constant 0 : index
    %c0_138 = arith.constant 0 : index
    %137 = vector.load %arg9[%c9_136, %c0_137, %c0_138] : memref<16x64x256xbf16, #tpu.memory_space<vmem>>, vector<1x64x256xbf16>
    %138 = vector.shape_cast %137 : vector<1x64x256xbf16> to vector<64x256xbf16>
    %139 = arith.extf %138 : vector<64x256xbf16> to vector<64x256xf32>
    %cst_139 = arith.constant dense<0.000000e+00> : vector<2x256xf32>
    %140 = tpu.matmul %136, %139, %cst_139 {dimension_numbers = #tpu.dot_dimension_numbers<[1], [0], [0], [1], [0, 0, 1, 1], [], []>} : vector<2x64xf32>, vector<64x256xf32>, vector<2x256xf32> -> vector<2x256xf32>
    %141 = arith.addf %135, %140 : vector<2x256xf32>
    %c16 = arith.constant 16 : index
    %c0_140 = arith.constant 0 : index
    %142 = tpu.strided_load %arg19[%c16, %c0_140] {strides = array<i32: 49, 1>} : memref<98x64xf32, #tpu.memory_space<vmem>>, vector<2x64xf32>
    %c10_141 = arith.constant 10 : index
    %c0_142 = arith.constant 0 : index
    %c0_143 = arith.constant 0 : index
    %143 = vector.load %arg9[%c10_141, %c0_142, %c0_143] : memref<16x64x256xbf16, #tpu.memory_space<vmem>>, vector<1x64x256xbf16>
    %144 = vector.shape_cast %143 : vector<1x64x256xbf16> to vector<64x256xbf16>
    %145 = arith.extf %144 : vector<64x256xbf16> to vector<64x256xf32>
    %cst_144 = arith.constant dense<0.000000e+00> : vector<2x256xf32>
    %146 = tpu.matmul %142, %145, %cst_144 {dimension_numbers = #tpu.dot_dimension_numbers<[1], [0], [0], [1], [0, 0, 1, 1], [], []>} : vector<2x64xf32>, vector<64x256xf32>, vector<2x256xf32> -> vector<2x256xf32>
    %147 = arith.addf %141, %146 : vector<2x256xf32>
    %c17 = arith.constant 17 : index
    %c0_145 = arith.constant 0 : index
    %148 = tpu.strided_load %arg19[%c17, %c0_145] {strides = array<i32: 49, 1>} : memref<98x64xf32, #tpu.memory_space<vmem>>, vector<2x64xf32>
    %c11 = arith.constant 11 : index
    %c0_146 = arith.constant 0 : index
    %c0_147 = arith.constant 0 : index
    %149 = vector.load %arg9[%c11, %c0_146, %c0_147] : memref<16x64x256xbf16, #tpu.memory_space<vmem>>, vector<1x64x256xbf16>
    %150 = vector.shape_cast %149 : vector<1x64x256xbf16> to vector<64x256xbf16>
    %151 = arith.extf %150 : vector<64x256xbf16> to vector<64x256xf32>
    %cst_148 = arith.constant dense<0.000000e+00> : vector<2x256xf32>
    %152 = tpu.matmul %148, %151, %cst_148 {dimension_numbers = #tpu.dot_dimension_numbers<[1], [0], [0], [1], [0, 0, 1, 1], [], []>} : vector<2x64xf32>, vector<64x256xf32>, vector<2x256xf32> -> vector<2x256xf32>
    %153 = arith.addf %147, %152 : vector<2x256xf32>
    %c21 = arith.constant 21 : index
    %c0_149 = arith.constant 0 : index
    %154 = tpu.strided_load %arg19[%c21, %c0_149] {strides = array<i32: 49, 1>} : memref<98x64xf32, #tpu.memory_space<vmem>>, vector<2x64xf32>
    %c12 = arith.constant 12 : index
    %c0_150 = arith.constant 0 : index
    %c0_151 = arith.constant 0 : index
    %155 = vector.load %arg9[%c12, %c0_150, %c0_151] : memref<16x64x256xbf16, #tpu.memory_space<vmem>>, vector<1x64x256xbf16>
    %156 = vector.shape_cast %155 : vector<1x64x256xbf16> to vector<64x256xbf16>
    %157 = arith.extf %156 : vector<64x256xbf16> to vector<64x256xf32>
    %cst_152 = arith.constant dense<0.000000e+00> : vector<2x256xf32>
    %158 = tpu.matmul %154, %157, %cst_152 {dimension_numbers = #tpu.dot_dimension_numbers<[1], [0], [0], [1], [0, 0, 1, 1], [], []>} : vector<2x64xf32>, vector<64x256xf32>, vector<2x256xf32> -> vector<2x256xf32>
    %159 = arith.addf %153, %158 : vector<2x256xf32>
    %c22 = arith.constant 22 : index
    %c0_153 = arith.constant 0 : index
    %160 = tpu.strided_load %arg19[%c22, %c0_153] {strides = array<i32: 49, 1>} : memref<98x64xf32, #tpu.memory_space<vmem>>, vector<2x64xf32>
    %c13 = arith.constant 13 : index
    %c0_154 = arith.constant 0 : index
    %c0_155 = arith.constant 0 : index
    %161 = vector.load %arg9[%c13, %c0_154, %c0_155] : memref<16x64x256xbf16, #tpu.memory_space<vmem>>, vector<1x64x256xbf16>
    %162 = vector.shape_cast %161 : vector<1x64x256xbf16> to vector<64x256xbf16>
    %163 = arith.extf %162 : vector<64x256xbf16> to vector<64x256xf32>
    %cst_156 = arith.constant dense<0.000000e+00> : vector<2x256xf32>
    %164 = tpu.matmul %160, %163, %cst_156 {dimension_numbers = #tpu.dot_dimension_numbers<[1], [0], [0], [1], [0, 0, 1, 1], [], []>} : vector<2x64xf32>, vector<64x256xf32>, vector<2x256xf32> -> vector<2x256xf32>
    %165 = arith.addf %159, %164 : vector<2x256xf32>
    %c23 = arith.constant 23 : index
    %c0_157 = arith.constant 0 : index
    %166 = tpu.strided_load %arg19[%c23, %c0_157] {strides = array<i32: 49, 1>} : memref<98x64xf32, #tpu.memory_space<vmem>>, vector<2x64xf32>
    %c14_158 = arith.constant 14 : index
    %c0_159 = arith.constant 0 : index
    %c0_160 = arith.constant 0 : index
    %167 = vector.load %arg9[%c14_158, %c0_159, %c0_160] : memref<16x64x256xbf16, #tpu.memory_space<vmem>>, vector<1x64x256xbf16>
    %168 = vector.shape_cast %167 : vector<1x64x256xbf16> to vector<64x256xbf16>
    %169 = arith.extf %168 : vector<64x256xbf16> to vector<64x256xf32>
    %cst_161 = arith.constant dense<0.000000e+00> : vector<2x256xf32>
    %170 = tpu.matmul %166, %169, %cst_161 {dimension_numbers = #tpu.dot_dimension_numbers<[1], [0], [0], [1], [0, 0, 1, 1], [], []>} : vector<2x64xf32>, vector<64x256xf32>, vector<2x256xf32> -> vector<2x256xf32>
    %171 = arith.addf %165, %170 : vector<2x256xf32>
    %c24 = arith.constant 24 : index
    %c0_162 = arith.constant 0 : index
    %172 = tpu.strided_load %arg19[%c24, %c0_162] {strides = array<i32: 49, 1>} : memref<98x64xf32, #tpu.memory_space<vmem>>, vector<2x64xf32>
    %c15_163 = arith.constant 15 : index
    %c0_164 = arith.constant 0 : index
    %c0_165 = arith.constant 0 : index
    %173 = vector.load %arg9[%c15_163, %c0_164, %c0_165] : memref<16x64x256xbf16, #tpu.memory_space<vmem>>, vector<1x64x256xbf16>
    %174 = vector.shape_cast %173 : vector<1x64x256xbf16> to vector<64x256xbf16>
    %175 = arith.extf %174 : vector<64x256xbf16> to vector<64x256xf32>
    %cst_166 = arith.constant dense<0.000000e+00> : vector<2x256xf32>
    %176 = tpu.matmul %172, %175, %cst_166 {dimension_numbers = #tpu.dot_dimension_numbers<[1], [0], [0], [1], [0, 0, 1, 1], [], []>} : vector<2x64xf32>, vector<64x256xf32>, vector<2x256xf32> -> vector<2x256xf32>
    %177 = arith.addf %171, %176 : vector<2x256xf32>
    %178 = vector.extract_strided_slice %177 {offsets = [0, 0], sizes = [2, 64], strides = [1, 1]} : vector<2x256xf32> to vector<2x64xf32>
    %cst_167 = arith.constant 5.000000e-01 : f32
    %179 = vector.broadcast %cst_167 : f32 to vector<2x64xf32>
    %180 = arith.mulf %179, %178 : vector<2x64xf32>
    %181 = math.tanh %180 : vector<2x64xf32>
    %cst_168 = arith.constant 1.000000e+00 : f32
    %182 = vector.broadcast %cst_168 : f32 to vector<2x64xf32>
    %183 = arith.addf %181, %182 : vector<2x64xf32>
    %cst_169 = arith.constant 5.000000e-01 : f32
    %184 = vector.broadcast %cst_169 : f32 to vector<2x64xf32>
    %185 = arith.mulf %184, %183 : vector<2x64xf32>
    %186 = vector.extract_strided_slice %177 {offsets = [0, 64], sizes = [2, 64], strides = [1, 1]} : vector<2x256xf32> to vector<2x64xf32>
    %cst_170 = arith.constant 5.000000e-01 : f32
    %187 = vector.broadcast %cst_170 : f32 to vector<2x64xf32>
    %188 = arith.mulf %187, %186 : vector<2x64xf32>
    %189 = math.tanh %188 : vector<2x64xf32>
    %cst_171 = arith.constant 1.000000e+00 : f32
    %190 = vector.broadcast %cst_171 : f32 to vector<2x64xf32>
    %191 = arith.addf %189, %190 : vector<2x64xf32>
    %cst_172 = arith.constant 5.000000e-01 : f32
    %192 = vector.broadcast %cst_172 : f32 to vector<2x64xf32>
    %193 = arith.mulf %192, %191 : vector<2x64xf32>
    %194 = vector.extract_strided_slice %177 {offsets = [0, 128], sizes = [2, 64], strides = [1, 1]} : vector<2x256xf32> to vector<2x64xf32>
    %195 = math.tanh %194 : vector<2x64xf32>
    %196 = vector.extract_strided_slice %177 {offsets = [0, 192], sizes = [2, 64], strides = [1, 1]} : vector<2x256xf32> to vector<2x64xf32>
    %cst_173 = arith.constant 5.000000e-01 : f32
    %197 = vector.broadcast %cst_173 : f32 to vector<2x64xf32>
    %198 = arith.mulf %197, %196 : vector<2x64xf32>
    %199 = math.tanh %198 : vector<2x64xf32>
    %cst_174 = arith.constant 1.000000e+00 : f32
    %200 = vector.broadcast %cst_174 : f32 to vector<2x64xf32>
    %201 = arith.addf %199, %200 : vector<2x64xf32>
    %cst_175 = arith.constant 5.000000e-01 : f32
    %202 = vector.broadcast %cst_175 : f32 to vector<2x64xf32>
    %203 = arith.mulf %202, %201 : vector<2x64xf32>
    %c0_176 = arith.constant 0 : index
    %c0_177 = arith.constant 0 : index
    %204 = vector.load %arg2[%c0_176, %c0_177] : memref<2x64xf32, #tpu.memory_space<vmem>>, vector<2x64xf32>
    %205 = arith.mulf %193, %204 : vector<2x64xf32>
    %206 = arith.mulf %185, %195 : vector<2x64xf32>
    %207 = arith.addf %205, %206 : vector<2x64xf32>
    %208 = math.tanh %207 : vector<2x64xf32>
    %209 = arith.mulf %203, %208 : vector<2x64xf32>
    %c0_178 = arith.constant 0 : index
    %c0_179 = arith.constant 0 : index
    %210 = vector.load %arg16[%c0_178, %c0_179] : memref<2x64xf32, #tpu.memory_space<vmem>>, vector<2x64xf32>
    tpu.vector_store %arg16[%c0_178, %c0_179], %207 {strides = array<i32>} : memref<2x64xf32, #tpu.memory_space<vmem>>, vector<2x64xf32>,
    %c0_180 = arith.constant 0 : index
    %c0_181 = arith.constant 0 : index
    %211 = vector.load %arg15[%c0_180, %c0_181] : memref<2x64xf32, #tpu.memory_space<vmem>>, vector<2x64xf32>
    tpu.vector_store %arg15[%c0_180, %c0_181], %209 {strides = array<i32>} : memref<2x64xf32, #tpu.memory_space<vmem>>, vector<2x64xf32>,
    %c0_182 = arith.constant 0 : index
    %c0_183 = arith.constant 0 : index
    %212 = vector.load %arg12[%c0_182, %c0_183] : memref<64x3xf32, #tpu.memory_space<vmem>>, vector<64x3xf32>
    %cst_184 = arith.constant dense<0.000000e+00> : vector<2x3xf32>
    %213 = tpu.matmul %209, %212, %cst_184 {dimension_numbers = #tpu.dot_dimension_numbers<[1], [0], [0], [1], [0, 0, 1, 1], [], []>} : vector<2x64xf32>, vector<64x3xf32>, vector<2x3xf32> -> vector<2x3xf32>
    %c0_185 = arith.constant 0 : index
    %c0_186 = arith.constant 0 : index
    %214 = vector.load %arg13[%c0_185, %c0_186] : memref<1x3xf32, #tpu.memory_space<vmem>>, vector<1x3xf32>
    %215 = vector.broadcast %214 : vector<1x3xf32> to vector<2x3xf32>
    %216 = arith.addf %213, %215 : vector<2x3xf32>
    %cst_187 = arith.constant 0.000000e+00 : f32
    %217 = vector.broadcast %cst_187 : f32 to vector<2x3xf32>
    %218 = arith.maximumf %216, %217 : vector<2x3xf32>
    %c0_188 = arith.constant 0 : index
    %c0_189 = arith.constant 0 : index
    %219 = vector.load %arg14[%c0_188, %c0_189] : memref<2x3xf32, #tpu.memory_space<vmem>>, vector<2x3xf32>
    tpu.vector_store %arg14[%c0_188, %c0_189], %218 {strides = array<i32>} : memref<2x3xf32, #tpu.memory_space<vmem>>, vector<2x3xf32>,
    return
  }
}

</mosaic_0001>

<bundles_post_ra>
// kernel: net_forward.1
= control target key start
LH: loop header
LB: loop body
LE: loop exit
PB: predicated region body
PF: predicated region fallthrough
CT: control target
= control target key end

     0   :  { %s4109_s0 = inlined_call_operand.vmem [shape: f32[122,3], index: 0, kind: input, shape index: {}]   ;;  %s4110_s1 = inlined_call_operand.vmem [shape: f32[2,64], index: 1, kind: input, shape index: {}]   ;;  %s4111_s2 = inlined_call_operand.vmem [shape: f32[2,64], index: 2, kind: input, shape index: {}]   ;;  %s4112_s3 = inlined_call_operand.vmem [shape: f32[4,3,16], index: 3, kind: input, shape index: {}]   ;;  %s4113_s4 = inlined_call_operand.vmem [shape: f32[1,16], index: 4, kind: input, shape index: {}]   ;;  %s4114_s5 = inlined_call_operand.vmem [shape: f32[4,16,32], index: 5, kind: input, shape index: {}]   ;;  %s4115_s6 = inlined_call_operand.vmem [shape: f32[1,32], index: 6, kind: input, shape index: {}]   ;;  %s4116_s7 = inlined_call_operand.vmem [shape: f32[4,32,64], index: 7, kind: input, shape index: {}]   ;;  %s4117_s8 = inlined_call_operand.vmem [shape: f32[1,64], index: 8, kind: input, shape index: {}]   ;;  %s4118_s9 = inlined_call_operand.hbm [shape: bf16[16,64,256], index: 9, kind: input, shape index: {}]   ;;  %s4119_s10 = inlined_call_operand.vmem [shape: bf16[64,256], index: 10, kind: input, shape index: {}]   ;;  %s4120_s11 = inlined_call_operand.vmem [shape: f32[1,256], index: 11, kind: input, shape index: {}]   ;;  %s4121_s12 = inlined_call_operand.vmem [shape: f32[64,3], index: 12, kind: input, shape index: {}]   ;;  %s4122_s13 = inlined_call_operand.vmem [shape: f32[1,3], index: 13, kind: input, shape index: {}]   ;;  %s4123_s14 = inlined_call_operand.hbm [shape: f32[2,3], index: 14, kind: output, shape index: {0}]   ;;  %s4124_s15 = inlined_call_operand.hbm [shape: f32[2,64], index: 15, kind: output, shape index: {1}]   ;;  %s4125_s16 = inlined_call_operand.hbm [shape: f32[2,64], index: 16, kind: output, shape index: {2}]  }
   0x1   :  { %4127 = sst [smem:[#allocation15_spill]] %s4109_s0 }
   0x2   :  { %22 = vsyncpa [#allocation6], 0 }
   0x3   :  { %23 = vsyncpa [#allocation7], 0 }
   0x4   :  { %24 = vsyncpa [#allocation10], 0  ;;  %s47_s23 = sshll.u32 %s4118_s9, 4  ;;  %s3418_s24 = smov [#allocation5]   ;;  %s48_s23 = int_to_ptr.hbm [resolvable:$true] %s47_s23 }
   0x5   :  { %s49_s25 = sshll.u32 %s3418_s24, 4  ;;  %s3419_s26 = smov 128   ;;  %s50_s25 = int_to_ptr.vmem [resolvable:$true] %s49_s25 }
   0x6   :  { %s3420_s27 = smov 8  }
   0x7   :  { %55 = dma.hbm_to_vmem [thread:$0]  %s48_s23, 16384, %s50_s25, [#allocation6], %s3419_s26, %s3419_s26, %s3420_s27  }
   0x8   :  { %3412 = dma.done.wait [#allocation6], 16384  }
   0x9   :  { %3413 = vsyncadd [#allocation6], 4294950912  ;;  %vm148_vm0 = vcmask 1042432   ;;  %vm102_vm1 = vcmask 23552   ;;  %v3102_v0 = vld [vmem:[%s4112_s3 + $0x8] sm:$0x7] }
   0xa   :  { %s4128_s17 = sld [smem:[#allocation15_spill]]  ;;  %v3119_v2 = vld [vmem:[%s4112_s3 + $0xc] sm:$0x7]  ;;  %3103 = vmatpush.msk.msra.mxu2 %vm148_vm0, %v3102_v0  ;;  %v3069_v4 = vld [vmem:[%s4112_s3 + $0x4] sm:$0x7]  ;;  %v3183_v24 = vld [vmem:[%s4114_s5 + $0x38] sm:$0xff] }
   0xb   :  { %3120 = vmatpush.msk.msra.mxu3 %vm148_vm0, %v3119_v2  ;;  %v84_v5 = vld [vmem:[%s4112_s3] sm:$0x7]  ;;  %3070 = vmatpush.msk.msra.mxu0 %vm148_vm0, %v3069_v4  ;;  %v3167_v20 = vld [vmem:[%s4114_s5 + $0x28] sm:$0xff]  ;;  %v3137_v25 = vld [vmem:[%s4114_s5 + $0x18] sm:$0xff]  ;;  %vm641_vm2 = vcmask 130048   ;;  %vm656_vm3 = vcmask 123904  }
   0xc   :  { %3086 = vmatpush.msk.msra.mxu1 %vm148_vm0, %v84_v5  ;;  %967 = vmatpush.msrb.mxu2 %v3167_v20  ;;  %v674_v26 = vld [vmem:[%s4114_s5 + $0x8] sm:$0xff]  ;;  %v3166_v48 = vld [vmem:[%s4114_s5 + $0x20] sm:$0xff]  ;;  %v3182_v49 = vld [vmem:[%s4114_s5 + $0x30] sm:$0xff]  ;;  %vm1189_vm4 = vcmask 261120   ;;  %vm1203_vm5 = vcmask 254976   ;;  %vm1712_vm6 = vcmask 523264  }
   0xd   :  { %1099 = vmatpush.msrb.mxu3 %v3183_v24  ;;  %748 = vmatpush.msrb.mxu0 %v3137_v25  ;;  %v3136_v53 = vld [vmem:[%s4114_s5 + $0x10] sm:$0xff]  ;;  %v673_v54 = vld [vmem:[%s4114_s5] sm:$0xff]  ;;  %vm1725_vm7 = vcmask 517120   ;;  %s3421_s30 = smov 64   ;;  %s3039_s28 = sshll.u32 %s4124_s15, 4  ;;  %vm3019_vm8 = vcmask 17408   ;;  %s3040_s28 = int_to_ptr.hbm [resolvable:$true] %s3039_s28 }
   0xe   :  { %849 = vmatpush.msrb.mxu1 %v674_v26  ;;  %968 = vmatpush.msrb.mxu2 %v3166_v48  ;;  %s3422_s29 = smov [#allocation9]   ;;  %s3050_s3 = sshll.u32 %s4125_s16, 4  ;;  %s3051_s3 = int_to_ptr.hbm [resolvable:$true] %s3050_s3 }
   0xf   :  { %1100 = vmatpush.msrb.mxu3 %v3182_v49  ;;  %749 = vmatpush.msrb.mxu0 %v3136_v53  ;;  %s3424_s15 = smov [#allocation8]   ;;  %s3028_s18 = sshll.u32 %s4123_s14, 4  ;;  %s3029_s18 = int_to_ptr.hbm [resolvable:$true] %s3028_s18 }
  0x10   :  { %v324_v1 = vld [vmem:[%s4128_s17 + $0x7] sm:$0xff]  ;;  %v325_v8 = vld [vmem:[%s4128_s17 + $0xf] sm:$0xff]  ;;  %v326_v11 = vld [vmem:[%s4128_s17 + $0x17] sm:$0xff]  ;;  %850 = vmatpush.msrb.mxu1 %v673_v54 }
  0x11   :  { %v466_v3 = vld [vmem:[%s4128_s17 + $0x8] sm:$0xff]  ;;  %3104 = vmatmul.msk.f32.vlgmr.msra.gmra.mxu2 %vm102_vm1, %v324_v1  ;;  %v69_v7 = vld [vmem:[%s4128_s17] sm:$0xff]  ;;  %v467_v9 = vld [vmem:[%s4128_s17 + $0x10] sm:$0xff] }
  0x12   :  { %3121 = vmatmul.msk.f32.vlgmr.msra.gmra.mxu3 %vm102_vm1, %v466_v3  ;;  %v85_v6 = vld [vmem:[%s4128_s17 + $0x1] sm:$0xff]  ;;  %3087 = vmatmul.msk.f32.vlgmr.msra.gmra.mxu1 %vm102_vm1, %v69_v7  ;;  %v86_v10 = vld [vmem:[%s4128_s17 + $0x9] sm:$0xff]  ;;  %v468_v12 = vld [vmem:[%s4128_s17 + $0x18] sm:$0xff] }
  0x13   :  { %3071 = vmatmul.msk.f32.vlgmr.msra.gmra.mxu0 %vm102_vm1, %v85_v6  ;;  %v87_v13 = vld [vmem:[%s4128_s17 + $0x11] sm:$0xff]  ;;  %v327_v14 = vld [vmem:[%s4128_s17 + $0x1f] sm:$0xff]  ;;  %v328_v17 = vld [vmem:[%s4128_s17 + $0x27] sm:$0xff] }
  0x14   :  { %v469_v15 = vld [vmem:[%s4128_s17 + $0x20] sm:$0xff]  ;;  %v470_v18 = vld [vmem:[%s4128_s17 + $0x28] sm:$0xff]  ;;  %v471_v22 = vld [vmem:[%s4128_s17 + $0x30] sm:$0xff] }
  0x15   :  { %v88_v16 = vld [vmem:[%s4128_s17 + $0x19] sm:$0xff]  ;;  %v89_v19 = vld [vmem:[%s4128_s17 + $0x21] sm:$0xff]  ;;  %v329_v21 = vld [vmem:[%s4128_s17 + $0x2f] sm:$0xff] }
  0x16   :  { %v90_v23 = vld [vmem:[%s4128_s17 + $0x29] sm:$0xff]  ;;  %v330_v27 = vld [vmem:[%s4128_s17 + $0x37] sm:$0xff]  ;;  %v331_v30 = vld [vmem:[%s4128_s17 + $0x3f] sm:$0xff] }
  0x17   :  { %v472_v28 = vld [vmem:[%s4128_s17 + $0x38] sm:$0xff]  ;;  %v473_v31 = vld [vmem:[%s4128_s17 + $0x40] sm:$0xff]  ;;  %v474_v34 = vld [vmem:[%s4128_s17 + $0x48] sm:$0xff] }
  0x18   :  { %v91_v29 = vld [vmem:[%s4128_s17 + $0x31] sm:$0xff]  ;;  %v92_v32 = vld [vmem:[%s4128_s17 + $0x39] sm:$0xff]  ;;  %v332_v33 = vld [vmem:[%s4128_s17 + $0x47] sm:$0xff] }
  0x19   :  { %3105 = vmatmul.msk.f32.gmra.mxu2 %vm102_vm1, %v325_v8  ;;  %v93_v35 = vld [vmem:[%s4128_s17 + $0x41] sm:$0xff]  ;;  %v333_v36 = vld [vmem:[%s4128_s17 + $0x4f] sm:$0xff]  ;;  %v334_v39 = vld [vmem:[%s4128_s17 + $0x57] sm:$0xff] }
  0x1a   :  { %3122 = vmatmul.msk.f32.gmra.mxu3 %vm102_vm1, %v467_v9  ;;  %3088 = vmatmul.msk.f32.gmra.mxu1 %vm102_vm1, %v466_v3  ;;  %v475_v37 = vld [vmem:[%s4128_s17 + $0x50] sm:$0xff]  ;;  %v476_v40 = vld [vmem:[%s4128_s17 + $0x58] sm:$0xff]  ;;  %v477_v43 = vld [vmem:[%s4128_s17 + $0x60] sm:$0xff] }
  0x1b   :  { %3072 = vmatmul.msk.f32.gmra.mxu0 %vm102_vm1, %v86_v10  ;;  %v94_v38 = vld [vmem:[%s4128_s17 + $0x49] sm:$0xff]  ;;  %v95_v41 = vld [vmem:[%s4128_s17 + $0x51] sm:$0xff]  ;;  %v335_v42 = vld [vmem:[%s4128_s17 + $0x5f] sm:$0xff] }
  0x1c   :  { %v96_v44 = vld [vmem:[%s4128_s17 + $0x59] sm:$0xff]  ;;  %v336_v45 = vld [vmem:[%s4128_s17 + $0x67] sm:$0xff]  ;;  %v337_v50 = vld [vmem:[%s4128_s17 + $0x6f] sm:$0xff] }
  0x1d   :  { %v478_v46 = vld [vmem:[%s4128_s17 + $0x68] sm:$0xff]  ;;  %v479_v51 = vld [vmem:[%s4128_s17 + $0x70] sm:$0xff]  ;;  %v480_v56 = vld [vmem:[%s4128_s17 + $0x78] sm:$0x3] }
  0x1e   :  { %v97_v47 = vld [vmem:[%s4128_s17 + $0x61] sm:$0xff]  ;;  %v98_v52 = vld [vmem:[%s4128_s17 + $0x69] sm:$0xff]  ;;  %v338_v55 = vld [vmem:[%s4128_s17 + $0x77] sm:$0x3] }
  0x1f   :  { %v99_v57 = vld [vmem:[%s4128_s17 + $0x71] sm:$0x3]  ;;  %v3753_v1 = vld [vmem:[%s4113_s4] ss:$0 sm:$0xff] }
  0x20   :  { %v83_v58 = vld [vmem:[%s4128_s17 + $0x70] sm:$0x3] }
  0x21   :  { %3106 = vmatmul.msk.f32.gmra.mxu2 %vm102_vm1, %v326_v11 }
  0x22   :  { %3123 = vmatmul.msk.f32.gmra.mxu3 %vm102_vm1, %v468_v12  ;;  %3089 = vmatmul.msk.f32.gmra.mxu1 %vm102_vm1, %v467_v9 }
  0x23   :  { %3073 = vmatmul.msk.f32.gmra.mxu0 %vm102_vm1, %v87_v13 }
  0x29   :  { %3107 = vmatmul.msk.f32.gmra.mxu2 %vm102_vm1, %v327_v14 }
  0x2a   :  { %3124 = vmatmul.msk.f32.gmra.mxu3 %vm102_vm1, %v469_v15  ;;  %3090 = vmatmul.msk.f32.gmra.mxu1 %vm102_vm1, %v468_v12 }
  0x2b   :  { %3074 = vmatmul.msk.f32.gmra.mxu0 %vm102_vm1, %v88_v16 }
  0x31   :  { %3108 = vmatmul.msk.f32.gmra.mxu2 %vm102_vm1, %v328_v17 }
  0x32   :  { %3125 = vmatmul.msk.f32.gmra.mxu3 %vm102_vm1, %v470_v18  ;;  %3091 = vmatmul.msk.f32.gmra.mxu1 %vm102_vm1, %v469_v15 }
  0x33   :  { %3075 = vmatmul.msk.f32.gmra.mxu0 %vm102_vm1, %v89_v19 }
  0x39   :  { %3109 = vmatmul.msk.f32.gmra.mxu2 %vm102_vm1, %v329_v21 }
  0x3a   :  { %3126 = vmatmul.msk.f32.gmra.mxu3 %vm102_vm1, %v471_v22  ;;  %3092 = vmatmul.msk.f32.gmra.mxu1 %vm102_vm1, %v470_v18 }
  0x3b   :  { %3076 = vmatmul.msk.f32.gmra.mxu0 %vm102_vm1, %v90_v23 }
  0x41   :  { %3110 = vmatmul.msk.f32.gmra.mxu2 %vm102_vm1, %v330_v27 }
  0x42   :  { %3127 = vmatmul.msk.f32.gmra.mxu3 %vm102_vm1, %v472_v28  ;;  %3093 = vmatmul.msk.f32.gmra.mxu1 %vm102_vm1, %v471_v22 }
  0x43   :  { %3077 = vmatmul.msk.f32.gmra.mxu0 %vm102_vm1, %v91_v29 }
  0x49   :  { %3111 = vmatmul.msk.f32.gmra.mxu2 %vm102_vm1, %v331_v30 }
  0x4a   :  { %3128 = vmatmul.msk.f32.gmra.mxu3 %vm102_vm1, %v473_v31  ;;  %3094 = vmatmul.msk.f32.gmra.mxu1 %vm102_vm1, %v472_v28 }
  0x4b   :  { %3078 = vmatmul.msk.f32.gmra.mxu0 %vm102_vm1, %v92_v32 }
  0x51   :  { %3112 = vmatmul.msk.f32.gmra.mxu2 %vm102_vm1, %v332_v33 }
  0x52   :  { %3129 = vmatmul.msk.f32.gmra.mxu3 %vm102_vm1, %v474_v34  ;;  %3095 = vmatmul.msk.f32.gmra.mxu1 %vm102_vm1, %v473_v31 }
  0x53   :  { %3079 = vmatmul.msk.f32.gmra.mxu0 %vm102_vm1, %v93_v35 }
  0x59   :  { %3113 = vmatmul.msk.f32.gmra.mxu2 %vm102_vm1, %v333_v36 }
  0x5a   :  { %3130 = vmatmul.msk.f32.gmra.mxu3 %vm102_vm1, %v475_v37  ;;  %3096 = vmatmul.msk.f32.gmra.mxu1 %vm102_vm1, %v474_v34 }
  0x5b   :  { %3080 = vmatmul.msk.f32.gmra.mxu0 %vm102_vm1, %v94_v38 }
  0x61   :  { %3114 = vmatmul.msk.f32.gmra.mxu2 %vm102_vm1, %v334_v39 }
  0x62   :  { %3131 = vmatmul.msk.f32.gmra.mxu3 %vm102_vm1, %v476_v40  ;;  %3097 = vmatmul.msk.f32.gmra.mxu1 %vm102_vm1, %v475_v37 }
  0x63   :  { %3081 = vmatmul.msk.f32.gmra.mxu0 %vm102_vm1, %v95_v41 }
  0x69   :  { %3115 = vmatmul.msk.f32.gmra.mxu2 %vm102_vm1, %v335_v42 }
  0x6a   :  { %3132 = vmatmul.msk.f32.gmra.mxu3 %vm102_vm1, %v477_v43  ;;  %3098 = vmatmul.msk.f32.gmra.mxu1 %vm102_vm1, %v476_v40 }
  0x6b   :  { %3082 = vmatmul.msk.f32.gmra.mxu0 %vm102_vm1, %v96_v44 }
  0x71   :  { %3116 = vmatmul.msk.f32.gmra.mxu2 %vm102_vm1, %v336_v45 }
  0x72   :  { %3133 = vmatmul.msk.f32.gmra.mxu3 %vm102_vm1, %v478_v46  ;;  %3099 = vmatmul.msk.f32.gmra.mxu1 %vm102_vm1, %v477_v43 }
  0x73   :  { %3083 = vmatmul.msk.f32.gmra.mxu0 %vm102_vm1, %v97_v47 }
  0x79   :  { %3117 = vmatmul.msk.f32.gmra.mxu2 %vm102_vm1, %v337_v50 }
  0x7a   :  { %3134 = vmatmul.msk.f32.gmra.mxu3 %vm102_vm1, %v479_v51  ;;  %3100 = vmatmul.msk.f32.gmra.mxu1 %vm102_vm1, %v478_v46 }
  0x7b   :  { %3084 = vmatmul.msk.f32.gmra.mxu0 %vm102_vm1, %v98_v52 }
  0x81   :  { %3118 = vmatmul.msk.f32.gmra.mxu2 %vm102_vm1, %v338_v55 }
  0x82   :  { %3135 = vmatmul.msk.f32.gmra.mxu3 %vm102_vm1, %v480_v56  ;;  %3101 = vmatmul.msk.f32.gmra.mxu1 %vm102_vm1, %v83_v58 }
  0x83   :  { %3085 = vmatmul.msk.f32.gmra.mxu0 %vm102_vm1, %v99_v57 }
  0x8f   :  { %v279_v60 = vpop.f32.mrf.mxu1 }
  0x90   :  { %v169_v59 = vpop.f32.mrf.mxu0 }
  0x91   :  { %v280_v61 = vadd.f32 %v279_v60, %v169_v59 }
  0x94   :  { %v406_v62 = vpop.f32.mrf.mxu2 }
  0x95   :  { %v548_v63 = vpop.f32.mrf.mxu3  ;;  %v451_v0 = vadd.f32 %v406_v62, %v280_v61 }
  0x97   :  { %v593_v2 = vadd.f32 %v548_v63, %v451_v0  ;;  %v282_v4 = vpop.f32.mrf.mxu1 }
  0x98   :  { %v172_v3 = vpop.f32.mrf.mxu0 }
  0x99   :  { %v611_v5 = vadd.f32 %v3753_v1, %v593_v2  ;;  %v283_v6 = vadd.f32 %v282_v4, %v172_v3 }
  0x9b   :  { %v626_v7 = vmax.f32 %v611_v5, 0.0 }
  0x9c   :  { %v409_v8 = vpop.f32.mrf.mxu2 }
  0x9d   :  { %v551_v9 = vpop.f32.mrf.mxu3  ;;  %642 = vst.msk [vmem:[#allocation2] sm:$0xff] %vm641_vm2, %v626_v7  ;;  %v452_v10 = vadd.f32 %v409_v8, %v283_v6 }
  0x9f   :  { %v594_v11 = vadd.f32 %v551_v9, %v452_v10  ;;  %v285_v13 = vpop.f32.mrf.mxu1 }
  0xa0   :  { %v175_v12 = vpop.f32.mrf.mxu0 }
  0xa1   :  { %v612_v14 = vadd.f32 %v3753_v1, %v594_v11  ;;  %v286_v15 = vadd.f32 %v285_v13, %v175_v12 }
  0xa3   :  { %v627_v16 = vmax.f32 %v612_v14, 0.0 }
  0xa4   :  { %v412_v17 = vpop.f32.mrf.mxu2  ;;  %v659_v18 = vld [vmem:[#allocation2] sm:$0xff] }
  0xa5   :  { %v554_v19 = vpop.f32.mrf.mxu3  ;;  %643 = vst.msk [vmem:[#allocation2 + $0x8] sm:$0xff] %vm641_vm2, %v627_v16  ;;  %v453_v20 = vadd.f32 %v412_v17, %v286_v15  ;;  %3152 = vmatmul.msk.f32.vlgmr.msrb.gmra.mxu1 %vm641_vm2, %v659_v18 }
  0xa7   :  { %v595_v21 = vadd.f32 %v554_v19, %v453_v20  ;;  %v288_v23 = vpop.f32.mrf.mxu1 }
  0xa8   :  { %v178_v22 = vpop.f32.mrf.mxu0 }
  0xa9   :  { %v613_v24 = vadd.f32 %v3753_v1, %v595_v21  ;;  %v289_v25 = vadd.f32 %v288_v23, %v178_v22 }
  0xab   :  { %v628_v26 = vmax.f32 %v613_v24, 0.0 }
  0xac   :  { %v415_v27 = vpop.f32.mrf.mxu2  ;;  %v675_v28 = vld [vmem:[#allocation2 + $0x1] sm:$0xff] }
  0xad   :  { %v660_v29 = vld [vmem:[#allocation2 + $0x8] sm:$0xff]  ;;  %v557_v31 = vpop.f32.mrf.mxu3  ;;  %644 = vst.msk [vmem:[#allocation2 + $0x10] sm:$0xff] %vm641_vm2, %v628_v26  ;;  %v454_v32 = vadd.f32 %v415_v27, %v289_v25  ;;  %3138 = vmatmul.msk.f32.vlgmr.msrb.gmra.mxu0 %vm641_vm2, %v675_v28 }
  0xae   :  { %v894_v30 = vld [vmem:[#allocation2 + $0x7] sm:$0xff]  ;;  %3153 = vmatmul.msk.f32.gmra.mxu1 %vm641_vm2, %v660_v29  ;;  %3184 = vmatmul.msk.f32.vlgmr.msrb.gmra.mxu3 %vm641_vm2, %v660_v29 }
  0xaf   :  { %3168 = vmatmul.msk.f32.vlgmr.msrb.gmra.mxu2 %vm641_vm2, %v894_v30  ;;  %v596_v33 = vadd.f32 %v557_v31, %v454_v32  ;;  %v291_v35 = vpop.f32.mrf.mxu1  ;;  %v3231_v30 = vld [vmem:[%s4116_s7 + $0x58] sm:$0xff] }
  0xb0   :  { %v181_v34 = vpop.f32.mrf.mxu0  ;;  %1500 = vmatpush.msra.mxu2 %v3231_v30 }
  0xb1   :  { %v614_v36 = vadd.f32 %v3753_v1, %v596_v33  ;;  %v292_v37 = vadd.f32 %v291_v35, %v181_v34 }
  0xb3   :  { %v629_v38 = vmax.f32 %v614_v36, 0.0 }
  0xb4   :  { %v418_v39 = vpop.f32.mrf.mxu2  ;;  %v676_v40 = vld [vmem:[#allocation2 + $0x9] sm:$0xff] }
  0xb5   :  { %v661_v41 = vld [vmem:[#allocation2 + $0x10] sm:$0xff]  ;;  %v560_v43 = vpop.f32.mrf.mxu3  ;;  %645 = vst.msk [vmem:[#allocation2 + $0x18] sm:$0xff] %vm641_vm2, %v629_v38  ;;  %v455_v44 = vadd.f32 %v418_v39, %v292_v37  ;;  %3139 = vmatmul.msk.f32.gmra.mxu0 %vm641_vm2, %v676_v40 }
  0xb6   :  { %v895_v42 = vld [vmem:[#allocation2 + $0xf] sm:$0xff]  ;;  %3154 = vmatmul.msk.f32.gmra.mxu1 %vm641_vm2, %v661_v41  ;;  %3185 = vmatmul.msk.f32.gmra.mxu3 %vm641_vm2, %v661_v41 }
  0xb7   :  { %3169 = vmatmul.msk.f32.gmra.mxu2 %vm641_vm2, %v895_v42  ;;  %v597_v45 = vadd.f32 %v560_v43, %v455_v44  ;;  %v294_v47 = vpop.f32.mrf.mxu1  ;;  %v3248_v43 = vld [vmem:[%s4116_s7 + $0x78] sm:$0xff] }
  0xb8   :  { %v184_v46 = vpop.f32.mrf.mxu0  ;;  %v3201_v44 = vld [vmem:[%s4116_s7 + $0x38] sm:$0xff]  ;;  %1626 = vmatpush.msra.mxu3 %v3248_v43 }
  0xb9   :  { %v615_v48 = vadd.f32 %v3753_v1, %v597_v45  ;;  %v295_v49 = vadd.f32 %v294_v47, %v184_v46  ;;  %v1222_v45 = vld [vmem:[%s4116_s7 + $0x18] sm:$0xff]  ;;  %1292 = vmatpush.msra.mxu0 %v3201_v44 }
  0xba   :  { %1387 = vmatpush.msra.mxu1 %v1222_v45 }
  0xbb   :  { %v630_v50 = vmax.f32 %v615_v48, 0.0 }
  0xbc   :  { %v421_v51 = vpop.f32.mrf.mxu2  ;;  %v677_v52 = vld [vmem:[#allocation2 + $0x11] sm:$0xff] }
  0xbd   :  { %v662_v53 = vld [vmem:[#allocation2 + $0x18] sm:$0xff]  ;;  %v563_v55 = vpop.f32.mrf.mxu3  ;;  %646 = vst.msk [vmem:[#allocation2 + $0x20] sm:$0xff] %vm641_vm2, %v630_v50  ;;  %v456_v56 = vadd.f32 %v421_v51, %v295_v49  ;;  %3140 = vmatmul.msk.f32.gmra.mxu0 %vm641_vm2, %v677_v52 }
  0xbe   :  { %v896_v54 = vld [vmem:[#allocation2 + $0x17] sm:$0xff]  ;;  %3155 = vmatmul.msk.f32.gmra.mxu1 %vm641_vm2, %v662_v53  ;;  %3186 = vmatmul.msk.f32.gmra.mxu3 %vm641_vm2, %v662_v53 }
  0xbf   :  { %3170 = vmatmul.msk.f32.gmra.mxu2 %vm641_vm2, %v896_v54  ;;  %v598_v57 = vadd.f32 %v563_v55, %v456_v56  ;;  %v297_v59 = vpop.f32.mrf.mxu1 }
  0xc0   :  { %v187_v58 = vpop.f32.mrf.mxu0 }
  0xc1   :  { %v616_v60 = vadd.f32 %v3753_v1, %v598_v57  ;;  %v298_v61 = vadd.f32 %v297_v59, %v187_v58 }
  0xc3   :  { %v631_v62 = vmax.f32 %v616_v60, 0.0 }
  0xc4   :  { %v424_v63 = vpop.f32.mrf.mxu2  ;;  %v678_v0 = vld [vmem:[#allocation2 + $0x19] sm:$0xff] }
  0xc5   :  { %v663_v2 = vld [vmem:[#allocation2 + $0x20] sm:$0xff]  ;;  %v566_v4 = vpop.f32.mrf.mxu3  ;;  %647 = vst.msk [vmem:[#allocation2 + $0x28] sm:$0xff] %vm641_vm2, %v631_v62  ;;  %v457_v5 = vadd.f32 %v424_v63, %v298_v61  ;;  %3141 = vmatmul.msk.f32.gmra.mxu0 %vm641_vm2, %v678_v0 }
  0xc6   :  { %v897_v3 = vld [vmem:[#allocation2 + $0x1f] sm:$0xff]  ;;  %3156 = vmatmul.msk.f32.gmra.mxu1 %vm641_vm2, %v663_v2  ;;  %3187 = vmatmul.msk.f32.gmra.mxu3 %vm641_vm2, %v663_v2 }
  0xc7   :  { %3171 = vmatmul.msk.f32.gmra.mxu2 %vm641_vm2, %v897_v3  ;;  %v599_v6 = vadd.f32 %v566_v4, %v457_v5  ;;  %v300_v8 = vpop.f32.mrf.mxu1 }
  0xc8   :  { %v190_v7 = vpop.f32.mrf.mxu0 }
  0xc9   :  { %v617_v9 = vadd.f32 %v3753_v1, %v599_v6  ;;  %v301_v10 = vadd.f32 %v300_v8, %v190_v7  ;;  %v3230_v7 = vld [vmem:[%s4116_s7 + $0x50] sm:$0xff] }
  0xca   :  { %v3247_v8 = vld [vmem:[%s4116_s7 + $0x70] sm:$0xff]  ;;  %1501 = vmatpush.msra.mxu2 %v3230_v7 }
  0xcb   :  { %v632_v11 = vmax.f32 %v617_v9, 0.0  ;;  %v3200_v9 = vld [vmem:[%s4116_s7 + $0x30] sm:$0xff]  ;;  %1627 = vmatpush.msra.mxu3 %v3247_v8  ;;  %v3891_v8 = vld [vmem:[%s4115_s6] ss:$0 sm:$0xff]  ;;  %s3026_s6 = sshll.u32 %s3424_s15, 4  ;;  %s3027_s6 = int_to_ptr.vmem [resolvable:$true] %s3026_s6 }
  0xcc   :  { %v427_v12 = vpop.f32.mrf.mxu2  ;;  %v679_v13 = vld [vmem:[#allocation2 + $0x21] sm:$0xff]  ;;  %1293 = vmatpush.msra.mxu0 %v3200_v9 }
  0xcd   :  { %v664_v14 = vld [vmem:[#allocation2 + $0x28] sm:$0xff]  ;;  %v569_v16 = vpop.f32.mrf.mxu3  ;;  %648 = vst.msk [vmem:[#allocation2 + $0x30] sm:$0xff] %vm641_vm2, %v632_v11  ;;  %v458_v17 = vadd.f32 %v427_v12, %v301_v10  ;;  %3142 = vmatmul.msk.f32.gmra.mxu0 %vm641_vm2, %v679_v13  ;;  %v1221_v10 = vld [vmem:[%s4116_s7 + $0x10] sm:$0xff] }
  0xce   :  { %v898_v15 = vld [vmem:[#allocation2 + $0x27] sm:$0xff]  ;;  %3157 = vmatmul.msk.f32.gmra.mxu1 %vm641_vm2, %v664_v14  ;;  %3188 = vmatmul.msk.f32.gmra.mxu3 %vm641_vm2, %v664_v14 }
  0xcf   :  { %3172 = vmatmul.msk.f32.gmra.mxu2 %vm641_vm2, %v898_v15  ;;  %v600_v18 = vadd.f32 %v569_v16, %v458_v17  ;;  %v303_v20 = vpop.f32.mrf.mxu1  ;;  %1388 = vmatpush.msra.mxu1 %v1221_v10 }
  0xd0   :  { %v193_v19 = vpop.f32.mrf.mxu0 }
  0xd1   :  { %v618_v21 = vadd.f32 %v3753_v1, %v600_v18  ;;  %v304_v22 = vadd.f32 %v303_v20, %v193_v19 }
  0xd3   :  { %v633_v23 = vmax.f32 %v618_v21, 0.0 }
  0xd4   :  { %v430_v24 = vpop.f32.mrf.mxu2  ;;  %v680_v25 = vld [vmem:[#allocation2 + $0x29] sm:$0xff] }
  0xd5   :  { %v665_v26 = vld [vmem:[#allocation2 + $0x30] sm:$0xff]  ;;  %v572_v28 = vpop.f32.mrf.mxu3  ;;  %649 = vst.msk [vmem:[#allocation2 + $0x38] sm:$0xff] %vm641_vm2, %v633_v23  ;;  %v459_v29 = vadd.f32 %v430_v24, %v304_v22  ;;  %3143 = vmatmul.msk.f32.gmra.mxu0 %vm641_vm2, %v680_v25 }
  0xd6   :  { %v899_v27 = vld [vmem:[#allocation2 + $0x2f] sm:$0xff]  ;;  %3158 = vmatmul.msk.f32.gmra.mxu1 %vm641_vm2, %v665_v26  ;;  %3189 = vmatmul.msk.f32.gmra.mxu3 %vm641_vm2, %v665_v26 }
  0xd7   :  { %3173 = vmatmul.msk.f32.gmra.mxu2 %vm641_vm2, %v899_v27  ;;  %v601_v31 = vadd.f32 %v572_v28, %v459_v29  ;;  %v306_v33 = vpop.f32.mrf.mxu1 }
  0xd8   :  { %v196_v32 = vpop.f32.mrf.mxu0 }
  0xd9   :  { %v619_v34 = vadd.f32 %v3753_v1, %v601_v31  ;;  %v307_v35 = vadd.f32 %v306_v33, %v196_v32 }
  0xdb   :  { %v634_v36 = vmax.f32 %v619_v34, 0.0 }
  0xdc   :  { %v433_v37 = vpop.f32.mrf.mxu2  ;;  %v681_v38 = vld [vmem:[#allocation2 + $0x31] sm:$0xff] }
  0xdd   :  { %v666_v39 = vld [vmem:[#allocation2 + $0x38] sm:$0xff]  ;;  %v575_v41 = vpop.f32.mrf.mxu3  ;;  %650 = vst.msk [vmem:[#allocation2 + $0x40] sm:$0xff] %vm641_vm2, %v634_v36  ;;  %v460_v42 = vadd.f32 %v433_v37, %v307_v35  ;;  %3144 = vmatmul.msk.f32.gmra.mxu0 %vm641_vm2, %v681_v38 }
  0xde   :  { %v900_v40 = vld [vmem:[#allocation2 + $0x37] sm:$0xff]  ;;  %3159 = vmatmul.msk.f32.gmra.mxu1 %vm641_vm2, %v666_v39  ;;  %3190 = vmatmul.msk.f32.gmra.mxu3 %vm641_vm2, %v666_v39 }
  0xdf   :  { %3174 = vmatmul.msk.f32.gmra.mxu2 %vm641_vm2, %v900_v40  ;;  %v602_v46 = vadd.f32 %v575_v41, %v460_v42  ;;  %v309_v48 = vpop.f32.mrf.mxu1 }
  0xe0   :  { %v199_v47 = vpop.f32.mrf.mxu0 }
  0xe1   :  { %v620_v49 = vadd.f32 %v3753_v1, %v602_v46  ;;  %v310_v50 = vadd.f32 %v309_v48, %v199_v47 }
  0xe3   :  { %v635_v51 = vmax.f32 %v620_v49, 0.0 }
  0xe4   :  { %v436_v52 = vpop.f32.mrf.mxu2  ;;  %v682_v53 = vld [vmem:[#allocation2 + $0x39] sm:$0xff] }
  0xe5   :  { %v667_v54 = vld [vmem:[#allocation2 + $0x40] sm:$0xff]  ;;  %v578_v56 = vpop.f32.mrf.mxu3  ;;  %651 = vst.msk [vmem:[#allocation2 + $0x48] sm:$0xff] %vm641_vm2, %v635_v51  ;;  %v461_v57 = vadd.f32 %v436_v52, %v310_v50  ;;  %3145 = vmatmul.msk.f32.gmra.mxu0 %vm641_vm2, %v682_v53 }
  0xe6   :  { %v901_v55 = vld [vmem:[#allocation2 + $0x3f] sm:$0xff]  ;;  %3160 = vmatmul.msk.f32.gmra.mxu1 %vm641_vm2, %v667_v54  ;;  %3191 = vmatmul.msk.f32.gmra.mxu3 %vm641_vm2, %v667_v54 }
  0xe7   :  { %3175 = vmatmul.msk.f32.gmra.mxu2 %vm641_vm2, %v901_v55  ;;  %v603_v58 = vadd.f32 %v578_v56, %v461_v57  ;;  %v312_v60 = vpop.f32.mrf.mxu1  ;;  %v3246_v57 = vld [vmem:[%s4116_s7 + $0x68] sm:$0xff] }
  0xe8   :  { %v202_v59 = vpop.f32.mrf.mxu0  ;;  %1628 = vmatpush.msra.mxu3 %v3246_v57 }
  0xe9   :  { %v621_v61 = vadd.f32 %v3753_v1, %v603_v58  ;;  %v313_v62 = vadd.f32 %v312_v60, %v202_v59  ;;  %v3199_v58 = vld [vmem:[%s4116_s7 + $0x28] sm:$0xff]  ;;  %v1219_v60 = vld [vmem:[%s4116_s7] sm:$0xff] }
  0xea   :  { %v1220_v59 = vld [vmem:[%s4116_s7 + $0x8] sm:$0xff]  ;;  %1294 = vmatpush.msra.mxu0 %v3199_v58 }
  0xeb   :  { %v636_v63 = vmax.f32 %v621_v61, 0.0  ;;  %1389 = vmatpush.msra.mxu1 %v1220_v59 }
  0xec   :  { %v439_v0 = vpop.f32.mrf.mxu2  ;;  %v683_v2 = vld [vmem:[#allocation2 + $0x41] sm:$0xff] }
  0xed   :  { %v902_v3 = vld [vmem:[#allocation2 + $0x47] sm:$0xff]  ;;  %v581_v4 = vpop.f32.mrf.mxu3  ;;  %652 = vst.msk [vmem:[#allocation2 + $0x50] sm:$0xff] %vm641_vm2, %v636_v63  ;;  %v462_v6 = vadd.f32 %v439_v0, %v313_v62  ;;  %3146 = vmatmul.msk.f32.gmra.mxu0 %vm641_vm2, %v683_v2  ;;  %1390 = vmatpush.msra.mxu1 %v1219_v60 }
  0xee   :  { %v1034_v5 = vld [vmem:[#allocation2 + $0x48] sm:$0xff]  ;;  %v3198_v62 = vld [vmem:[%s4116_s7 + $0x20] sm:$0xff] }
  0xef   :  { %3161 = vmatmul.msk.f32.gmra.mxu1 %vm641_vm2, %v1034_v5  ;;  %3176 = vmatmul.msk.f32.gmra.mxu2 %vm641_vm2, %v902_v3  ;;  %v604_v11 = vadd.f32 %v581_v4, %v462_v6  ;;  %v315_v13 = vpop.f32.mrf.mxu1  ;;  %v3228_v63 = vld [vmem:[%s4116_s7 + $0x40] sm:$0xff] }
  0xf0   :  { %3192 = vmatmul.msk.f32.gmra.mxu3 %vm641_vm2, %v1034_v5  ;;  %v205_v12 = vpop.f32.mrf.mxu0  ;;  %v3245_v0 = vld [vmem:[%s4116_s7 + $0x60] sm:$0xff]  ;;  %1295 = vmatpush.msra.mxu0 %v3198_v62 }
  0xf1   :  { %v622_v14 = vadd.f32 %v3753_v1, %v604_v11  ;;  %v316_v15 = vadd.f32 %v315_v13, %v205_v12  ;;  %1629 = vmatpush.msra.mxu3 %v3245_v0 }
  0xf3   :  { %v637_v16 = vmax.f32 %v622_v14, 0.0 }
  0xf4   :  { %v903_v17 = vld [vmem:[#allocation2 + $0x4f] sm:$0xff]  ;;  %v442_v20 = vpop.f32.mrf.mxu2 }
  0xf5   :  { %v1035_v18 = vld [vmem:[#allocation2 + $0x50] sm:$0xff]  ;;  %v584_v21 = vpop.f32.mrf.mxu3  ;;  %653 = vst.msk [vmem:[#allocation2 + $0x58] sm:$0xff] %vm641_vm2, %v637_v16  ;;  %v463_v22 = vadd.f32 %v442_v20, %v316_v15 }
  0xf6   :  { %v684_v19 = vld [vmem:[#allocation2 + $0x49] sm:$0xff] }
  0xf7   :  { %3147 = vmatmul.msk.f32.gmra.mxu0 %vm641_vm2, %v684_v19  ;;  %3162 = vmatmul.msk.f32.gmra.mxu1 %vm641_vm2, %v1035_v18  ;;  %v605_v23 = vadd.f32 %v584_v21, %v463_v22  ;;  %v318_v25 = vpop.f32.mrf.mxu1 }
  0xf8   :  { %3177 = vmatmul.msk.f32.gmra.mxu2 %vm641_vm2, %v903_v17  ;;  %3193 = vmatmul.msk.f32.gmra.mxu3 %vm641_vm2, %v1035_v18  ;;  %v208_v24 = vpop.f32.mrf.mxu0 }
  0xf9   :  { %v623_v26 = vadd.f32 %v3753_v1, %v605_v23  ;;  %v319_v27 = vadd.f32 %v318_v25, %v208_v24 }
  0xfb   :  { %v638_v28 = vmax.f32 %v623_v26, 0.0 }
  0xfc   :  { %v904_v29 = vld [vmem:[#allocation2 + $0x57] sm:$0xff]  ;;  %v445_v32 = vpop.f32.mrf.mxu2 }
  0xfd   :  { %v1036_v30 = vld [vmem:[#allocation2 + $0x58] sm:$0xff]  ;;  %v587_v33 = vpop.f32.mrf.mxu3  ;;  %654 = vst.msk [vmem:[#allocation2 + $0x60] sm:$0xff] %vm641_vm2, %v638_v28  ;;  %v464_v34 = vadd.f32 %v445_v32, %v319_v27 }
  0xfe   :  { %v685_v31 = vld [vmem:[#allocation2 + $0x51] sm:$0xff] }
  0xff   :  { %3148 = vmatmul.msk.f32.gmra.mxu0 %vm641_vm2, %v685_v31  ;;  %3163 = vmatmul.msk.f32.gmra.mxu1 %vm641_vm2, %v1036_v30  ;;  %v606_v35 = vadd.f32 %v587_v33, %v464_v34  ;;  %v321_v37 = vpop.f32.mrf.mxu1 }
 0x100   :  { %3178 = vmatmul.msk.f32.gmra.mxu2 %vm641_vm2, %v904_v29  ;;  %3194 = vmatmul.msk.f32.gmra.mxu3 %vm641_vm2, %v1036_v30  ;;  %v211_v36 = vpop.f32.mrf.mxu0 }
 0x101   :  { %v624_v38 = vadd.f32 %v3753_v1, %v606_v35  ;;  %v322_v39 = vadd.f32 %v321_v37, %v211_v36 }
 0x103   :  { %v639_v40 = vmax.f32 %v624_v38, 0.0 }
 0x104   :  { %v448_v41 = vpop.f32.mrf.mxu2  ;;  %v905_v42 = vld [vmem:[#allocation2 + $0x5f] sm:$0xff] }
 0x105   :  { %v590_v43 = vpop.f32.mrf.mxu3  ;;  %v1037_v44 = vld [vmem:[#allocation2 + $0x60] sm:$0xff]  ;;  %655 = vst.msk [vmem:[#allocation2 + $0x68] sm:$0xff] %vm641_vm2, %v639_v40  ;;  %v465_v46 = vadd.f32 %v448_v41, %v322_v39 }
 0x106   :  { %v686_v45 = vld [vmem:[#allocation2 + $0x59] sm:$0xff] }
 0x107   :  { %3149 = vmatmul.msk.f32.gmra.mxu0 %vm641_vm2, %v686_v45  ;;  %3164 = vmatmul.msk.f32.gmra.mxu1 %vm641_vm2, %v1037_v44  ;;  %v607_v47 = vadd.f32 %v590_v43, %v465_v46 }
 0x108   :  { %3179 = vmatmul.msk.f32.gmra.mxu2 %vm641_vm2, %v905_v42  ;;  %3195 = vmatmul.msk.f32.gmra.mxu3 %vm641_vm2, %v1037_v44 }
 0x109   :  { %v625_v48 = vadd.f32 %v3753_v1, %v607_v47  ;;  %v3229_v1 = vld [vmem:[%s4116_s7 + $0x48] sm:$0xff] }
 0x10a   :  { %1502 = vmatpush.msra.mxu2 %v3229_v1 }
 0x10b   :  { %v640_v49 = vmax.f32 %v625_v48, 0.0 }
 0x10c   :  { %v906_v50 = vld [vmem:[#allocation2 + $0x67] sm:$0xff]  ;;  %1503 = vmatpush.msra.mxu2 %v3228_v63 }
 0x10d   :  { %v1038_v51 = vld [vmem:[#allocation2 + $0x68] sm:$0xff]  ;;  %657 = vst.msk [vmem:[#allocation2 + $0x70] sm:$0x3] %vm656_vm3, %v640_v49 }
 0x10e   :  { %v687_v52 = vld [vmem:[#allocation2 + $0x61] sm:$0xff]  ;;  %v688_v54 = vld [vmem:[#allocation2 + $0x69] sm:$0x3] }
 0x10f   :  { %3150 = vmatmul.msk.f32.gmra.mxu0 %vm641_vm2, %v687_v52  ;;  %v672_v53 = vld [vmem:[#allocation2 + $0x68] sm:$0x3] }
 0x110   :  { %3180 = vmatmul.msk.f32.gmra.mxu2 %vm641_vm2, %v906_v50  ;;  %3196 = vmatmul.msk.f32.gmra.mxu3 %vm641_vm2, %v1038_v51 }
 0x111   :  { %3165 = vmatmul.msk.f32.gmra.mxu1 %vm641_vm2, %v672_v53 }
 0x114   :  { %v907_v55 = vld [vmem:[#allocation2 + $0x6f] sm:$0x3] }
 0x115   :  { %v1039_v56 = vld [vmem:[#allocation2 + $0x70] sm:$0x3] }
 0x117   :  { %3151 = vmatmul.msk.f32.gmra.mxu0 %vm641_vm2, %v688_v54 }
 0x118   :  { %3181 = vmatmul.msk.f32.gmra.mxu2 %vm641_vm2, %v907_v55  ;;  %3197 = vmatmul.msk.f32.gmra.mxu3 %vm641_vm2, %v1039_v56 }
 0x122   :  { %v852_v61 = vpop.f32.mrf.mxu1 }
 0x12a   :  { %v751_v2 = vpop.f32.mrf.mxu0 }
 0x12b   :  { %v855_v3 = vpop.f32.mrf.mxu1  ;;  %v853_v4 = vadd.f32 %v852_v61, %v751_v2 }
 0x131   :  { %v1102_v6 = vpop.f32.mrf.mxu3 }
 0x132   :  { %v970_v5 = vpop.f32.mrf.mxu2  ;;  %v754_v9 = vpop.f32.mrf.mxu0 }
 0x133   :  { %v1012_v7 = vadd.f32 %v970_v5, %v853_v4  ;;  %v858_v10 = vpop.f32.mrf.mxu1  ;;  %v856_v14 = vadd.f32 %v855_v3, %v754_v9 }
 0x135   :  { %v1144_v11 = vadd.f32 %v1102_v6, %v1012_v7 }
 0x137   :  { %v1161_v12 = vadd.f32 %v3891_v8, %v1144_v11 }
 0x139   :  { %v1175_v13 = vmax.f32 %v1161_v12, 0.0  ;;  %v1105_v16 = vpop.f32.mrf.mxu3 }
 0x13a   :  { %v973_v15 = vpop.f32.mrf.mxu2  ;;  %v757_v18 = vpop.f32.mrf.mxu0 }
 0x13b   :  { %1190 = vst.msk [vmem:[#allocation3] sm:$0xff] %vm1189_vm4, %v1175_v13  ;;  %v1013_v17 = vadd.f32 %v973_v15, %v856_v14  ;;  %v861_v19 = vpop.f32.mrf.mxu1  ;;  %v859_v23 = vadd.f32 %v858_v10, %v757_v18 }
 0x13d   :  { %v1145_v20 = vadd.f32 %v1105_v16, %v1013_v17 }
 0x13f   :  { %v1162_v21 = vadd.f32 %v3891_v8, %v1145_v20 }
 0x141   :  { %v1176_v22 = vmax.f32 %v1162_v21, 0.0  ;;  %v1108_v25 = vpop.f32.mrf.mxu3 }
 0x142   :  { %v976_v24 = vpop.f32.mrf.mxu2  ;;  %v1206_v26 = vld [vmem:[#allocation3] sm:$0xff]  ;;  %v760_v28 = vpop.f32.mrf.mxu0 }
 0x143   :  { %1191 = vst.msk [vmem:[#allocation3 + $0x8] sm:$0xff] %vm1189_vm4, %v1176_v22  ;;  %v1014_v27 = vadd.f32 %v976_v24, %v859_v23  ;;  %3215 = vmatmul.msk.f32.vlgmr.msra.gmra.mxu1 %vm1189_vm4, %v1206_v26  ;;  %v864_v29 = vpop.f32.mrf.mxu1  ;;  %v862_v33 = vadd.f32 %v861_v19, %v760_v28 }
 0x145   :  { %v1146_v30 = vadd.f32 %v1108_v25, %v1014_v27 }
 0x147   :  { %v1163_v31 = vadd.f32 %v3891_v8, %v1146_v30 }
 0x149   :  { %v1177_v32 = vmax.f32 %v1163_v31, 0.0  ;;  %v1111_v35 = vpop.f32.mrf.mxu3 }
 0x14a   :  { %v979_v34 = vpop.f32.mrf.mxu2  ;;  %v1223_v36 = vld [vmem:[#allocation3 + $0x1] sm:$0xff]  ;;  %v763_v40 = vpop.f32.mrf.mxu0 }
 0x14b   :  { %v1207_v37 = vld [vmem:[#allocation3 + $0x8] sm:$0xff]  ;;  %1192 = vst.msk [vmem:[#allocation3 + $0x10] sm:$0xff] %vm1189_vm4, %v1177_v32  ;;  %v1015_v39 = vadd.f32 %v979_v34, %v862_v33  ;;  %3202 = vmatmul.msk.f32.vlgmr.msra.gmra.mxu0 %vm1189_vm4, %v1223_v36  ;;  %v867_v41 = vpop.f32.mrf.mxu1  ;;  %v865_v45 = vadd.f32 %v864_v29, %v763_v40 }
 0x14c   :  { %v1431_v38 = vld [vmem:[#allocation3 + $0x7] sm:$0xff]  ;;  %3216 = vmatmul.msk.f32.gmra.mxu1 %vm1189_vm4, %v1207_v37  ;;  %3249 = vmatmul.msk.f32.vlgmr.msra.gmra.mxu3 %vm1189_vm4, %v1207_v37 }
 0x14d   :  { %3232 = vmatmul.msk.f32.vlgmr.msra.gmra.mxu2 %vm1189_vm4, %v1431_v38  ;;  %v1147_v42 = vadd.f32 %v1111_v35, %v1015_v39 }
 0x14f   :  { %v1164_v43 = vadd.f32 %v3891_v8, %v1147_v42 }
 0x151   :  { %v1178_v44 = vmax.f32 %v1164_v43, 0.0  ;;  %v1114_v47 = vpop.f32.mrf.mxu3 }
 0x152   :  { %v982_v46 = vpop.f32.mrf.mxu2  ;;  %v1224_v48 = vld [vmem:[#allocation3 + $0x9] sm:$0xff]  ;;  %v766_v52 = vpop.f32.mrf.mxu0 }
 0x153   :  { %v1208_v49 = vld [vmem:[#allocation3 + $0x10] sm:$0xff]  ;;  %1193 = vst.msk [vmem:[#allocation3 + $0x18] sm:$0xff] %vm1189_vm4, %v1178_v44  ;;  %v1016_v51 = vadd.f32 %v982_v46, %v865_v45  ;;  %3203 = vmatmul.msk.f32.gmra.mxu0 %vm1189_vm4, %v1224_v48  ;;  %v870_v53 = vpop.f32.mrf.mxu1  ;;  %v868_v1 = vadd.f32 %v867_v41, %v766_v52 }
 0x154   :  { %v1432_v50 = vld [vmem:[#allocation3 + $0xf] sm:$0xff]  ;;  %3217 = vmatmul.msk.f32.gmra.mxu1 %vm1189_vm4, %v1208_v49  ;;  %3250 = vmatmul.msk.f32.gmra.mxu3 %vm1189_vm4, %v1208_v49 }
 0x155   :  { %3233 = vmatmul.msk.f32.gmra.mxu2 %vm1189_vm4, %v1432_v50  ;;  %v1148_v54 = vadd.f32 %v1114_v47, %v1016_v51 }
 0x157   :  { %v1165_v55 = vadd.f32 %v3891_v8, %v1148_v54 }
 0x159   :  { %v1179_v56 = vmax.f32 %v1165_v55, 0.0  ;;  %v1117_v58 = vpop.f32.mrf.mxu3 }
 0x15a   :  { %v985_v57 = vpop.f32.mrf.mxu2  ;;  %v1225_v59 = vld [vmem:[#allocation3 + $0x11] sm:$0xff]  ;;  %v769_v63 = vpop.f32.mrf.mxu0 }
 0x15b   :  { %v1209_v60 = vld [vmem:[#allocation3 + $0x18] sm:$0xff]  ;;  %1194 = vst.msk [vmem:[#allocation3 + $0x20] sm:$0xff] %vm1189_vm4, %v1179_v56  ;;  %v1017_v62 = vadd.f32 %v985_v57, %v868_v1  ;;  %3204 = vmatmul.msk.f32.gmra.mxu0 %vm1189_vm4, %v1225_v59  ;;  %v873_v0 = vpop.f32.mrf.mxu1  ;;  %v871_v5 = vadd.f32 %v870_v53, %v769_v63 }
 0x15c   :  { %v1433_v61 = vld [vmem:[#allocation3 + $0x17] sm:$0xff]  ;;  %3218 = vmatmul.msk.f32.gmra.mxu1 %vm1189_vm4, %v1209_v60  ;;  %3251 = vmatmul.msk.f32.gmra.mxu3 %vm1189_vm4, %v1209_v60 }
 0x15d   :  { %3234 = vmatmul.msk.f32.gmra.mxu2 %vm1189_vm4, %v1433_v61  ;;  %v1149_v2 = vadd.f32 %v1117_v58, %v1017_v62 }
 0x15f   :  { %v1166_v3 = vadd.f32 %v3891_v8, %v1149_v2 }
 0x161   :  { %v1180_v4 = vmax.f32 %v1166_v3, 0.0  ;;  %v1120_v7 = vpop.f32.mrf.mxu3 }
 0x162   :  { %v988_v6 = vpop.f32.mrf.mxu2  ;;  %v1226_v9 = vld [vmem:[#allocation3 + $0x19] sm:$0xff]  ;;  %v772_v13 = vpop.f32.mrf.mxu0 }
 0x163   :  { %v1210_v10 = vld [vmem:[#allocation3 + $0x20] sm:$0xff]  ;;  %1195 = vst.msk [vmem:[#allocation3 + $0x28] sm:$0xff] %vm1189_vm4, %v1180_v4  ;;  %v1018_v12 = vadd.f32 %v988_v6, %v871_v5  ;;  %3205 = vmatmul.msk.f32.gmra.mxu0 %vm1189_vm4, %v1226_v9  ;;  %v876_v15 = vpop.f32.mrf.mxu1  ;;  %v874_v18 = vadd.f32 %v873_v0, %v772_v13 }
 0x164   :  { %v1434_v11 = vld [vmem:[#allocation3 + $0x1f] sm:$0xff]  ;;  %3219 = vmatmul.msk.f32.gmra.mxu1 %vm1189_vm4, %v1210_v10  ;;  %3252 = vmatmul.msk.f32.gmra.mxu3 %vm1189_vm4, %v1210_v10 }
 0x165   :  { %3235 = vmatmul.msk.f32.gmra.mxu2 %vm1189_vm4, %v1434_v11  ;;  %v1150_v14 = vadd.f32 %v1120_v7, %v1018_v12 }
 0x167   :  { %v1167_v16 = vadd.f32 %v3891_v8, %v1150_v14 }
 0x169   :  { %v1181_v17 = vmax.f32 %v1167_v16, 0.0  ;;  %v1123_v20 = vpop.f32.mrf.mxu3 }
 0x16a   :  { %v991_v19 = vpop.f32.mrf.mxu2  ;;  %v1227_v21 = vld [vmem:[#allocation3 + $0x21] sm:$0xff]  ;;  %v775_v25 = vpop.f32.mrf.mxu0 }
 0x16b   :  { %v1211_v22 = vld [vmem:[#allocation3 + $0x28] sm:$0xff]  ;;  %1196 = vst.msk [vmem:[#allocation3 + $0x30] sm:$0xff] %vm1189_vm4, %v1181_v17  ;;  %v1019_v24 = vadd.f32 %v991_v19, %v874_v18  ;;  %3206 = vmatmul.msk.f32.gmra.mxu0 %vm1189_vm4, %v1227_v21  ;;  %v877_v30 = vadd.f32 %v876_v15, %v775_v25 }
 0x16c   :  { %v1435_v23 = vld [vmem:[#allocation3 + $0x27] sm:$0xff]  ;;  %3220 = vmatmul.msk.f32.gmra.mxu1 %vm1189_vm4, %v1211_v22  ;;  %3253 = vmatmul.msk.f32.gmra.mxu3 %vm1189_vm4, %v1211_v22  ;;  %v879_v27 = vpop.f32.mrf.mxu1 }
 0x16d   :  { %3236 = vmatmul.msk.f32.gmra.mxu2 %vm1189_vm4, %v1435_v23  ;;  %v1151_v26 = vadd.f32 %v1123_v20, %v1019_v24 }
 0x16f   :  { %v1168_v28 = vadd.f32 %v3891_v8, %v1151_v26 }
 0x171   :  { %v1182_v29 = vmax.f32 %v1168_v28, 0.0 }
 0x172   :  { %v994_v31 = vpop.f32.mrf.mxu2  ;;  %v1228_v32 = vld [vmem:[#allocation3 + $0x29] sm:$0xff] }
 0x173   :  { %v1212_v33 = vld [vmem:[#allocation3 + $0x30] sm:$0xff]  ;;  %v1126_v35 = vpop.f32.mrf.mxu3  ;;  %1197 = vst.msk [vmem:[#allocation3 + $0x38] sm:$0xff] %vm1189_vm4, %v1182_v29  ;;  %v1020_v36 = vadd.f32 %v994_v31, %v877_v30  ;;  %3207 = vmatmul.msk.f32.gmra.mxu0 %vm1189_vm4, %v1228_v32 }
 0x174   :  { %v1436_v34 = vld [vmem:[#allocation3 + $0x2f] sm:$0xff]  ;;  %3221 = vmatmul.msk.f32.gmra.mxu1 %vm1189_vm4, %v1212_v33  ;;  %v778_v37 = vpop.f32.mrf.mxu0  ;;  %3254 = vmatmul.msk.f32.gmra.mxu3 %vm1189_vm4, %v1212_v33  ;;  %v882_v41 = vpop.f32.mrf.mxu1 }
 0x175   :  { %3237 = vmatmul.msk.f32.gmra.mxu2 %vm1189_vm4, %v1436_v34  ;;  %v1152_v38 = vadd.f32 %v1126_v35, %v1020_v36  ;;  %v880_v40 = vadd.f32 %v879_v27, %v778_v37 }
 0x177   :  { %v1169_v39 = vadd.f32 %v3891_v8, %v1152_v38 }
 0x179   :  { %v1183_v42 = vmax.f32 %v1169_v39, 0.0 }
 0x17a   :  { %v1229_v44 = vld [vmem:[#allocation3 + $0x31] sm:$0xff] }
 0x17b   :  { %v997_v43 = vpop.f32.mrf.mxu2  ;;  %v1213_v45 = vld [vmem:[#allocation3 + $0x38] sm:$0xff]  ;;  %v1129_v47 = vpop.f32.mrf.mxu3  ;;  %1198 = vst.msk [vmem:[#allocation3 + $0x40] sm:$0xff] %vm1189_vm4, %v1183_v42  ;;  %3208 = vmatmul.msk.f32.gmra.mxu0 %vm1189_vm4, %v1229_v44 }
 0x17c   :  { %v1437_v46 = vld [vmem:[#allocation3 + $0x37] sm:$0xff]  ;;  %v1021_v48 = vadd.f32 %v997_v43, %v880_v40  ;;  %3222 = vmatmul.msk.f32.gmra.mxu1 %vm1189_vm4, %v1213_v45  ;;  %v781_v49 = vpop.f32.mrf.mxu0  ;;  %3255 = vmatmul.msk.f32.gmra.mxu3 %vm1189_vm4, %v1213_v45  ;;  %v885_v53 = vpop.f32.mrf.mxu1 }
 0x17d   :  { %3238 = vmatmul.msk.f32.gmra.mxu2 %vm1189_vm4, %v1437_v46  ;;  %v883_v52 = vadd.f32 %v882_v41, %v781_v49  ;;  %v1809_v41 = vld [vmem:[#allocation5 + $0x38] sm:$0xff]  ;;  %v1734_v49 = vld [vmem:[%s4119_s10 + $0x30] sm:$0xff] }
 0x17e   :  { %v1153_v50 = vadd.f32 %v1129_v47, %v1021_v48  ;;  %v1824_v45 = vunpack.c.l.bf16 %v1809_v41  ;;  %v1825_v47 = vunpack.c.h.bf16 %v1809_v41 }
 0x180   :  { %v1170_v51 = vadd.f32 %v3891_v8, %v1153_v50  ;;  %1837 = vmatpush.msrb.mxu2 %v1824_v45  ;;  %1857 = vmatpush.msrb.mxu3 %v1825_v47  ;;  %v1808_v50 = vld [vmem:[#allocation5 + $0x30] sm:$0xff] }
 0x182   :  { %v1184_v54 = vmax.f32 %v1170_v51, 0.0  ;;  %v1230_v56 = vld [vmem:[#allocation3 + $0x39] sm:$0xff]  ;;  %v1748_v51 = vunpack.c.l.bf16 %v1734_v49 }
 0x183   :  { %v1000_v55 = vpop.f32.mrf.mxu2  ;;  %v1214_v1 = vld [vmem:[#allocation3 + $0x40] sm:$0xff]  ;;  %v1132_v58 = vpop.f32.mrf.mxu3  ;;  %3209 = vmatmul.msk.f32.gmra.mxu0 %vm1189_vm4, %v1230_v56 }
 0x184   :  { %v1438_v57 = vld [vmem:[#allocation3 + $0x3f] sm:$0xff]  ;;  %1199 = vst.msk [vmem:[#allocation3 + $0x48] sm:$0xff] %vm1189_vm4, %v1184_v54  ;;  %v1022_v59 = vadd.f32 %v1000_v55, %v883_v52  ;;  %3223 = vmatmul.msk.f32.gmra.mxu1 %vm1189_vm4, %v1214_v1  ;;  %v784_v60 = vpop.f32.mrf.mxu0  ;;  %3256 = vmatmul.msk.f32.gmra.mxu3 %vm1189_vm4, %v1214_v1  ;;  %v888_v2 = vpop.f32.mrf.mxu1  ;;  %v1822_v52 = vunpack.c.l.bf16 %v1808_v50  ;;  %v1823_v54 = vunpack.c.h.bf16 %v1808_v50  ;;  %v1733_v55 = vld [vmem:[%s4119_s10 + $0x28] sm:$0xff] }
 0x185   :  { %3239 = vmatmul.msk.f32.gmra.mxu2 %vm1189_vm4, %v1438_v57  ;;  %v886_v63 = vadd.f32 %v885_v53, %v784_v60  ;;  %v1749_v53 = vunpack.c.h.bf16 %v1734_v49  ;;  %v1746_v56 = vunpack.c.l.bf16 %v1733_v55  ;;  %v1747_v1 = vunpack.c.h.bf16 %v1733_v55  ;;  %v1732_v57 = vld [vmem:[%s4119_s10 + $0x20] sm:$0xff] }
 0x186   :  { %v1154_v61 = vadd.f32 %v1132_v58, %v1022_v59  ;;  %1838 = vmatpush.msrb.mxu2 %v1822_v52  ;;  %1858 = vmatpush.msrb.mxu3 %v1823_v54  ;;  %v1744_v58 = vunpack.c.l.bf16 %v1732_v57  ;;  %v1745_v59 = vunpack.c.h.bf16 %v1732_v57  ;;  %v1876_v52 = vld [vmem:[#allocation5 + $0x50] sm:$0xff]  ;;  %v1803_v57 = vld [vmem:[#allocation5 + $0x8] sm:$0xff] }
 0x188   :  { %v1171_v62 = vadd.f32 %v3891_v8, %v1154_v61 }
 0x18a   :  { %v1185_v0 = vmax.f32 %v1171_v62, 0.0  ;;  %v1807_v62 = vld [vmem:[#allocation5 + $0x28] sm:$0xff] }
 0x18b   :  { %v1231_v3 = vld [vmem:[#allocation3 + $0x41] sm:$0xff]  ;;  %v1003_v6 = vpop.f32.mrf.mxu2  ;;  %v1135_v7 = vpop.f32.mrf.mxu3 }
 0x18c   :  { %v1439_v4 = vld [vmem:[#allocation3 + $0x47] sm:$0xff]  ;;  %1200 = vst.msk [vmem:[#allocation3 + $0x50] sm:$0xff] %vm1189_vm4, %v1185_v0  ;;  %3210 = vmatmul.msk.f32.gmra.mxu0 %vm1189_vm4, %v1231_v3  ;;  %v1023_v9 = vadd.f32 %v1003_v6, %v886_v63  ;;  %v787_v10 = vpop.f32.mrf.mxu0  ;;  %v1820_v0 = vunpack.c.l.bf16 %v1807_v62 }
 0x18d   :  { %v1565_v5 = vld [vmem:[#allocation3 + $0x48] sm:$0xff]  ;;  %3240 = vmatmul.msk.f32.gmra.mxu2 %vm1189_vm4, %v1439_v4  ;;  %v889_v13 = vadd.f32 %v888_v2, %v787_v10  ;;  %v1731_v63 = vld [vmem:[%s4119_s10 + $0x18] sm:$0xff]  ;;  %v1730_v4 = vld [vmem:[%s4119_s10 + $0x10] sm:$0xff] }
 0x18e   :  { %3224 = vmatmul.msk.f32.gmra.mxu1 %vm1189_vm4, %v1565_v5  ;;  %3257 = vmatmul.msk.f32.gmra.mxu3 %vm1189_vm4, %v1565_v5  ;;  %v1155_v11 = vadd.f32 %v1135_v7, %v1023_v9  ;;  %v891_v22 = vpop.f32.mrf.mxu1  ;;  %v1742_v2 = vunpack.c.l.bf16 %v1731_v63  ;;  %v1743_v3 = vunpack.c.h.bf16 %v1731_v63  ;;  %v1740_v5 = vunpack.c.l.bf16 %v1730_v4  ;;  %v1729_v7 = vld [vmem:[%s4119_s10 + $0x8] sm:$0xff] }
 0x18f   :  { %1839 = vmatpush.msrb.mxu2 %v1820_v0  ;;  %v1741_v6 = vunpack.c.h.bf16 %v1730_v4  ;;  %v1738_v9 = vunpack.c.l.bf16 %v1729_v7  ;;  %v1739_v10 = vunpack.c.h.bf16 %v1729_v7 }
 0x190   :  { %v1172_v12 = vadd.f32 %v3891_v8, %v1155_v11 }
 0x192   :  { %v1186_v14 = vmax.f32 %v1172_v12, 0.0  ;;  %v1728_v12 = vld [vmem:[%s4119_s10] sm:$0xff] }
 0x193   :  { %v1440_v15 = vld [vmem:[#allocation3 + $0x4f] sm:$0xff]  ;;  %v1006_v18 = vpop.f32.mrf.mxu2  ;;  %v1138_v19 = vpop.f32.mrf.mxu3 }
 0x194   :  { %v1232_v16 = vld [vmem:[#allocation3 + $0x49] sm:$0xff]  ;;  %1201 = vst.msk [vmem:[#allocation3 + $0x58] sm:$0xff] %vm1189_vm4, %v1186_v14  ;;  %v1024_v20 = vadd.f32 %v1006_v18, %v889_v13  ;;  %v790_v21 = vpop.f32.mrf.mxu0 }
 0x195   :  { %v1566_v17 = vld [vmem:[#allocation3 + $0x50] sm:$0xff]  ;;  %3211 = vmatmul.msk.f32.gmra.mxu0 %vm1189_vm4, %v1232_v16  ;;  %3241 = vmatmul.msk.f32.gmra.mxu2 %vm1189_vm4, %v1440_v15  ;;  %v892_v25 = vadd.f32 %v891_v22, %v790_v21  ;;  %v1736_v15 = vunpack.c.l.bf16 %v1728_v12  ;;  %v1737_v16 = vunpack.c.h.bf16 %v1728_v12  ;;  %v1821_v22 = vunpack.c.h.bf16 %v1807_v62 }
 0x196   :  { %3225 = vmatmul.msk.f32.gmra.mxu1 %vm1189_vm4, %v1566_v17  ;;  %3258 = vmatmul.msk.f32.gmra.mxu3 %vm1189_vm4, %v1566_v17  ;;  %v1156_v23 = vadd.f32 %v1138_v19, %v1024_v20  ;;  %v1881_v17 = vld [vmem:[#allocation5 + $0x78] sm:$0xff]  ;;  %v3999_v19 = vld [vmem:[%s4117_s8] ss:$0 sm:$0xff]  ;;  %s3037_s8 = sshll.u32 %s3422_s29, 4  ;;  %s3038_s8 = int_to_ptr.vmem [resolvable:$true] %s3037_s8 }
 0x197   :  { %1859 = vmatpush.msrb.mxu3 %v1821_v22 }
 0x198   :  { %v1173_v24 = vadd.f32 %v3891_v8, %v1156_v23  ;;  %v1896_v23 = vunpack.c.l.bf16 %v1881_v17 }
 0x19a   :  { %v1187_v26 = vmax.f32 %v1173_v24, 0.0  ;;  %v1897_v24 = vunpack.c.h.bf16 %v1881_v17 }
 0x19b   :  { %v1009_v27 = vpop.f32.mrf.mxu2  ;;  %v1441_v28 = vld [vmem:[#allocation3 + $0x57] sm:$0xff]  ;;  %v1141_v29 = vpop.f32.mrf.mxu3 }
 0x19c   :  { %v1567_v30 = vld [vmem:[#allocation3 + $0x58] sm:$0xff]  ;;  %1202 = vst.msk [vmem:[#allocation3 + $0x60] sm:$0xff] %vm1189_vm4, %v1187_v26  ;;  %v1025_v32 = vadd.f32 %v1009_v27, %v892_v25  ;;  %v1880_v25 = vld [vmem:[#allocation5 + $0x70] sm:$0xff] }
 0x19d   :  { %v1233_v31 = vld [vmem:[#allocation3 + $0x51] sm:$0xff]  ;;  %3242 = vmatmul.msk.f32.gmra.mxu2 %vm1189_vm4, %v1441_v28  ;;  %v1894_v27 = vunpack.c.l.bf16 %v1880_v25  ;;  %v1895_v28 = vunpack.c.h.bf16 %v1880_v25 }
 0x19e   :  { %3212 = vmatmul.msk.f32.gmra.mxu0 %vm1189_vm4, %v1233_v31  ;;  %3226 = vmatmul.msk.f32.gmra.mxu1 %vm1189_vm4, %v1567_v30  ;;  %v1157_v33 = vadd.f32 %v1141_v29, %v1025_v32  ;;  %v1879_v29 = vld [vmem:[#allocation5 + $0x68] sm:$0xff] }
 0x19f   :  { %3259 = vmatmul.msk.f32.gmra.mxu3 %vm1189_vm4, %v1567_v30  ;;  %v1892_v31 = vunpack.c.l.bf16 %v1879_v29  ;;  %v1893_v32 = vunpack.c.h.bf16 %v1879_v29 }
 0x1a0   :  { %v1174_v34 = vadd.f32 %v3891_v8, %v1157_v33  ;;  %v1735_v8 = vld [vmem:[%s4119_s10 + $0x38] sm:$0xff] }
 0x1a1   :  { %v1750_v44 = vunpack.c.l.bf16 %v1735_v8  ;;  %v1751_v46 = vunpack.c.h.bf16 %v1735_v8 }
 0x1a2   :  { %v1188_v35 = vmax.f32 %v1174_v34, 0.0  ;;  %v1806_v34 = vld [vmem:[#allocation5 + $0x20] sm:$0xff] }
 0x1a3   :  { %v1442_v36 = vld [vmem:[#allocation3 + $0x5f] sm:$0xff]  ;;  %1769 = vmatpush.msrb.mxu0 %v1750_v44  ;;  %1789 = vmatpush.msrb.mxu1 %v1751_v46 }
 0x1a4   :  { %v1568_v37 = vld [vmem:[#allocation3 + $0x60] sm:$0xff]  ;;  %1204 = vst.msk [vmem:[#allocation3 + $0x68] sm:$0x3] %vm1203_vm5, %v1188_v35  ;;  %v1878_v35 = vld [vmem:[#allocation5 + $0x60] sm:$0xff] }
 0x1a5   :  { %v1234_v38 = vld [vmem:[#allocation3 + $0x59] sm:$0xff]  ;;  %3243 = vmatmul.msk.f32.gmra.mxu2 %vm1189_vm4, %v1442_v36  ;;  %v1235_v40 = vld [vmem:[#allocation3 + $0x61] sm:$0x3]  ;;  %1770 = vmatpush.msrb.mxu0 %v1748_v51  ;;  %v1891_v41 = vunpack.c.h.bf16 %v1878_v35  ;;  %v1804_v51 = vld [vmem:[#allocation5 + $0x10] sm:$0xff] }
 0x1a6   :  { %3213 = vmatmul.msk.f32.gmra.mxu0 %vm1189_vm4, %v1234_v38  ;;  %v1218_v39 = vld [vmem:[#allocation3 + $0x60] sm:$0x3]  ;;  %1790 = vmatpush.msrb.mxu1 %v1749_v53  ;;  %v1819_v38 = vunpack.c.h.bf16 %v1806_v34  ;;  %v1814_v54 = vunpack.c.l.bf16 %v1804_v51  ;;  %v1815_v55 = vunpack.c.h.bf16 %v1804_v51 }
 0x1a7   :  { %3260 = vmatmul.msk.f32.gmra.mxu3 %vm1189_vm4, %v1568_v37  ;;  %3227 = vmatmul.msk.f32.gmra.mxu1 %vm1189_vm4, %v1218_v39  ;;  %v1818_v37 = vunpack.c.l.bf16 %v1806_v34  ;;  %v1890_v39 = vunpack.c.l.bf16 %v1878_v35 }
 0x1a8   :  { %1771 = vmatpush.msrb.mxu0 %v1746_v56  ;;  %1791 = vmatpush.msrb.mxu1 %v1747_v1  ;;  %v1886_v56 = vunpack.c.l.bf16 %v1876_v52  ;;  %v1887_v1 = vunpack.c.h.bf16 %v1876_v52 }
 0x1a9   :  { %1840 = vmatpush.msrb.mxu2 %v1818_v37  ;;  %1860 = vmatpush.msrb.mxu3 %v1819_v38  ;;  %v1950_v37 = vld [vmem:[#allocation5 + $0xa0] sm:$0xff] }
 0x1aa   :  { %1772 = vmatpush.msrb.mxu0 %v1744_v58  ;;  %1792 = vmatpush.msrb.mxu1 %v1745_v59  ;;  %v1875_v58 = vld [vmem:[#allocation5 + $0x48] sm:$0xff]  ;;  %v2022_v38 = vld [vmem:[#allocation5 + $0xe0] sm:$0xff] }
 0x1ab   :  { %v1443_v42 = vld [vmem:[#allocation3 + $0x67] sm:$0x3]  ;;  %v1884_v62 = vunpack.c.l.bf16 %v1875_v58  ;;  %v1885_v0 = vunpack.c.h.bf16 %v1875_v58 }
 0x1ac   :  { %v1569_v43 = vld [vmem:[#allocation3 + $0x68] sm:$0x3]  ;;  %1773 = vmatpush.msrb.mxu0 %v1742_v2  ;;  %1793 = vmatpush.msrb.mxu1 %v1743_v3  ;;  %v1802_v2 = vld [vmem:[#allocation5] sm:$0xff] }
 0x1ad   :  { %3244 = vmatmul.msk.f32.gmra.mxu2 %vm1189_vm4, %v1443_v42  ;;  %v1805_v42 = vld [vmem:[#allocation5 + $0x18] sm:$0xff]  ;;  %v1874_v3 = vld [vmem:[#allocation5 + $0x40] sm:$0xff] }
 0x1ae   :  { %3214 = vmatmul.msk.f32.gmra.mxu0 %vm1189_vm4, %v1235_v40  ;;  %1794 = vmatpush.msrb.mxu1 %v1741_v6  ;;  %v1816_v47 = vunpack.c.l.bf16 %v1805_v42  ;;  %v1811_v6 = vunpack.c.h.bf16 %v1802_v2  ;;  %v1882_v7 = vunpack.c.l.bf16 %v1874_v3 }
 0x1af   :  { %3261 = vmatmul.msk.f32.gmra.mxu3 %vm1189_vm4, %v1569_v43  ;;  %1774 = vmatpush.msrb.mxu0 %v1740_v5  ;;  %v1877_v43 = vld [vmem:[#allocation5 + $0x58] sm:$0xff]  ;;  %v1810_v5 = vunpack.c.l.bf16 %v1802_v2 }
 0x1b0   :  { %1795 = vmatpush.msrb.mxu1 %v1739_v10  ;;  %v1888_v49 = vunpack.c.l.bf16 %v1877_v43  ;;  %v1889_v50 = vunpack.c.h.bf16 %v1877_v43  ;;  %1841 = vmatpush.msrb.mxu2 %v1816_v47  ;;  %v2025_v10 = vld [vmem:[#allocation5 + $0xf8] sm:$0xff]  ;;  %v2035_v43 = vunpack.c.h.bf16 %v2022_v38 }
 0x1b1   :  { %1775 = vmatpush.msrb.mxu0 %v1738_v9  ;;  %v1953_v9 = vld [vmem:[#allocation5 + $0xb8] sm:$0xff]  ;;  %v2041_v22 = vunpack.c.h.bf16 %v2025_v10 }
 0x1b2   :  { %1796 = vmatpush.msrb.mxu1 %v1737_v16  ;;  %1842 = vmatpush.msrb.mxu2 %v1814_v54 }
 0x1b3   :  { %1776 = vmatpush.msrb.mxu0 %v1736_v15  ;;  %v1969_v15 = vunpack.c.h.bf16 %v1953_v9 }
 0x1b4   :  { %1929 = vmatpush.msra.mxu1 %v1897_v24  ;;  %v2024_v24 = vld [vmem:[#allocation5 + $0xf0] sm:$0xff] }
 0x1b5   :  { %1909 = vmatpush.msra.mxu0 %v1896_v23  ;;  %v1952_v23 = vld [vmem:[#allocation5 + $0xb0] sm:$0xff]  ;;  %v2039_v29 = vunpack.c.h.bf16 %v2024_v24 }
 0x1b6   :  { %1930 = vmatpush.msra.mxu1 %v1895_v28  ;;  %v1966_v25 = vunpack.c.l.bf16 %v1952_v23  ;;  %v2038_v28 = vunpack.c.l.bf16 %v2024_v24 }
 0x1b7   :  { %1910 = vmatpush.msra.mxu0 %v1894_v27 }
 0x1b8   :  { %1931 = vmatpush.msra.mxu1 %v1893_v32 }
 0x1b9   :  { %1911 = vmatpush.msra.mxu0 %v1892_v31  ;;  %v2023_v31 = vld [vmem:[#allocation5 + $0xe8] sm:$0xff] }
 0x1ba   :  { %1932 = vmatpush.msra.mxu1 %v1891_v41  ;;  %v2036_v35 = vunpack.c.l.bf16 %v2023_v31 }
 0x1bb   :  { %1912 = vmatpush.msra.mxu0 %v1890_v39  ;;  %v1962_v39 = vunpack.c.l.bf16 %v1950_v37 }
 0x1bc   :  { %1933 = vmatpush.msra.mxu1 %v1889_v50 }
 0x1bd   :  { %1913 = vmatpush.msra.mxu0 %v1888_v49 }
 0x1be   :  { %1934 = vmatpush.msra.mxu1 %v1887_v1 }
 0x1bf   :  { %1914 = vmatpush.msra.mxu0 %v1886_v56  ;;  %v2020_v56 = vld [vmem:[#allocation5 + $0xd0] sm:$0xff] }
 0x1c0   :  { %v1392_v48 = vpop.f32.mrf.mxu1  ;;  %1935 = vmatpush.msra.mxu1 %v1885_v0 }
 0x1c1   :  { %1915 = vmatpush.msra.mxu0 %v1884_v62  ;;  %v2019_v62 = vld [vmem:[#allocation5 + $0xc8] sm:$0xff] }
 0x1c3   :  { %1916 = vmatpush.msra.mxu0 %v1882_v7 }
 0x1c8   :  { %v1297_v60 = vpop.f32.mrf.mxu0 }
 0x1c9   :  { %v1395_v61 = vpop.f32.mrf.mxu1  ;;  %v1393_v11 = vadd.f32 %v1392_v48, %v1297_v60  ;;  %v1817_v48 = vunpack.c.h.bf16 %v1805_v42  ;;  %v1812_v60 = vunpack.c.l.bf16 %v1803_v57  ;;  %v2034_v42 = vunpack.c.l.bf16 %v2022_v38 }
 0x1cb   :  { %1861 = vmatpush.msrb.mxu3 %v1817_v48  ;;  %1843 = vmatpush.msrb.mxu2 %v1812_v60  ;;  %v2031_v60 = vunpack.c.h.bf16 %v2020_v56 }
 0x1cd   :  { %1862 = vmatpush.msrb.mxu3 %v1815_v55  ;;  %1844 = vmatpush.msrb.mxu2 %v1810_v5  ;;  %v1948_v55 = vld [vmem:[#allocation5 + $0x90] sm:$0xff]  ;;  %v1946_v5 = vld [vmem:[#allocation5 + $0x80] sm:$0xff] }
 0x1ce   :  { %v1958_v1 = vunpack.c.l.bf16 %v1948_v55  ;;  %v1954_v7 = vunpack.c.l.bf16 %v1946_v5 }
 0x1cf   :  { %v1631_v14 = vpop.f32.mrf.mxu3 }
 0x1d0   :  { %v1505_v13 = vpop.f32.mrf.mxu2  ;;  %v1300_v20 = vpop.f32.mrf.mxu0 }
 0x1d1   :  { %v1544_v18 = vadd.f32 %v1505_v13, %v1393_v11  ;;  %v4001_v21 = vpop.f32.mrf.mxu1  ;;  %v1396_v33 = vadd.f32 %v1395_v61, %v1300_v20  ;;  %v1813_v61 = vunpack.c.h.bf16 %v1803_v57  ;;  %v1883_v13 = vunpack.c.h.bf16 %v1874_v3  ;;  %v1727_v20 = vld [vmem:[%s4110_s1] sm:$0x3] }
 0x1d2   :  { %3262 = vmatmul.msk.f32.vlgmr.msrb.gmra.mxu0 %vm1712_vm6, %v1727_v20  ;;  %3263 = vmatmul.msk.f32.vlgmr.msrb.gmra.mxu1 %vm1712_vm6, %v1727_v20  ;;  %v1959_v57 = vunpack.c.h.bf16 %v1948_v55  ;;  %v2028_v3 = vunpack.c.l.bf16 %v2019_v62 }
 0x1d3   :  { %v1670_v26 = vadd.f32 %v1631_v14, %v1544_v18  ;;  %1863 = vmatpush.msrb.mxu3 %v1813_v61  ;;  %v1968_v14 = vunpack.c.l.bf16 %v1953_v9  ;;  %1936 = vmatpush.msra.mxu1 %v1883_v13  ;;  %v1947_v61 = vld [vmem:[#allocation5 + $0x88] sm:$0xff]  ;;  %v1955_v9 = vunpack.c.h.bf16 %v1946_v5 }
 0x1d4   :  { %v1957_v0 = vunpack.c.h.bf16 %v1947_v61 }
 0x1d5   :  { %v1686_v30 = vadd.f32 %v3999_v19, %v1670_v26  ;;  %1864 = vmatpush.msrb.mxu3 %v1811_v6  ;;  %v1967_v26 = vunpack.c.h.bf16 %v1952_v23  ;;  %1981 = vmatpush.msra.mxu2 %v1968_v14  ;;  %v2018_v6 = vld [vmem:[#allocation5 + $0xc0] sm:$0xff] }
 0x1d6   :  { %2073 = vmatpush.msrb.mxu1 %v2041_v22 }
 0x1d7   :  { %v1699_v36 = vmax.f32 %v1686_v30, 0.0  ;;  %v1634_v8 = vpop.f32.mrf.mxu3  ;;  %v1951_v30 = vld [vmem:[#allocation5 + $0xa8] sm:$0xff]  ;;  %2001 = vmatpush.msra.mxu3 %v1969_v15  ;;  %1982 = vmatpush.msra.mxu2 %v1966_v25 }
 0x1d8   :  { %v1508_v40 = vpop.f32.mrf.mxu2  ;;  %v1303_v45 = vpop.f32.mrf.mxu0  ;;  %v1964_v32 = vunpack.c.l.bf16 %v1951_v30  ;;  %2074 = vmatpush.msrb.mxu1 %v2039_v29 }
 0x1d9   :  { %1713 = vst.msk [vmem:[#allocation4] sm:$0xff] %vm1712_vm6, %v1699_v36  ;;  %v1545_v44 = vadd.f32 %v1508_v40, %v1396_v33  ;;  %v4005_v46 = vpop.f32.mrf.mxu1  ;;  %v1399_v63 = vadd.f32 %v4001_v21, %v1303_v45  ;;  %v2040_v21 = vunpack.c.l.bf16 %v2025_v10  ;;  %v1965_v33 = vunpack.c.h.bf16 %v1951_v30  ;;  %2002 = vmatpush.msra.mxu3 %v1967_v26  ;;  %v2021_v45 = vld [vmem:[#allocation5 + $0xd8] sm:$0xff] }
 0x1da   :  { %v2037_v36 = vunpack.c.h.bf16 %v2023_v31  ;;  %v1963_v40 = vunpack.c.h.bf16 %v1950_v37  ;;  %1983 = vmatpush.msra.mxu2 %v1964_v32  ;;  %v2033_v54 = vunpack.c.h.bf16 %v2021_v45  ;;  %v2097_v37 = vld [vmem:[#allocation5 + $0x138] sm:$0xff] }
 0x1db   :  { %v1671_v53 = vadd.f32 %v1634_v8, %v1545_v44  ;;  %2053 = vmatpush.msrb.mxu0 %v2040_v21  ;;  %v1949_v44 = vld [vmem:[#allocation5 + $0x98] sm:$0xff]  ;;  %2003 = vmatpush.msra.mxu3 %v1965_v33 }
 0x1dc   :  { %v1960_v49 = vunpack.c.l.bf16 %v1949_v44  ;;  %v1961_v50 = vunpack.c.h.bf16 %v1949_v44  ;;  %2075 = vmatpush.msrb.mxu1 %v2037_v36  ;;  %1984 = vmatpush.msra.mxu2 %v1962_v39  ;;  %v2169_v39 = vld [vmem:[#allocation5 + $0x178] sm:$0xff]  ;;  %v2113_v44 = vunpack.c.h.bf16 %v2097_v37 }
 0x1dd   :  { %v1687_v59 = vadd.f32 %v3999_v19, %v1671_v53  ;;  %2054 = vmatpush.msrb.mxu0 %v2038_v28  ;;  %2004 = vmatpush.msra.mxu3 %v1963_v40 }
 0x1de   :  { %2076 = vmatpush.msrb.mxu1 %v2035_v43  ;;  %1985 = vmatpush.msra.mxu2 %v1960_v49  ;;  %v2112_v43 = vunpack.c.l.bf16 %v2097_v37 }
 0x1df   :  { %v1700_v4 = vmax.f32 %v1687_v59, 0.0  ;;  %v1637_v12 = vpop.f32.mrf.mxu3  ;;  %2055 = vmatpush.msrb.mxu0 %v2036_v35  ;;  %v2030_v59 = vunpack.c.l.bf16 %v2020_v56  ;;  %2005 = vmatpush.msra.mxu3 %v1961_v50 }
 0x1e0   :  { %v1511_v11 = vpop.f32.mrf.mxu2  ;;  %v1306_v17 = vpop.f32.mrf.mxu0  ;;  %2077 = vmatpush.msrb.mxu1 %v2033_v54  ;;  %1986 = vmatpush.msra.mxu2 %v1958_v1  ;;  %v2167_v1 = vld [vmem:[#allocation5 + $0x168] sm:$0xff] }
 0x1e1   :  { %1714 = vst.msk [vmem:[#allocation4 + $0x8] sm:$0xff] %vm1712_vm6, %v1700_v4  ;;  %v1546_v16 = vadd.f32 %v1511_v11, %v1399_v63  ;;  %v1404_v18 = vpop.f32.mrf.mxu1  ;;  %v1402_v41 = vadd.f32 %v4005_v46, %v1306_v17  ;;  %v2032_v46 = vunpack.c.l.bf16 %v2021_v45  ;;  %2056 = vmatpush.msrb.mxu0 %v2034_v42  ;;  %v1956_v63 = vunpack.c.l.bf16 %v1947_v61  ;;  %2006 = vmatpush.msra.mxu3 %v1959_v57  ;;  %v2168_v45 = vld [vmem:[#allocation5 + $0x170] sm:$0xff] }
 0x1e2   :  { %v2029_v4 = vunpack.c.h.bf16 %v2019_v62  ;;  %2078 = vmatpush.msrb.mxu1 %v2031_v60  ;;  %v2026_v11 = vunpack.c.l.bf16 %v2018_v6  ;;  %v2182_v57 = vunpack.c.l.bf16 %v2168_v45 }
 0x1e3   :  { %v1672_v27 = vadd.f32 %v1637_v12, %v1546_v16  ;;  %2057 = vmatpush.msrb.mxu0 %v2032_v46  ;;  %v2027_v12 = vunpack.c.h.bf16 %v2018_v6  ;;  %1987 = vmatpush.msra.mxu2 %v1956_v63  ;;  %v2166_v63 = vld [vmem:[#allocation5 + $0x160] sm:$0xff] }
 0x1e4   :  { %2007 = vmatpush.msra.mxu3 %v1957_v0  ;;  %2079 = vmatpush.msrb.mxu1 %v2029_v4  ;;  %v2180_v0 = vunpack.c.l.bf16 %v2167_v1 }
 0x1e5   :  { %v1688_v34 = vadd.f32 %v3999_v19, %v1672_v27  ;;  %2058 = vmatpush.msrb.mxu0 %v2030_v59  ;;  %1988 = vmatpush.msra.mxu2 %v1954_v7  ;;  %v2094_v59 = vld [vmem:[#allocation5 + $0x120] sm:$0xff]  ;;  %v2178_v7 = vunpack.c.l.bf16 %v2166_v63 }
 0x1e6   :  { %2008 = vmatpush.msra.mxu3 %v1955_v9  ;;  %2080 = vmatpush.msrb.mxu1 %v2027_v12  ;;  %v2106_v4 = vunpack.c.l.bf16 %v2094_v59  ;;  %v2107_v5 = vunpack.c.h.bf16 %v2094_v59  ;;  %v2179_v9 = vunpack.c.h.bf16 %v2166_v63 }
 0x1e7   :  { %v1701_v8 = vmax.f32 %v1688_v34, 0.0  ;;  %v1640_v48 = vpop.f32.mrf.mxu3  ;;  %2059 = vmatpush.msrb.mxu0 %v2028_v3 }
 0x1e8   :  { %v1514_v47 = vpop.f32.mrf.mxu2  ;;  %v1309_v52 = vpop.f32.mrf.mxu0 }
 0x1e9   :  { %1715 = vst.msk [vmem:[#allocation4 + $0x10] sm:$0xff] %vm1712_vm6, %v1701_v8  ;;  %v1547_v51 = vadd.f32 %v1514_v47, %v1402_v41  ;;  %v1407_v53 = vpop.f32.mrf.mxu1  ;;  %2060 = vmatpush.msrb.mxu0 %v2026_v11  ;;  %v2096_v8 = vld [vmem:[#allocation5 + $0x130] sm:$0xff]  ;;  %v2095_v47 = vld [vmem:[#allocation5 + $0x128] sm:$0xff]  ;;  %v2185_v52 = vunpack.c.h.bf16 %v2169_v39 }
 0x1ea   :  { %v2110_v54 = vunpack.c.l.bf16 %v2096_v8  ;;  %v2111_v55 = vunpack.c.h.bf16 %v2096_v8  ;;  %v2108_v61 = vunpack.c.l.bf16 %v2095_v47  ;;  %v2109_v62 = vunpack.c.h.bf16 %v2095_v47  ;;  %v2241_v8 = vld [vmem:[#allocation5 + $0x1b8] sm:$0xff] }
 0x1eb   :  { %v1673_v58 = vadd.f32 %v1640_v48, %v1547_v51  ;;  %v2184_v51 = vunpack.c.l.bf16 %v2169_v39 }
 0x1ed   :  { %v1689_v2 = vadd.f32 %v3999_v19, %v1673_v58  ;;  %v2183_v58 = vunpack.c.h.bf16 %v2168_v45 }
 0x1ef   :  { %v1702_v10 = vmax.f32 %v1689_v2, 0.0  ;;  %v1643_v14 = vpop.f32.mrf.mxu3  ;;  %v2181_v2 = vunpack.c.h.bf16 %v2167_v1 }
 0x1f0   :  { %v1517_v13 = vpop.f32.mrf.mxu2  ;;  %v1312_v15 = vpop.f32.mrf.mxu0 }
 0x1f1   :  { %1716 = vst.msk [vmem:[#allocation4 + $0x18] sm:$0xff] %vm1712_vm6, %v1702_v10  ;;  %v1410_v16 = vpop.f32.mrf.mxu1  ;;  %v2093_v10 = vld [vmem:[#allocation5 + $0x118] sm:$0xff] }
 0x1f2   :  { %v2165_v13 = vld [vmem:[#allocation5 + $0x158] sm:$0xff] }
 0x1f7   :  { %v1646_v18 = vpop.f32.mrf.mxu3 }
 0x1f8   :  { %v1520_v17 = vpop.f32.mrf.mxu2  ;;  %v1315_v20 = vpop.f32.mrf.mxu0  ;;  %v2104_v18 = vunpack.c.l.bf16 %v2093_v10 }
 0x1f9   :  { %v1413_v21 = vpop.f32.mrf.mxu1  ;;  %v1411_v22 = vadd.f32 %v1410_v16, %v1315_v20  ;;  %v2092_v16 = vld [vmem:[#allocation5 + $0x110] sm:$0xff]  ;;  %v2105_v20 = vunpack.c.h.bf16 %v2093_v10 }
 0x1ff   :  { %v1649_v24 = vpop.f32.mrf.mxu3 }
 0x200   :  { %v1523_v23 = vpop.f32.mrf.mxu2  ;;  %v1318_v26 = vpop.f32.mrf.mxu0 }
 0x201   :  { %v1550_v25 = vadd.f32 %v1523_v23, %v1411_v22  ;;  %v1416_v29 = vpop.f32.mrf.mxu1  ;;  %v1414_v31 = vadd.f32 %v1413_v21, %v1318_v26  ;;  %v2164_v21 = vld [vmem:[#allocation5 + $0x150] sm:$0xff]  ;;  %v2091_v26 = vld [vmem:[#allocation5 + $0x108] sm:$0xff] }
 0x202   :  { %v2101_v37 = vunpack.c.h.bf16 %v2091_v26 }
 0x203   :  { %v1676_v27 = vadd.f32 %v1649_v24, %v1550_v25  ;;  %v2176_v24 = vunpack.c.l.bf16 %v2165_v13  ;;  %v2177_v25 = vunpack.c.h.bf16 %v2165_v13 }
 0x205   :  { %v1692_v28 = vadd.f32 %v3999_v19, %v1676_v27 }
 0x207   :  { %v1705_v30 = vmax.f32 %v1692_v28, 0.0  ;;  %v1652_v33 = vpop.f32.mrf.mxu3 }
 0x208   :  { %v1526_v32 = vpop.f32.mrf.mxu2 }
 0x209   :  { %1719 = vst.msk [vmem:[#allocation4 + $0x30] sm:$0xff] %vm1712_vm6, %v1705_v30  ;;  %v1551_v34 = vadd.f32 %v1526_v32, %v1414_v31  ;;  %v1321_v35 = vpop.f32.mrf.mxu0  ;;  %v2103_v30 = vunpack.c.h.bf16 %v2092_v16  ;;  %v2163_v31 = vld [vmem:[#allocation5 + $0x148] sm:$0xff]  ;;  %v2174_v32 = vunpack.c.l.bf16 %v2164_v21 }
 0x20a   :  { %v1417_v42 = vadd.f32 %v1416_v29, %v1321_v35  ;;  %v2102_v29 = vunpack.c.l.bf16 %v2092_v16  ;;  %v2172_v39 = vunpack.c.l.bf16 %v2163_v31 }
 0x20b   :  { %v1677_v36 = vadd.f32 %v1652_v33, %v1551_v34  ;;  %v1419_v40 = vpop.f32.mrf.mxu1  ;;  %v2175_v33 = vunpack.c.h.bf16 %v2164_v21  ;;  %v2090_v34 = vld [vmem:[#allocation5 + $0x100] sm:$0xff]  ;;  %v2308_v21 = vld [vmem:[#allocation5 + $0x1d0] sm:$0xff] }
 0x20d   :  { %v1693_v38 = vadd.f32 %v3999_v19, %v1677_v36  ;;  %v2100_v36 = vunpack.c.l.bf16 %v2091_v26 }
 0x20f   :  { %v1706_v41 = vmax.f32 %v1693_v38, 0.0  ;;  %v2162_v38 = vld [vmem:[#allocation5 + $0x140] sm:$0xff] }
 0x210   :  { %v1529_v48 = vpop.f32.mrf.mxu2  ;;  %v1801_v49 = vld [vmem:[#allocation4] ss:$49 sm:$0x3]  ;;  %v1872_v50 = vld [vmem:[#allocation4 + $0x1] ss:$49 sm:$0x3]  ;;  %v2170_v47 = vunpack.c.l.bf16 %v2162_v38 }
 0x211   :  { %v1655_v53 = vpop.f32.mrf.mxu3  ;;  %1720 = vst.msk [vmem:[#allocation4 + $0x38] sm:$0xff] %vm1712_vm6, %v1706_v41  ;;  %v1552_v46 = vadd.f32 %v1529_v48, %v1417_v42  ;;  %3264 = vmatmul.msk.f32.vlgmr.msrb.gmra.mxu2 %vm1712_vm6, %v1801_v49  ;;  %3265 = vmatmul.msk.f32.vlgmr.msrb.gmra.mxu3 %vm1712_vm6, %v1801_v49  ;;  %v1944_v23 = vld [vmem:[#allocation4 + $0x2] ss:$49 sm:$0x3]  ;;  %v2098_v42 = vunpack.c.l.bf16 %v2090_v34  ;;  %v2171_v48 = vunpack.c.h.bf16 %v2162_v38 }
 0x212   :  { %v1324_v56 = vpop.f32.mrf.mxu0  ;;  %3266 = vmatmul.msk.f32.vlgmr.msra.gmra.mxu0 %vm1712_vm6, %v1872_v50  ;;  %3267 = vmatmul.msk.f32.vlgmr.msra.gmra.mxu1 %vm1712_vm6, %v1872_v50  ;;  %v2016_v27 = vld [vmem:[#allocation4 + $0x3] ss:$49 sm:$0x3]  ;;  %v2256_v50 = vunpack.c.l.bf16 %v2241_v8 }
 0x213   :  { %2125 = vmatpush.msrb.mxu2 %v2112_v43  ;;  %2145 = vmatpush.msrb.mxu3 %v2113_v44  ;;  %v1678_v60 = vadd.f32 %v1655_v53, %v1552_v46  ;;  %v1422_v6 = vpop.f32.mrf.mxu1  ;;  %v1420_v12 = vadd.f32 %v1419_v40, %v1324_v56  ;;  %v2173_v40 = vunpack.c.h.bf16 %v2163_v31  ;;  %v2099_v43 = vunpack.c.h.bf16 %v2090_v34  ;;  %v2313_v44 = vld [vmem:[#allocation5 + $0x1f8] sm:$0xff]  ;;  %v2239_v56 = vld [vmem:[#allocation5 + $0x1a8] sm:$0xff] }
 0x214   :  { %2197 = vmatpush.msra.mxu0 %v2184_v51  ;;  %2217 = vmatpush.msra.mxu1 %v2185_v52  ;;  %v2257_v51 = vunpack.c.h.bf16 %v2241_v8  ;;  %v2328_v53 = vunpack.c.l.bf16 %v2313_v44  ;;  %v2329_v46 = vunpack.c.h.bf16 %v2313_v44  ;;  %v2237_v6 = vld [vmem:[#allocation5 + $0x198] sm:$0xff] }
 0x215   :  { %v1694_v3 = vadd.f32 %v3999_v19, %v1678_v60  ;;  %2126 = vmatpush.msrb.mxu2 %v2110_v54  ;;  %2146 = vmatpush.msrb.mxu3 %v2111_v55  ;;  %v2240_v54 = vld [vmem:[#allocation5 + $0x1b0] sm:$0xff] }
 0x216   :  { %2198 = vmatpush.msra.mxu0 %v2182_v57  ;;  %2218 = vmatpush.msra.mxu1 %v2183_v58  ;;  %v2312_v55 = vld [vmem:[#allocation5 + $0x1f0] sm:$0xff]  ;;  %v2254_v1 = vunpack.c.l.bf16 %v2240_v54  ;;  %v2255_v57 = vunpack.c.h.bf16 %v2240_v54  ;;  %v2311_v58 = vld [vmem:[#allocation5 + $0x1e8] sm:$0xff] }
 0x217   :  { %v1707_v11 = vmax.f32 %v1694_v3, 0.0  ;;  %2127 = vmatpush.msrb.mxu2 %v2108_v61  ;;  %2147 = vmatpush.msrb.mxu3 %v2109_v62  ;;  %v2326_v60 = vunpack.c.l.bf16 %v2312_v55  ;;  %v2327_v61 = vunpack.c.h.bf16 %v2312_v55  ;;  %v2238_v62 = vld [vmem:[#allocation5 + $0x1a0] sm:$0xff] }
 0x218   :  { %2199 = vmatpush.msra.mxu0 %v2180_v0  ;;  %2219 = vmatpush.msra.mxu1 %v2181_v2  ;;  %v1532_v14 = vpop.f32.mrf.mxu2  ;;  %v2088_v59 = vld [vmem:[#allocation4 + $0x7] ss:$49 sm:$0x3]  ;;  %v2160_v63 = vld [vmem:[#allocation4 + $0x8] ss:$49 sm:$0x3]  ;;  %v2252_v0 = vunpack.c.l.bf16 %v2239_v56  ;;  %v2253_v2 = vunpack.c.h.bf16 %v2239_v56  ;;  %v2250_v10 = vunpack.c.l.bf16 %v2238_v62 }
 0x219   :  { %v1658_v15 = vpop.f32.mrf.mxu3  ;;  %1721 = vst.msk [vmem:[#allocation4 + $0x40] sm:$0xff] %vm1712_vm6, %v1707_v11  ;;  %2128 = vmatpush.msrb.mxu2 %v2106_v4  ;;  %2148 = vmatpush.msrb.mxu3 %v2107_v5  ;;  %v1553_v17 = vadd.f32 %v1532_v14, %v1420_v12  ;;  %v2310_v3 = vld [vmem:[#allocation5 + $0x1e0] sm:$0xff]  ;;  %v2324_v4 = vunpack.c.l.bf16 %v2311_v58  ;;  %v2325_v5 = vunpack.c.h.bf16 %v2311_v58  ;;  %v2251_v11 = vunpack.c.h.bf16 %v2238_v62  ;;  %v2309_v12 = vld [vmem:[#allocation5 + $0x1d8] sm:$0xff] }
 0x21a   :  { %2200 = vmatpush.msra.mxu0 %v2178_v7  ;;  %2220 = vmatpush.msra.mxu1 %v2179_v9  ;;  %v2322_v13 = vunpack.c.l.bf16 %v2310_v3  ;;  %v2323_v14 = vunpack.c.h.bf16 %v2310_v3  ;;  %v2382_v56 = vld [vmem:[#allocation5 + $0x220] sm:$0xff] }
 0x21b   :  { %v1327_v22 = vpop.f32.mrf.mxu0  ;;  %3268 = vmatmul.msk.f32.vlgmr.msra.gmra.mxu2 %vm1712_vm6, %v1944_v23  ;;  %3269 = vmatmul.msk.f32.vlgmr.msra.gmra.mxu3 %vm1712_vm6, %v1944_v23  ;;  %v1679_v28 = vadd.f32 %v1658_v15, %v1553_v17  ;;  %v1425_v45 = vpop.f32.mrf.mxu1  ;;  %v2236_v15 = vld [vmem:[#allocation5 + $0x190] sm:$0xff]  ;;  %v2321_v23 = vunpack.c.h.bf16 %v2309_v12  ;;  %v2454_v58 = vld [vmem:[#allocation5 + $0x260] sm:$0xff]  ;;  %v2394_v62 = vunpack.c.l.bf16 %v2382_v56 }
 0x21c   :  { %3270 = vmatmul.msk.f32.vlgmr.msrb.gmra.mxu0 %vm1712_vm6, %v2016_v27  ;;  %3271 = vmatmul.msk.f32.vlgmr.msrb.gmra.mxu1 %vm1712_vm6, %v2016_v27  ;;  %v2320_v22 = vunpack.c.l.bf16 %v2309_v12  ;;  %v2247_v26 = vunpack.c.h.bf16 %v2236_v15  ;;  %v2307_v27 = vld [vmem:[#allocation5 + $0x1c8] sm:$0xff]  ;;  %v2467_v3 = vunpack.c.h.bf16 %v2454_v58 }
 0x21d   :  { %2129 = vmatpush.msrb.mxu2 %v2104_v18  ;;  %2149 = vmatpush.msrb.mxu3 %v2105_v20  ;;  %v1695_v35 = vadd.f32 %v3999_v19, %v1679_v28  ;;  %v2248_v18 = vunpack.c.l.bf16 %v2237_v6  ;;  %v2249_v20 = vunpack.c.h.bf16 %v2237_v6  ;;  %v2318_v28 = vunpack.c.l.bf16 %v2308_v21 }
 0x21e   :  { %2201 = vmatpush.msra.mxu0 %v2176_v24  ;;  %2221 = vmatpush.msra.mxu1 %v2177_v25  ;;  %v2235_v24 = vld [vmem:[#allocation5 + $0x188] sm:$0xff]  ;;  %v2246_v25 = vunpack.c.l.bf16 %v2236_v15  ;;  %v2316_v34 = vunpack.c.l.bf16 %v2307_v27 }
 0x21f   :  { %v1708_v41 = vmax.f32 %v1695_v35, 0.0  ;;  %2130 = vmatpush.msrb.mxu2 %v2102_v29  ;;  %2150 = vmatpush.msrb.mxu3 %v2103_v30  ;;  %v2319_v29 = vunpack.c.h.bf16 %v2308_v21  ;;  %v2234_v30 = vld [vmem:[#allocation5 + $0x180] sm:$0xff]  ;;  %v2244_v31 = vunpack.c.l.bf16 %v2235_v24  ;;  %v2317_v35 = vunpack.c.h.bf16 %v2307_v27 }
 0x220   :  { %2202 = vmatpush.msra.mxu0 %v2174_v32  ;;  %2222 = vmatpush.msra.mxu1 %v2175_v33  ;;  %v1535_v19 = vpop.f32.mrf.mxu2  ;;  %v2245_v32 = vunpack.c.h.bf16 %v2235_v24  ;;  %v2306_v33 = vld [vmem:[#allocation5 + $0x1c0] sm:$0xff]  ;;  %v2242_v38 = vunpack.c.l.bf16 %v2234_v30 }
 0x221   :  { %1722 = vst.msk [vmem:[#allocation4 + $0x48] sm:$0xff] %vm1712_vm6, %v1708_v41  ;;  %2131 = vmatpush.msrb.mxu2 %v2100_v36  ;;  %2151 = vmatpush.msrb.mxu3 %v2101_v37  ;;  %v2315_v8 = vunpack.c.h.bf16 %v2306_v33  ;;  %v2385_v41 = vld [vmem:[#allocation5 + $0x238] sm:$0xff]  ;;  %v2450_v21 = vld [vmem:[#allocation5 + $0x240] sm:$0xff] }
 0x222   :  { %v1661_v49 = vpop.f32.mrf.mxu3  ;;  %2203 = vmatpush.msra.mxu0 %v2172_v39  ;;  %2223 = vmatpush.msra.mxu1 %v2173_v40  ;;  %v2243_v39 = vunpack.c.h.bf16 %v2234_v30  ;;  %v2314_v40 = vunpack.c.l.bf16 %v2306_v33  ;;  %v2400_v44 = vunpack.c.l.bf16 %v2385_v41  ;;  %v2401_v45 = vunpack.c.h.bf16 %v2385_v41  ;;  %v2528_v30 = vld [vmem:[#allocation5 + $0x2b0] sm:$0xff] }
 0x223   :  { %v1330_v52 = vpop.f32.mrf.mxu0  ;;  %2132 = vmatpush.msrb.mxu2 %v2098_v42  ;;  %2152 = vmatpush.msrb.mxu3 %v2099_v43  ;;  %v2457_v42 = vld [vmem:[#allocation5 + $0x278] sm:$0xff]  ;;  %v2384_v43 = vld [vmem:[#allocation5 + $0x230] sm:$0xff]  ;;  %v2459_v27 = vunpack.c.h.bf16 %v2450_v21 }
 0x224   :  { %2204 = vmatpush.msra.mxu0 %v2170_v47  ;;  %2224 = vmatpush.msra.mxu1 %v2171_v48  ;;  %v1428_v17 = vpop.f32.mrf.mxu1  ;;  %v2456_v47 = vld [vmem:[#allocation5 + $0x270] sm:$0xff]  ;;  %v2472_v19 = vunpack.c.l.bf16 %v2457_v42  ;;  %v2473_v49 = vunpack.c.h.bf16 %v2457_v42  ;;  %v2398_v52 = vunpack.c.l.bf16 %v2384_v43 }
 0x225   :  { %2269 = vmatpush.msra.mxu2 %v2256_v50  ;;  %2289 = vmatpush.msra.mxu3 %v2257_v51  ;;  %v2232_v48 = vld [vmem:[#allocation4 + $0x9] ss:$49 sm:$0x3]  ;;  %v2383_v50 = vld [vmem:[#allocation5 + $0x228] sm:$0xff]  ;;  %v2470_v54 = vunpack.c.l.bf16 %v2456_v47  ;;  %v2471_v55 = vunpack.c.h.bf16 %v2456_v47 }
 0x226   :  { %2341 = vmatpush.msrb.mxu0 %v2328_v53  ;;  %2361 = vmatpush.msrb.mxu1 %v2329_v46  ;;  %v2304_v51 = vld [vmem:[#allocation4 + $0xa] ss:$49 sm:$0x3]  ;;  %v2399_v53 = vunpack.c.h.bf16 %v2384_v43  ;;  %v2455_v46 = vld [vmem:[#allocation5 + $0x268] sm:$0xff] }
 0x227   :  { %3272 = vmatmul.msk.f32.vlgmr.msrb.gmra.mxu2 %vm1712_vm6, %v2088_v59  ;;  %3273 = vmatmul.msk.f32.vlgmr.msrb.gmra.mxu3 %vm1712_vm6, %v2088_v59  ;;  %v2468_v59 = vunpack.c.l.bf16 %v2455_v46  ;;  %v2378_v17 = vld [vmem:[#allocation5 + $0x200] sm:$0xff]  ;;  %v2600_v33 = vld [vmem:[#allocation5 + $0x2f0] sm:$0xff] }
 0x228   :  { %3274 = vmatmul.msk.f32.vlgmr.msra.gmra.mxu0 %vm1712_vm6, %v2160_v63  ;;  %3275 = vmatmul.msk.f32.vlgmr.msra.gmra.mxu1 %vm1712_vm6, %v2160_v63  ;;  %v1538_v7 = vpop.f32.mrf.mxu2  ;;  %v2395_v63 = vunpack.c.h.bf16 %v2382_v56  ;;  %v2386_v24 = vunpack.c.l.bf16 %v2378_v17  ;;  %v2614_v41 = vunpack.c.l.bf16 %v2600_v33  ;;  %v2615_v42 = vunpack.c.h.bf16 %v2600_v33  ;;  %v2526_v43 = vld [vmem:[#allocation5 + $0x2a0] sm:$0xff] }
 0x229   :  { %2270 = vmatpush.msra.mxu2 %v2254_v1  ;;  %2290 = vmatpush.msra.mxu3 %v2255_v57  ;;  %v2396_v1 = vunpack.c.l.bf16 %v2383_v50  ;;  %v2397_v57 = vunpack.c.h.bf16 %v2383_v50  ;;  %v2452_v7 = vld [vmem:[#allocation5 + $0x250] sm:$0xff]  ;;  %v2598_v47 = vld [vmem:[#allocation5 + $0x2e0] sm:$0xff]  ;;  %v2538_v50 = vunpack.c.l.bf16 %v2526_v43 }
 0x22a   :  { %v1664_v9 = vpop.f32.mrf.mxu3  ;;  %2342 = vmatpush.msrb.mxu0 %v2326_v60  ;;  %2362 = vmatpush.msrb.mxu1 %v2327_v61  ;;  %v2469_v60 = vunpack.c.h.bf16 %v2455_v46  ;;  %v2381_v61 = vld [vmem:[#allocation5 + $0x218] sm:$0xff]  ;;  %v2462_v15 = vunpack.c.l.bf16 %v2452_v7  ;;  %v2611_v46 = vunpack.c.h.bf16 %v2598_v47  ;;  %v2742_v33 = vld [vmem:[#allocation5 + $0x360] sm:$0xff] }
 0x22b   :  { %v1333_v16 = vpop.f32.mrf.mxu0  ;;  %2271 = vmatpush.msra.mxu2 %v2252_v0  ;;  %2291 = vmatpush.msra.mxu3 %v2253_v2  ;;  %v2453_v0 = vld [vmem:[#allocation5 + $0x258] sm:$0xff]  ;;  %v2466_v2 = vunpack.c.l.bf16 %v2454_v58  ;;  %v2393_v6 = vunpack.c.h.bf16 %v2381_v61 }
 0x22c   :  { %2343 = vmatpush.msrb.mxu0 %v2324_v4  ;;  %2363 = vmatpush.msrb.mxu1 %v2325_v5  ;;  %v2380_v4 = vld [vmem:[#allocation5 + $0x210] sm:$0xff]  ;;  %v2392_v5 = vunpack.c.l.bf16 %v2381_v61  ;;  %v2464_v9 = vunpack.c.l.bf16 %v2453_v0  ;;  %v2463_v16 = vunpack.c.h.bf16 %v2452_v7 }
 0x22d   :  { %2272 = vmatpush.msra.mxu2 %v2250_v10  ;;  %2292 = vmatpush.msra.mxu3 %v2251_v11  ;;  %v2465_v10 = vunpack.c.h.bf16 %v2453_v0  ;;  %v2379_v11 = vld [vmem:[#allocation5 + $0x208] sm:$0xff]  ;;  %v2390_v12 = vunpack.c.l.bf16 %v2380_v4 }
 0x22e   :  { %2344 = vmatpush.msrb.mxu0 %v2322_v13  ;;  %2364 = vmatpush.msrb.mxu1 %v2323_v14  ;;  %v2391_v13 = vunpack.c.h.bf16 %v2380_v4  ;;  %v2451_v14 = vld [vmem:[#allocation5 + $0x248] sm:$0xff] }
 0x22f   :  { %2273 = vmatpush.msra.mxu2 %v2248_v18  ;;  %2293 = vmatpush.msra.mxu3 %v2249_v20  ;;  %v2388_v18 = vunpack.c.l.bf16 %v2379_v11  ;;  %v2389_v20 = vunpack.c.h.bf16 %v2379_v11 }
 0x230   :  { %2345 = vmatpush.msrb.mxu0 %v2320_v22  ;;  %2365 = vmatpush.msrb.mxu1 %v2321_v23  ;;  %v1541_v36 = vpop.f32.mrf.mxu2  ;;  %v2460_v22 = vunpack.c.l.bf16 %v2451_v14  ;;  %v2461_v23 = vunpack.c.h.bf16 %v2451_v14  ;;  %v2745_v14 = vld [vmem:[#allocation5 + $0x378] sm:$0xff] }
 0x231   :  { %2274 = vmatpush.msra.mxu2 %v2246_v25  ;;  %2294 = vmatpush.msra.mxu3 %v2247_v26  ;;  %v2387_v25 = vunpack.c.h.bf16 %v2378_v17  ;;  %v2458_v26 = vunpack.c.l.bf16 %v2450_v21  ;;  %v2760_v21 = vunpack.c.l.bf16 %v2745_v14 }
 0x232   :  { %v1667_v37 = vpop.f32.mrf.mxu3  ;;  %2346 = vmatpush.msrb.mxu0 %v2318_v28  ;;  %2366 = vmatpush.msrb.mxu1 %v2319_v29  ;;  %v2529_v28 = vld [vmem:[#allocation5 + $0x2b8] sm:$0xff] }
 0x233   :  { %2275 = vmatpush.msra.mxu2 %v2244_v31  ;;  %2295 = vmatpush.msra.mxu3 %v2245_v32  ;;  %v2601_v29 = vld [vmem:[#allocation5 + $0x2f8] sm:$0xff]  ;;  %v2544_v31 = vunpack.c.l.bf16 %v2529_v28  ;;  %v2545_v32 = vunpack.c.h.bf16 %v2529_v28  ;;  %v2527_v37 = vld [vmem:[#allocation5 + $0x2a8] sm:$0xff] }
 0x234   :  { %2347 = vmatpush.msrb.mxu0 %v2316_v34  ;;  %2367 = vmatpush.msrb.mxu1 %v2317_v35  ;;  %v2376_v34 = vld [vmem:[#allocation4 + $0xe] ss:$49 sm:$0x3]  ;;  %v2616_v35 = vunpack.c.l.bf16 %v2601_v29  ;;  %v2617_v36 = vunpack.c.h.bf16 %v2601_v29 }
 0x235   :  { %2276 = vmatpush.msra.mxu2 %v2242_v38  ;;  %2296 = vmatpush.msra.mxu3 %v2243_v39  ;;  %v2448_v38 = vld [vmem:[#allocation4 + $0xf] ss:$49 sm:$0x3]  ;;  %v2542_v39 = vunpack.c.l.bf16 %v2528_v30 }
 0x236   :  { %2348 = vmatpush.msrb.mxu0 %v2314_v40  ;;  %2368 = vmatpush.msrb.mxu1 %v2315_v8  ;;  %v2543_v40 = vunpack.c.h.bf16 %v2528_v30  ;;  %v2599_v8 = vld [vmem:[#allocation5 + $0x2e8] sm:$0xff]  ;;  %v2670_v30 = vld [vmem:[#allocation5 + $0x320] sm:$0xff] }
 0x237   :  { %3276 = vmatmul.msk.f32.vlgmr.msra.gmra.mxu2 %vm1712_vm6, %v2232_v48  ;;  %3277 = vmatmul.msk.f32.vlgmr.msra.gmra.mxu3 %vm1712_vm6, %v2232_v48  ;;  %v2612_v48 = vunpack.c.l.bf16 %v2599_v8 }
 0x238   :  { %3278 = vmatmul.msk.f32.vlgmr.msrb.gmra.mxu0 %vm1712_vm6, %v2304_v51  ;;  %3279 = vmatmul.msk.f32.vlgmr.msrb.gmra.mxu1 %vm1712_vm6, %v2304_v51  ;;  %v2539_v51 = vunpack.c.h.bf16 %v2526_v43 }
 0x239   :  { %2413 = vmatpush.msrb.mxu2 %v2400_v44  ;;  %2433 = vmatpush.msrb.mxu3 %v2401_v45  ;;  %v2540_v44 = vunpack.c.l.bf16 %v2527_v37  ;;  %v2541_v45 = vunpack.c.h.bf16 %v2527_v37  ;;  %v2682_v37 = vunpack.c.l.bf16 %v2670_v30 }
 0x23a   :  { %2485 = vmatpush.msra.mxu0 %v2472_v19  ;;  %2505 = vmatpush.msra.mxu1 %v2473_v49  ;;  %v2613_v19 = vunpack.c.h.bf16 %v2599_v8  ;;  %v2525_v49 = vld [vmem:[#allocation5 + $0x298] sm:$0xff]  ;;  %v2755_v8 = vunpack.c.h.bf16 %v2742_v33 }
 0x23b   :  { %2414 = vmatpush.msrb.mxu2 %v2398_v52  ;;  %2434 = vmatpush.msrb.mxu3 %v2399_v53  ;;  %v2597_v52 = vld [vmem:[#allocation5 + $0x2d8] sm:$0xff]  ;;  %v2610_v53 = vunpack.c.l.bf16 %v2598_v47  ;;  %v2537_v56 = vunpack.c.h.bf16 %v2525_v49 }
 0x23c   :  { %2486 = vmatpush.msra.mxu0 %v2470_v54  ;;  %2506 = vmatpush.msra.mxu1 %v2471_v55  ;;  %v2524_v54 = vld [vmem:[#allocation5 + $0x290] sm:$0xff]  ;;  %v2536_v55 = vunpack.c.l.bf16 %v2525_v49  ;;  %v2609_v58 = vunpack.c.h.bf16 %v2597_v52 }
 0x23d   :  { %2415 = vmatpush.msrb.mxu2 %v2396_v1  ;;  %2435 = vmatpush.msrb.mxu3 %v2397_v57  ;;  %v2596_v1 = vld [vmem:[#allocation5 + $0x2d0] sm:$0xff]  ;;  %v2608_v57 = vunpack.c.l.bf16 %v2597_v52  ;;  %v2535_v61 = vunpack.c.h.bf16 %v2524_v54 }
 0x23e   :  { %2487 = vmatpush.msra.mxu0 %v2468_v59  ;;  %2507 = vmatpush.msra.mxu1 %v2469_v60  ;;  %v2523_v59 = vld [vmem:[#allocation5 + $0x288] sm:$0xff]  ;;  %v2534_v60 = vunpack.c.l.bf16 %v2524_v54  ;;  %v2607_v0 = vunpack.c.h.bf16 %v2596_v1 }
 0x23f   :  { %2416 = vmatpush.msrb.mxu2 %v2394_v62  ;;  %2436 = vmatpush.msrb.mxu3 %v2395_v63  ;;  %v2595_v62 = vld [vmem:[#allocation5 + $0x2c8] sm:$0xff]  ;;  %v2606_v63 = vunpack.c.l.bf16 %v2596_v1  ;;  %v2533_v4 = vunpack.c.h.bf16 %v2523_v59 }
 0x240   :  { %2488 = vmatpush.msra.mxu0 %v2466_v2  ;;  %2508 = vmatpush.msra.mxu1 %v2467_v3  ;;  %v2522_v2 = vld [vmem:[#allocation5 + $0x280] sm:$0xff]  ;;  %v2532_v3 = vunpack.c.l.bf16 %v2523_v59  ;;  %v2605_v7 = vunpack.c.h.bf16 %v2595_v62 }
 0x241   :  { %2417 = vmatpush.msrb.mxu2 %v2392_v5  ;;  %2437 = vmatpush.msrb.mxu3 %v2393_v6  ;;  %v2594_v5 = vld [vmem:[#allocation5 + $0x2c0] sm:$0xff]  ;;  %v2604_v6 = vunpack.c.l.bf16 %v2595_v62  ;;  %v2889_v62 = vld [vmem:[#allocation5 + $0x3f8] sm:$0xff] }
 0x242   :  { %2489 = vmatpush.msra.mxu0 %v2464_v9  ;;  %2509 = vmatpush.msra.mxu1 %v2465_v10  ;;  %v2530_v9 = vunpack.c.l.bf16 %v2522_v2  ;;  %v2531_v10 = vunpack.c.h.bf16 %v2522_v2  ;;  %v2602_v11 = vunpack.c.l.bf16 %v2594_v5 }
 0x243   :  { %2418 = vmatpush.msrb.mxu2 %v2390_v12  ;;  %2438 = vmatpush.msrb.mxu3 %v2391_v13  ;;  %v2603_v12 = vunpack.c.h.bf16 %v2594_v5  ;;  %v2673_v13 = vld [vmem:[#allocation5 + $0x338] sm:$0xff]  ;;  %v2904_v5 = vunpack.c.l.bf16 %v2889_v62 }
 0x244   :  { %2490 = vmatpush.msra.mxu0 %v2462_v15  ;;  %2510 = vmatpush.msra.mxu1 %v2463_v16  ;;  %v2672_v15 = vld [vmem:[#allocation5 + $0x330] sm:$0xff]  ;;  %v2688_v16 = vunpack.c.l.bf16 %v2673_v13  ;;  %v2689_v17 = vunpack.c.h.bf16 %v2673_v13 }
 0x245   :  { %2419 = vmatpush.msrb.mxu2 %v2388_v18  ;;  %2439 = vmatpush.msrb.mxu3 %v2389_v20  ;;  %v2744_v18 = vld [vmem:[#allocation5 + $0x370] sm:$0xff]  ;;  %v2520_v20 = vld [vmem:[#allocation4 + $0x10] ss:$49 sm:$0x3] }
 0x246   :  { %2491 = vmatpush.msra.mxu0 %v2460_v22  ;;  %2511 = vmatpush.msra.mxu1 %v2461_v23  ;;  %v2761_v22 = vunpack.c.h.bf16 %v2745_v14  ;;  %v2671_v23 = vld [vmem:[#allocation5 + $0x328] sm:$0xff]  ;;  %v2758_v28 = vunpack.c.l.bf16 %v2744_v18  ;;  %v2759_v29 = vunpack.c.h.bf16 %v2744_v18  ;;  %v2886_v18 = vld [vmem:[#allocation5 + $0x3e0] sm:$0xff] }
 0x247   :  { %2420 = vmatpush.msrb.mxu2 %v2386_v24  ;;  %2440 = vmatpush.msrb.mxu3 %v2387_v25  ;;  %v2592_v24 = vld [vmem:[#allocation4 + $0x11] ss:$49 sm:$0x3]  ;;  %v2686_v25 = vunpack.c.l.bf16 %v2672_v15 }
 0x248   :  { %2492 = vmatpush.msra.mxu0 %v2458_v26  ;;  %2512 = vmatpush.msra.mxu1 %v2459_v27  ;;  %v2687_v26 = vunpack.c.h.bf16 %v2672_v15  ;;  %v2743_v27 = vld [vmem:[#allocation5 + $0x368] sm:$0xff]  ;;  %v2814_v15 = vld [vmem:[#allocation5 + $0x3a0] sm:$0xff] }
 0x249   :  { %3280 = vmatmul.msk.f32.vlgmr.msrb.gmra.mxu2 %vm1712_vm6, %v2376_v34  ;;  %3281 = vmatmul.msk.f32.vlgmr.msrb.gmra.mxu3 %vm1712_vm6, %v2376_v34  ;;  %v2756_v34 = vunpack.c.l.bf16 %v2743_v27 }
 0x24a   :  { %3282 = vmatmul.msk.f32.vlgmr.msra.gmra.mxu0 %vm1712_vm6, %v2448_v38  ;;  %3283 = vmatmul.msk.f32.vlgmr.msra.gmra.mxu1 %vm1712_vm6, %v2448_v38  ;;  %v2683_v38 = vunpack.c.h.bf16 %v2670_v30 }
 0x24b   :  { %2557 = vmatpush.msra.mxu2 %v2544_v31  ;;  %2577 = vmatpush.msra.mxu3 %v2545_v32  ;;  %v2684_v31 = vunpack.c.l.bf16 %v2671_v23  ;;  %v2685_v32 = vunpack.c.h.bf16 %v2671_v23  ;;  %v2826_v23 = vunpack.c.l.bf16 %v2814_v15 }
 0x24c   :  { %2629 = vmatpush.msrb.mxu0 %v2616_v35  ;;  %2649 = vmatpush.msrb.mxu1 %v2617_v36  ;;  %v2757_v35 = vunpack.c.h.bf16 %v2743_v27  ;;  %v2669_v36 = vld [vmem:[#allocation5 + $0x318] sm:$0xff]  ;;  %v2899_v27 = vunpack.c.h.bf16 %v2886_v18 }
 0x24d   :  { %2558 = vmatpush.msra.mxu2 %v2542_v39  ;;  %2578 = vmatpush.msra.mxu3 %v2543_v40  ;;  %v2741_v39 = vld [vmem:[#allocation5 + $0x358] sm:$0xff]  ;;  %v2754_v40 = vunpack.c.l.bf16 %v2742_v33  ;;  %v2681_v43 = vunpack.c.h.bf16 %v2669_v36 }
 0x24e   :  { %2630 = vmatpush.msrb.mxu0 %v2614_v41  ;;  %2650 = vmatpush.msrb.mxu1 %v2615_v42  ;;  %v2668_v41 = vld [vmem:[#allocation5 + $0x310] sm:$0xff]  ;;  %v2680_v42 = vunpack.c.l.bf16 %v2669_v36  ;;  %v2753_v47 = vunpack.c.h.bf16 %v2741_v39 }
 0x24f   :  { %2559 = vmatpush.msra.mxu2 %v2540_v44  ;;  %2579 = vmatpush.msra.mxu3 %v2541_v45  ;;  %v2740_v44 = vld [vmem:[#allocation5 + $0x350] sm:$0xff]  ;;  %v2752_v45 = vunpack.c.l.bf16 %v2741_v39  ;;  %v2679_v49 = vunpack.c.h.bf16 %v2668_v41 }
 0x250   :  { %2631 = vmatpush.msrb.mxu0 %v2612_v48  ;;  %2651 = vmatpush.msrb.mxu1 %v2613_v19  ;;  %v2667_v48 = vld [vmem:[#allocation5 + $0x308] sm:$0xff]  ;;  %v2678_v19 = vunpack.c.l.bf16 %v2668_v41  ;;  %v2751_v52 = vunpack.c.h.bf16 %v2740_v44 }
 0x251   :  { %2560 = vmatpush.msra.mxu2 %v2538_v50  ;;  %2580 = vmatpush.msra.mxu3 %v2539_v51  ;;  %v2739_v50 = vld [vmem:[#allocation5 + $0x348] sm:$0xff]  ;;  %v2750_v51 = vunpack.c.l.bf16 %v2740_v44  ;;  %v2677_v54 = vunpack.c.h.bf16 %v2667_v48 }
 0x252   :  { %2632 = vmatpush.msrb.mxu0 %v2610_v53  ;;  %2652 = vmatpush.msrb.mxu1 %v2611_v46  ;;  %v2666_v53 = vld [vmem:[#allocation5 + $0x300] sm:$0xff]  ;;  %v2676_v46 = vunpack.c.l.bf16 %v2667_v48  ;;  %v2749_v1 = vunpack.c.h.bf16 %v2739_v50 }
 0x253   :  { %2561 = vmatpush.msra.mxu2 %v2536_v55  ;;  %2581 = vmatpush.msra.mxu3 %v2537_v56  ;;  %v2738_v55 = vld [vmem:[#allocation5 + $0x340] sm:$0xff]  ;;  %v2748_v56 = vunpack.c.l.bf16 %v2739_v50  ;;  %v2960_v50 = vld [vmem:[%s4111_s2] sm:$0x3] }
 0x254   :  { %2633 = vmatpush.msrb.mxu0 %v2608_v57  ;;  %2653 = vmatpush.msrb.mxu1 %v2609_v58  ;;  %v2674_v57 = vunpack.c.l.bf16 %v2666_v53  ;;  %v2675_v58 = vunpack.c.h.bf16 %v2666_v53  ;;  %v2746_v59 = vunpack.c.l.bf16 %v2738_v55  ;;  %v1798_v53 = vpop.f32.mrf.mxu1 }
 0x255   :  { %2562 = vmatpush.msra.mxu2 %v2534_v60  ;;  %2582 = vmatpush.msra.mxu3 %v2535_v61  ;;  %v2747_v60 = vunpack.c.h.bf16 %v2738_v55  ;;  %v2817_v61 = vld [vmem:[#allocation5 + $0x3b8] sm:$0xff] }
 0x256   :  { %2634 = vmatpush.msrb.mxu0 %v2606_v63  ;;  %2654 = vmatpush.msrb.mxu1 %v2607_v0  ;;  %v2816_v63 = vld [vmem:[#allocation5 + $0x3b0] sm:$0xff]  ;;  %v2832_v0 = vunpack.c.l.bf16 %v2817_v61  ;;  %v2833_v2 = vunpack.c.h.bf16 %v2817_v61 }
 0x257   :  { %2563 = vmatpush.msra.mxu2 %v2532_v3  ;;  %2583 = vmatpush.msra.mxu3 %v2533_v4  ;;  %v2888_v3 = vld [vmem:[#allocation5 + $0x3f0] sm:$0xff]  ;;  %v2664_v4 = vld [vmem:[#allocation4 + $0x15] ss:$49 sm:$0x3] }
 0x258   :  { %2635 = vmatpush.msrb.mxu0 %v2604_v6  ;;  %2655 = vmatpush.msrb.mxu1 %v2605_v7  ;;  %v2905_v6 = vunpack.c.h.bf16 %v2889_v62  ;;  %v2815_v7 = vld [vmem:[#allocation5 + $0x3a8] sm:$0xff]  ;;  %v2902_v13 = vunpack.c.l.bf16 %v2888_v3  ;;  %v2903_v14 = vunpack.c.h.bf16 %v2888_v3 }
 0x259   :  { %2564 = vmatpush.msra.mxu2 %v2530_v9  ;;  %2584 = vmatpush.msra.mxu3 %v2531_v10  ;;  %v2736_v9 = vld [vmem:[#allocation4 + $0x16] ss:$49 sm:$0x3]  ;;  %v2830_v10 = vunpack.c.l.bf16 %v2816_v63 }
 0x25a   :  { %2636 = vmatpush.msrb.mxu0 %v2602_v11  ;;  %2656 = vmatpush.msrb.mxu1 %v2603_v12  ;;  %v2831_v11 = vunpack.c.h.bf16 %v2816_v63  ;;  %v2887_v12 = vld [vmem:[#allocation5 + $0x3e8] sm:$0xff] }
 0x25b   :  { %3284 = vmatmul.msk.f32.vlgmr.msra.gmra.mxu2 %vm1712_vm6, %v2520_v20  ;;  %3285 = vmatmul.msk.f32.vlgmr.msra.gmra.mxu3 %vm1712_vm6, %v2520_v20  ;;  %v2900_v20 = vunpack.c.l.bf16 %v2887_v12 }
 0x25c   :  { %3286 = vmatmul.msk.f32.vlgmr.msrb.gmra.mxu0 %vm1712_vm6, %v2592_v24  ;;  %3287 = vmatmul.msk.f32.vlgmr.msrb.gmra.mxu1 %vm1712_vm6, %v2592_v24  ;;  %v2827_v24 = vunpack.c.h.bf16 %v2814_v15 }
 0x25d   :  { %2701 = vmatpush.msrb.mxu2 %v2688_v16  ;;  %2721 = vmatpush.msrb.mxu3 %v2689_v17  ;;  %v2828_v16 = vunpack.c.l.bf16 %v2815_v7  ;;  %v2829_v17 = vunpack.c.h.bf16 %v2815_v7 }
 0x25e   :  { %2773 = vmatpush.msra.mxu0 %v2760_v21  ;;  %2793 = vmatpush.msra.mxu1 %v2761_v22  ;;  %v2901_v21 = vunpack.c.h.bf16 %v2887_v12  ;;  %v2813_v22 = vld [vmem:[#allocation5 + $0x398] sm:$0xff] }
 0x25f   :  { %2702 = vmatpush.msrb.mxu2 %v2686_v25  ;;  %2722 = vmatpush.msrb.mxu3 %v2687_v26  ;;  %v2885_v25 = vld [vmem:[#allocation5 + $0x3d8] sm:$0xff]  ;;  %v2898_v26 = vunpack.c.l.bf16 %v2886_v18  ;;  %v2825_v30 = vunpack.c.h.bf16 %v2813_v22 }
 0x260   :  { %2774 = vmatpush.msra.mxu0 %v2758_v28  ;;  %2794 = vmatpush.msra.mxu1 %v2759_v29  ;;  %v2812_v28 = vld [vmem:[#allocation5 + $0x390] sm:$0xff]  ;;  %v2824_v29 = vunpack.c.l.bf16 %v2813_v22  ;;  %v2897_v33 = vunpack.c.h.bf16 %v2885_v25 }
 0x261   :  { %2703 = vmatpush.msrb.mxu2 %v2684_v31  ;;  %2723 = vmatpush.msrb.mxu3 %v2685_v32  ;;  %v2884_v31 = vld [vmem:[#allocation5 + $0x3d0] sm:$0xff]  ;;  %v2896_v32 = vunpack.c.l.bf16 %v2885_v25  ;;  %v2823_v36 = vunpack.c.h.bf16 %v2812_v28 }
 0x262   :  { %2775 = vmatpush.msra.mxu0 %v2756_v34  ;;  %2795 = vmatpush.msra.mxu1 %v2757_v35  ;;  %v2811_v34 = vld [vmem:[#allocation5 + $0x388] sm:$0xff]  ;;  %v2822_v35 = vunpack.c.l.bf16 %v2812_v28  ;;  %v2895_v39 = vunpack.c.h.bf16 %v2884_v31 }
 0x263   :  { %2704 = vmatpush.msrb.mxu2 %v2682_v37  ;;  %2724 = vmatpush.msrb.mxu3 %v2683_v38  ;;  %v2883_v37 = vld [vmem:[#allocation5 + $0x3c8] sm:$0xff]  ;;  %v2894_v38 = vunpack.c.l.bf16 %v2884_v31  ;;  %v2821_v41 = vunpack.c.h.bf16 %v2811_v34 }
 0x264   :  { %2776 = vmatpush.msra.mxu0 %v2754_v40  ;;  %2796 = vmatpush.msra.mxu1 %v2755_v8  ;;  %v2810_v40 = vld [vmem:[#allocation5 + $0x380] sm:$0xff]  ;;  %v2820_v8 = vunpack.c.l.bf16 %v2811_v34  ;;  %v2893_v44 = vunpack.c.h.bf16 %v2883_v37 }
 0x265   :  { %2705 = vmatpush.msrb.mxu2 %v2680_v42  ;;  %2725 = vmatpush.msrb.mxu3 %v2681_v43  ;;  %v2882_v42 = vld [vmem:[#allocation5 + $0x3c0] sm:$0xff]  ;;  %v2892_v43 = vunpack.c.l.bf16 %v2883_v37 }
 0x266   :  { %2777 = vmatpush.msra.mxu0 %v2752_v45  ;;  %2797 = vmatpush.msra.mxu1 %v2753_v47  ;;  %v2818_v45 = vunpack.c.l.bf16 %v2810_v40  ;;  %v2819_v47 = vunpack.c.h.bf16 %v2810_v40  ;;  %v2890_v48 = vunpack.c.l.bf16 %v2882_v42 }
 0x267   :  { %2706 = vmatpush.msrb.mxu2 %v2678_v19  ;;  %2726 = vmatpush.msrb.mxu3 %v2679_v49  ;;  %v2891_v19 = vunpack.c.h.bf16 %v2882_v42  ;;  %v2808_v49 = vld [vmem:[#allocation4 + $0x17] ss:$49 sm:$0x3] }
 0x268   :  { %2778 = vmatpush.msra.mxu0 %v2750_v51  ;;  %2798 = vmatpush.msra.mxu1 %v2751_v52  ;;  %v2880_v51 = vld [vmem:[#allocation4 + $0x18] ss:$49 sm:$0x3]  ;;  %v1778_v52 = vpop.f32.mrf.mxu0 }
 0x269   :  { %2707 = vmatpush.msrb.mxu2 %v2676_v46  ;;  %2727 = vmatpush.msrb.mxu3 %v2677_v54 }
 0x26a   :  { %2779 = vmatpush.msra.mxu0 %v2748_v56  ;;  %2799 = vmatpush.msra.mxu1 %v2749_v1  ;;  %v1752_v1 = vld [vmem:[%s4120_s11] sm:$0x3] }
 0x26b   :  { %2708 = vmatpush.msrb.mxu2 %v2674_v57  ;;  %2728 = vmatpush.msrb.mxu3 %v2675_v58  ;;  %v1755_v61 = vperm.slane %v1752_v1, 1 }
 0x26c   :  { %2780 = vmatpush.msra.mxu0 %v2746_v59  ;;  %2800 = vmatpush.msra.mxu1 %v2747_v60  ;;  %v1754_v60 = vperm.slane %v1752_v1, 0 }
 0x26d   :  { %3288 = vmatmul.msk.f32.vlgmr.msrb.gmra.mxu2 %vm1712_vm6, %v2664_v4  ;;  %3289 = vmatmul.msk.f32.vlgmr.msrb.gmra.mxu3 %vm1712_vm6, %v2664_v4 }
 0x26e   :  { %3290 = vmatmul.msk.f32.vlgmr.msra.gmra.mxu0 %vm1712_vm6, %v2736_v9  ;;  %3291 = vmatmul.msk.f32.vlgmr.msra.gmra.mxu1 %vm1712_vm6, %v2736_v9  ;;  %v1779_v63 = vadd.f32 %v1778_v52, %v1754_v60 }
 0x26f   :  { %2845 = vmatpush.msra.mxu2 %v2832_v0  ;;  %2865 = vmatpush.msra.mxu3 %v2833_v2  ;;  %v1799_v0 = vadd.f32 %v1798_v53, %v1755_v61 }
 0x270   :  { %2917 = vmatpush.msrb.mxu0 %v2904_v5  ;;  %2937 = vmatpush.msrb.mxu1 %v2905_v6 }
 0x271   :  { %2846 = vmatpush.msra.mxu2 %v2830_v10  ;;  %2866 = vmatpush.msra.mxu3 %v2831_v11 }
 0x272   :  { %2918 = vmatpush.msrb.mxu0 %v2902_v13  ;;  %2938 = vmatpush.msrb.mxu1 %v2903_v14 }
 0x273   :  { %2847 = vmatpush.msra.mxu2 %v2828_v16  ;;  %2867 = vmatpush.msra.mxu3 %v2829_v17 }
 0x274   :  { %2919 = vmatpush.msrb.mxu0 %v2900_v20  ;;  %2939 = vmatpush.msrb.mxu1 %v2901_v21 }
 0x275   :  { %2848 = vmatpush.msra.mxu2 %v2826_v23  ;;  %2868 = vmatpush.msra.mxu3 %v2827_v24 }
 0x276   :  { %2920 = vmatpush.msrb.mxu0 %v2898_v26  ;;  %2940 = vmatpush.msrb.mxu1 %v2899_v27 }
 0x277   :  { %2849 = vmatpush.msra.mxu2 %v2824_v29  ;;  %2869 = vmatpush.msra.mxu3 %v2825_v30 }
 0x278   :  { %2921 = vmatpush.msrb.mxu0 %v2896_v32  ;;  %2941 = vmatpush.msrb.mxu1 %v2897_v33 }
 0x279   :  { %2850 = vmatpush.msra.mxu2 %v2822_v35  ;;  %2870 = vmatpush.msra.mxu3 %v2823_v36 }
 0x27a   :  { %2922 = vmatpush.msrb.mxu0 %v2894_v38  ;;  %2942 = vmatpush.msrb.mxu1 %v2895_v39 }
 0x27b   :  { %2851 = vmatpush.msra.mxu2 %v2820_v8  ;;  %2871 = vmatpush.msra.mxu3 %v2821_v41 }
 0x27c   :  { %2923 = vmatpush.msrb.mxu0 %v2892_v43  ;;  %2943 = vmatpush.msrb.mxu1 %v2893_v44 }
 0x27d   :  { %2852 = vmatpush.msra.mxu2 %v2818_v45  ;;  %2872 = vmatpush.msra.mxu3 %v2819_v47 }
 0x27e   :  { %2924 = vmatpush.msrb.mxu0 %v2890_v48  ;;  %2944 = vmatpush.msrb.mxu1 %v2891_v19 }
 0x27f   :  { %3292 = vmatmul.msk.f32.vlgmr.msra.gmra.mxu2 %vm1712_vm6, %v2808_v49  ;;  %3293 = vmatmul.msk.f32.vlgmr.msra.gmra.mxu3 %vm1712_vm6, %v2808_v49 }
 0x280   :  { %3294 = vmatmul.msk.f32.vlgmr.msrb.gmra.mxu0 %vm1712_vm6, %v2880_v51  ;;  %3295 = vmatmul.msk.f32.vlgmr.msrb.gmra.mxu1 %vm1712_vm6, %v2880_v51 }
 0x281   :  { %2962 = vrot.lane.b32.xlu0 %v2960_v50, %s3421_s30 }
 0x28f   :  { %v1918_v55 = vpop.f32.mrf.mxu0  ;;  %v1938_v56 = vpop.f32.mrf.mxu1 }
 0x294   :  { %v1846_v46 = vpop.f32.mrf.mxu2  ;;  %v1866_v54 = vpop.f32.mrf.mxu3 }
 0x295   :  { %v1869_v2 = vadd.f32 %v1846_v46, %v1779_v63  ;;  %v1870_v5 = vadd.f32 %v1866_v54, %v1799_v0  ;;  %v2991_v63 = vld [vmem:[%s4121_s12 + $0x38] sm:$0xff]  ;;  %v2990_v0 = vld [vmem:[%s4121_s12 + $0x30] sm:$0xff] }
 0x296   :  { %3006 = vmatpush.msrb.mxu2 %v2991_v63 }
 0x297   :  { %v1941_v7 = vadd.f32 %v1918_v55, %v1869_v2  ;;  %v1942_v10 = vadd.f32 %v1938_v56, %v1870_v5  ;;  %v2989_v2 = vld [vmem:[%s4121_s12 + $0x28] sm:$0xff]  ;;  %v2988_v5 = vld [vmem:[%s4121_s12 + $0x20] sm:$0xff] }
 0x298   :  { %3007 = vmatpush.msrb.mxu2 %v2990_v0 }
 0x299   :  { %v2062_v59 = vpop.f32.mrf.mxu0  ;;  %v2082_v62 = vpop.f32.mrf.mxu1 }
 0x29a   :  { %3008 = vmatpush.msrb.mxu2 %v2989_v2 }
 0x29c   :  { %3009 = vmatpush.msrb.mxu2 %v2988_v5 }
 0x29e   :  { %v1990_v57 = vpop.f32.mrf.mxu2  ;;  %v2010_v58 = vpop.f32.mrf.mxu3 }
 0x29f   :  { %v2013_v9 = vadd.f32 %v1990_v57, %v1941_v7  ;;  %v2014_v12 = vadd.f32 %v2010_v58, %v1942_v10  ;;  %v2986_v7 = vld [vmem:[%s4121_s12 + $0x10] sm:$0xff] }
 0x2a1   :  { %v2085_v15 = vadd.f32 %v2062_v59, %v2013_v9  ;;  %v2086_v18 = vadd.f32 %v2082_v62, %v2014_v12  ;;  %v2985_v9 = vld [vmem:[%s4121_s12 + $0x8] sm:$0xff]  ;;  %v2984_v12 = vld [vmem:[%s4121_s12] sm:$0xff] }
 0x2a5   :  { %v2206_v6 = vpop.f32.mrf.mxu0  ;;  %v2226_v11 = vpop.f32.mrf.mxu1 }
 0x2aa   :  { %v2134_v3 = vpop.f32.mrf.mxu2  ;;  %v2154_v4 = vpop.f32.mrf.mxu3 }
 0x2ab   :  { %v2157_v17 = vadd.f32 %v2134_v3, %v2085_v15  ;;  %v2158_v20 = vadd.f32 %v2154_v4, %v2086_v18 }
 0x2ad   :  { %v2229_v22 = vadd.f32 %v2206_v6, %v2157_v17  ;;  %v2230_v26 = vadd.f32 %v2226_v11, %v2158_v20  ;;  %v2987_v6 = vld [vmem:[%s4121_s12 + $0x18] sm:$0xff] }
 0x2ae   :  { %3010 = vmatpush.msrb.mxu2 %v2987_v6 }
 0x2b0   :  { %3011 = vmatpush.msrb.mxu2 %v2986_v7 }
 0x2b2   :  { %3012 = vmatpush.msrb.mxu2 %v2985_v9 }
 0x2b4   :  { %3013 = vmatpush.msrb.mxu2 %v2984_v12 }
 0x2b5   :  { %v2350_v16 = vpop.f32.mrf.mxu0  ;;  %v2370_v21 = vpop.f32.mrf.mxu1 }
 0x2ba   :  { %v2278_v13 = vpop.f32.mrf.mxu2  ;;  %v2298_v14 = vpop.f32.mrf.mxu3 }
 0x2bb   :  { %v2301_v25 = vadd.f32 %v2278_v13, %v2229_v22  ;;  %v2302_v28 = vadd.f32 %v2298_v14, %v2230_v26  ;;  %v3307_v22 = vld [vmem:[%s4122_s13] ss:$0 sm:$0xff] }
 0x2bd   :  { %v2373_v29 = vadd.f32 %v2350_v16, %v2301_v25  ;;  %v2374_v32 = vadd.f32 %v2370_v21, %v2302_v28 }
 0x2c7   :  { %v2494_v27 = vpop.f32.mrf.mxu0  ;;  %v2514_v30 = vpop.f32.mrf.mxu1 }
 0x2cc   :  { %v2422_v23 = vpop.f32.mrf.mxu2  ;;  %v2442_v24 = vpop.f32.mrf.mxu3 }
 0x2cd   :  { %v2445_v31 = vadd.f32 %v2422_v23, %v2373_v29  ;;  %v2446_v35 = vadd.f32 %v2442_v24, %v2374_v32 }
 0x2cf   :  { %v2517_v37 = vadd.f32 %v2494_v27, %v2445_v31  ;;  %v2518_v39 = vadd.f32 %v2514_v30, %v2446_v35 }
 0x2d9   :  { %v2638_v36 = vpop.f32.mrf.mxu0  ;;  %v2658_v40 = vpop.f32.mrf.mxu1 }
 0x2de   :  { %v2566_v33 = vpop.f32.mrf.mxu2  ;;  %v2586_v34 = vpop.f32.mrf.mxu3 }
 0x2df   :  { %v2589_v38 = vadd.f32 %v2566_v33, %v2517_v37  ;;  %v2590_v8 = vadd.f32 %v2586_v34, %v2518_v39 }
 0x2e1   :  { %v2661_v43 = vadd.f32 %v2638_v36, %v2589_v38  ;;  %v2662_v47 = vadd.f32 %v2658_v40, %v2590_v8 }
 0x2eb   :  { %v2782_v44 = vpop.f32.mrf.mxu0  ;;  %v2802_v19 = vpop.f32.mrf.mxu1 }
 0x2f0   :  { %v2710_v41 = vpop.f32.mrf.mxu2  ;;  %v2730_v42 = vpop.f32.mrf.mxu3 }
 0x2f1   :  { %v2733_v45 = vadd.f32 %v2710_v41, %v2661_v43  ;;  %v2734_v48 = vadd.f32 %v2730_v42, %v2662_v47 }
 0x2f3   :  { %v2805_v49 = vadd.f32 %v2782_v44, %v2733_v45  ;;  %v2806_v53 = vadd.f32 %v2802_v19, %v2734_v48  ;;  %v2963_v4 = vpop.permute.xlu0 %2962 }
 0x2fd   :  { %v2926_v46 = vpop.f32.mrf.mxu0  ;;  %v2946_v1 = vpop.f32.mrf.mxu1 }
 0x302   :  { %v2854_v50 = vpop.f32.mrf.mxu2  ;;  %v2874_v51 = vpop.f32.mrf.mxu3 }
 0x303   :  { %v2877_v52 = vadd.f32 %v2854_v50, %v2805_v49  ;;  %v2878_v55 = vadd.f32 %v2874_v51, %v2806_v53 }
 0x305   :  { %v2949_v54 = vadd.f32 %v2926_v46, %v2877_v52  ;;  %v2950_v57 = vadd.f32 %v2946_v1, %v2878_v55 }
 0x307   :  { %v2951_v56 = vmul.f32 0.5, %v2949_v54  ;;  %v2956_v3 = vmul.f32 0.5, %v2950_v57 }
 0x309   :  { %3308 = vtanh.f32 %v2951_v56 }
 0x30a   :  { %3310 = vtanh.f32 %v2950_v57 }
 0x30b   :  { %3312 = vtanh.f32 %v2956_v3 }
 0x30f   :  { %v3309_v58 = vpop.eup %3308 }
 0x310   :  { %v2953_v59 = vadd.f32 1.0, %v3309_v58  ;;  %v3311_v61 = vpop.eup %3310 }
 0x311   :  { %v3313_v13 = vpop.eup %3312 }
 0x312   :  { %v2954_v60 = vmul.f32 0.5, %v2953_v59  ;;  %v2958_v15 = vadd.f32 1.0, %v3313_v13 }
 0x314   :  { %v2966_v62 = vmul.f32 %v3311_v61, %v2954_v60  ;;  %v2965_v10 = vmul.f32 %v2963_v4, %v2954_v60  ;;  %v2959_v16 = vmul.f32 0.5, %v2958_v15 }
 0x316   :  { %2968 = vrot.lane.b32.xlu0 %v2966_v62, %s3421_s30 }
 0x388   :  { %v2969_v11 = vpop.permute.xlu0 %2968 }
 0x389   :  { %v2971_v14 = vadd.f32 %v2969_v11, %v2965_v10 }
 0x38b   :  { %3314 = vtanh.f32 %v2971_v14 }
 0x391   :  { %v3315_v17 = vpop.eup %3314 }
 0x392   :  { %v2973_v18 = vmul.f32 %v3315_v17, %v2959_v16 }
 0x394   :  { %2980 = vrot.lane.b32.xlu1 %v2973_v18, %s3421_s30 }
 0x39c   :  { %2975 = vrot.lane.b32.xlu1 %v2971_v14, %s3421_s30  ;;  %s3423_s30 = smov [#allocation11]  }
 0x39d   :  { %s3048_s0 = sshll.u32 %s3423_s30, 4  ;;  %s3049_s0 = int_to_ptr.vmem [resolvable:$true] %s3048_s0 }
 0x406   :  { %v2981_v20 = vpop.permute.xlu1 %2980 }
 0x407   :  { %2983 = vst.msk [vmem:[#allocation9] sm:$0x3] %vm1725_vm7, %v2981_v20  ;;  %3296 = vmatmul.msk.f32.vlgmr.msrb.gmra.mxu2 %vm1712_vm6, %v2981_v20 }
 0x408   :  { %3042 = dma.vmem_to_hbm [thread:$0]  %s3038_s8, 32, %s3040_s28, [#allocation10]  }
 0x40e   :  { %v2976_v21 = vpop.permute.xlu1 %2975 }
 0x40f   :  { %2978 = vst.msk [vmem:[#allocation11] sm:$0x3] %vm1725_vm7, %v2976_v21 }
 0x410   :  { %3053 = dma.vmem_to_hbm [thread:$0]  %s3049_s0, 32, %s3051_s3, [#allocation10]  }
 0x48a   :  { %v3015_v23 = vpop.f32.mrf.mxu2 }
 0x48b   :  { %v3016_v24 = vadd.f32 %v3307_v22, %v3015_v23 }
 0x48d   :  { %v3018_v25 = vmax.f32 %v3016_v24, 0.0 }
 0x48f   :  { %3020 = vst.msk [vmem:[#allocation8] sm:$0x3] %vm3019_vm8, %v3018_v25 }
 0x490   :  { %3031 = dma.vmem_to_hbm [thread:$0]  %s3027_s6, 32, %s3029_s18, [#allocation7]  }
 0x491   :  { %3414 = dma.done.wait [#allocation7], 32  }
 0x492   :  { %3415 = vsyncadd [#allocation7], 4294967264 }
 0x493   :  { %3416 = dma.done.wait [#allocation10], 64  }
 0x494   :  { %3417 = vsyncadd [#allocation10], 4294967232 }
 0x495   :  { %3066 = vsyncpa [#allocation6], 1 }
 0x496   :  { %3067 = vsyncpa [#allocation7], 1 }
 0x497   :  { %3068 = vsyncpa [#allocation10], 1 }

</bundles_post_ra>
